<compile_context>
chip_gen: v7x
topology: tpu7x:2x2x1
jax: 0.10.0
libtpu: 0.0.40
codegen_flags: <defaults>
</compile_context>

<pallas_src>
import math

import jax
import jax.numpy as jnp
from jax.experimental import pallas as pl
from jax.experimental.pallas import tpu as pltpu


# -----------------------------------------------------------------------------
# Kernel
# -----------------------------------------------------------------------------
def _make_kernel(n_heads, head_dim, n_params):

    def layer_norm(x, g, b):
        mu = jnp.mean(x, axis=-1, keepdims=True)
        var = jnp.mean((x - mu) ** 2, axis=-1, keepdims=True)
        return (x - mu) * jax.lax.rsqrt(var + 1e-5) * g + b

    def project_heads(x_b, w_h, b_h):
        # x_b: (T, H) bf16; w_h: (nH, H, hd) bf16; b_h: (nH, 1, hd) f32
        outs = [jnp.dot(x_b, w_h[h], preferred_element_type=jnp.float32) + b_h[h]
                for h in range(n_heads)]
        return jnp.stack(outs, axis=0)                       # (nH, T, hd) f32

    def mha(x_q, x_kv, mask_add, wq, bq, wk, bk, wv, bv, wo, bo):
        # x_q: (Tq, H) f32; x_kv: (Tk, H) f32; mask_add additive, broadcastable to (Tq, Tk)
        xq_b = x_q.astype(jnp.bfloat16)
        xk_b = x_kv.astype(jnp.bfloat16)
        q = project_heads(xq_b, wq, bq).astype(jnp.bfloat16)   # (nH, Tq, hd)
        k = project_heads(xk_b, wk, bk).astype(jnp.bfloat16)   # (nH, Tk, hd)
        v = project_heads(xk_b, wv, bv).astype(jnp.bfloat16)   # (nH, Tk, hd)

        # 1/sqrt(head_dim) is already folded into wq/bq by the wrapper.
        energy = jnp.einsum('hqd,hkd->hqk', q, k,
                            preferred_element_type=jnp.float32)       # (nH, Tq, Tk)
        energy = energy + mask_add[None, :, :]                        # additive mask
        m = jnp.max(energy, axis=-1, keepdims=True)
        p = jnp.exp(energy - m)
        denom = jnp.sum(p, axis=-1, keepdims=True)
        attn = p * pl.reciprocal(denom, approx=True)                  # f32 probs

        ctx = jnp.einsum('hqk,hkd->hqd', attn.astype(jnp.bfloat16), v,
                         preferred_element_type=jnp.float32)          # (nH, Tq, hd)

        # Output projection, accumulated per head (no lane-dim concatenate).
        out = bo                                                       # (1, H)
        for h in range(n_heads):
            out = out + jnp.dot(ctx[h].astype(jnp.bfloat16), wo[h],
                                preferred_element_type=jnp.float32)
        return out, attn

    def kernel(trgq_ref, trgkv_ref, enc_ref, tmask_ref, smask_ref, *refs):
        param_refs = refs[:n_params]
        out_ref, attn_ref = refs[n_params], refs[n_params + 1]
        (sa_wq, sa_bq, sa_wk, sa_bk, sa_wv, sa_bv, sa_wo, sa_bo,
         ea_wq, ea_bq, ea_wk, ea_bk, ea_wv, ea_bv, ea_wo, ea_bo,
         ln1_g, ln1_b, ln2_g, ln2_b, ln3_g, ln3_b,
         ff_w1, ff_b1, ff_w2, ff_b2) = [r[...] for r in param_refs]

        trg_q = trgq_ref[0]          # (TQ, H)  query-row tile
        trg_kv = trgkv_ref[0]        # (T, H)   full keys/values for self-attention
        enc = enc_ref[0]             # (S, H)
        tmask = tmask_ref[0, 0]      # (TQ, T)  additive causal mask
        smask = smask_ref[0, 0]      # (1, S)   additive source mask

        # 1) masked self-attention + residual + LayerNorm
        # TODO(synk): per-tile recompute of the self-attention K/V projection of the
        #             full target sequence; hoist to a scratch carry if T gets large.
        sa_out, _ = mha(trg_q, trg_kv, tmask,
                        sa_wq, sa_bq, sa_wk, sa_bk, sa_wv, sa_bv, sa_wo, sa_bo)
        t1 = layer_norm(trg_q + sa_out, ln1_g, ln1_b)

        # 2) encoder cross-attention + residual + LayerNorm
        ea_out, attn = mha(t1, enc, smask,
                           ea_wq, ea_bq, ea_wk, ea_bk, ea_wv, ea_bv, ea_wo, ea_bo)
        t2 = layer_norm(t1 + ea_out, ln2_g, ln2_b)

        # 3) position-wise feed-forward + residual + LayerNorm
        h1 = jnp.maximum(
            jnp.dot(t2.astype(jnp.bfloat16), ff_w1,
                    preferred_element_type=jnp.float32) + ff_b1, 0.0)
        ff = jnp.dot(h1.astype(jnp.bfloat16), ff_w2,
                     preferred_element_type=jnp.float32) + ff_b2
        t3 = layer_norm(t2 + ff, ln3_g, ln3_b)

        out_ref[0] = t3.astype(out_ref.dtype)
        attn_ref[0] = attn.astype(attn_ref.dtype)   # single lane-dense store, all heads

    return kernel


# -----------------------------------------------------------------------------
# Wrapper-side parameter prep (scale folding, head split, bf16 matmul weights)
# -----------------------------------------------------------------------------
def _prepare_params(params, n_heads):
    (sa_wq, sa_bq, sa_wk, sa_bk, sa_wv, sa_bv, sa_wo, sa_bo,
     ea_wq, ea_bq, ea_wk, ea_bk, ea_wv, ea_bv, ea_wo, ea_bo,
     ln1_g, ln1_b, ln2_g, ln2_b, ln3_g, ln3_b,
     ff_w1, ff_b1, ff_w2, ff_b2) = params
    H = sa_wq.shape[0]
    hd = H // n_heads
    scale = math.sqrt(hd)

    def split_in_w(w):   # (H, H) in->out  ->  (nH, H, hd) bf16
        return jnp.transpose(w.reshape(H, n_heads, hd), (1, 0, 2)).astype(jnp.bfloat16)

    def split_b(b):      # (1, H) -> (nH, 1, hd) f32
        return b.reshape(n_heads, hd)[:, None, :].astype(jnp.float32)

    def split_out_w(w):  # (H, H) -> (nH, hd, H) bf16 (input rows grouped per head)
        return w.reshape(n_heads, hd, H).astype(jnp.bfloat16)

    def attn_params(wq, bq, wk, bk, wv, bv, wo, bo):
        # Fold 1/sqrt(head_dim) into the query projection.
        return (split_in_w(wq / scale), split_b(bq / scale),
                split_in_w(wk), split_b(bk),
                split_in_w(wv), split_b(bv),
                split_out_w(wo), bo.astype(jnp.float32))

    return (
        *attn_params(sa_wq, sa_bq, sa_wk, sa_bk, sa_wv, sa_bv, sa_wo, sa_bo),
        *attn_params(ea_wq, ea_bq, ea_wk, ea_bk, ea_wv, ea_bv, ea_wo, ea_bo),
        ln1_g, ln1_b, ln2_g, ln2_b, ln3_g, ln3_b,
        ff_w1.astype(jnp.bfloat16), ff_b1, ff_w2.astype(jnp.bfloat16), ff_b2,
    )


# -----------------------------------------------------------------------------
# Wrapper
# -----------------------------------------------------------------------------
def decoder_layer(trg, enc_src, trg_mask, src_mask, params, n_heads):
    B, T, H = trg.shape
    S = enc_src.shape[1]
    assert H % n_heads == 0
    head_dim = H // n_heads

    # Target-sequence (query-row) tile.
    if T <= 128:
        TQ = T
    elif T % 128 == 0:
        TQ = 128
    else:
        # TODO(synk): pad T to a multiple of 128 instead of falling back to one tile.
        TQ = T
    n_q = T // TQ

    prepped = _prepare_params(params, n_heads)
    n_params = len(prepped)
    kernel = _make_kernel(n_heads, head_dim, n_params)

    # Additive masks: 0 where kept, -1e10 where masked (matches masked_fill(-1e10)).
    tmask_add = (trg_mask.astype(jnp.float32) - 1.0) * 1e10
    smask_add = (src_mask.astype(jnp.float32) - 1.0) * 1e10

    def const_spec(p):
        nd = p.ndim
        # Constant index_map -> same block across the whole grid (no re-DMA of weights).
        # TODO(synk): single-buffer the weights (pipeline_mode=pl.Buffered(1)) to halve
        #             their VMEM footprint once verified on the target jax version.
        return pl.BlockSpec(p.shape, lambda b, q, nd=nd: (0,) * nd)

    in_specs = [
        pl.BlockSpec((1, TQ, H), lambda b, q: (b, q, 0)),         # trg query-row tile
        pl.BlockSpec((1, T, H), lambda b, q: (b, 0, 0)),          # trg full (self-attn K/V)
        pl.BlockSpec((1, S, H), lambda b, q: (b, 0, 0)),          # encoder output
        pl.BlockSpec((1, 1, TQ, T), lambda b, q: (b, 0, q, 0)),   # additive causal mask
        pl.BlockSpec((1, 1, 1, S), lambda b, q: (b, 0, 0, 0)),    # additive source mask
    ] + [const_spec(p) for p in prepped]

    out_specs = [
        pl.BlockSpec((1, TQ, H), lambda b, q: (b, q, 0)),
        pl.BlockSpec((1, n_heads, TQ, S), lambda b, q: (b, 0, q, 0)),
    ]
    out_shape = (
        jax.ShapeDtypeStruct((B, T, H), jnp.float32),
        jax.ShapeDtypeStruct((B, n_heads, T, S), jnp.float32),
    )
    return pl.pallas_call(
        kernel,
        grid=(B, n_q),
        in_specs=in_specs,
        out_specs=out_specs,
        out_shape=out_shape,
        compiler_params=pltpu.CompilerParams(
            dimension_semantics=("parallel", "parallel"),
            vmem_limit_bytes=48 * 1024 * 1024,   # headroom under v7x's 64 MiB physical VMEM
        ),
    )(trg, trg, enc_src, tmask_add, smask_add, *prepped)


# -----------------------------------------------------------------------------
# Deterministic parameter init (synthetic; Linear stored as (in, out))
# -----------------------------------------------------------------------------
def init_params(key, hid_dim, pf_dim):
    def lin(k, fin, fout):
        kw, kb = jax.random.split(k)
        w = jax.random.normal(kw, (fin, fout), jnp.float32) / math.sqrt(fin)
        b = 0.01 * jax.random.normal(kb, (1, fout), jnp.float32)
        return w, b

    keys = jax.random.split(key, 16)
    params = []
    for i in range(4):                               # self-attention: q, k, v, o
        params += list(lin(keys[i], hid_dim, hid_dim))
    for i in range(4):                               # encoder attention: q, k, v, o
        params += list(lin(keys[4 + i], hid_dim, hid_dim))
    for _ in range(3):                               # 3 LayerNorms (gamma=1, beta=0)
        params += [jnp.ones((1, hid_dim), jnp.float32),
                   jnp.zeros((1, hid_dim), jnp.float32)]
    params += list(lin(keys[8], hid_dim, pf_dim))    # feed-forward
    params += list(lin(keys[9], pf_dim, hid_dim))
    return tuple(params)


# -----------------------------------------------------------------------------
# Pure-JAX reference (mirrors the PyTorch forward, dropout = identity)
# -----------------------------------------------------------------------------
def reference(trg, enc_src, trg_mask, src_mask, params, n_heads):
    (sa_wq, sa_bq, sa_wk, sa_bk, sa_wv, sa_bv, sa_wo, sa_bo,
     ea_wq, ea_bq, ea_wk, ea_bk, ea_wv, ea_bv, ea_wo, ea_bo,
     ln1_g, ln1_b, ln2_g, ln2_b, ln3_g, ln3_b,
     ff_w1, ff_b1, ff_w2, ff_b2) = params

    def layer_norm(x, g, b):
        mu = jnp.mean(x, axis=-1, keepdims=True)
        var = jnp.mean((x - mu) ** 2, axis=-1, keepdims=True)
        return (x - mu) * jax.lax.rsqrt(var + 1e-5) * g + b

    def mha(q_in, k_in, v_in, mask, wq, bq, wk, bk, wv, bv, wo, bo):
        B, Tq, H = q_in.shape
        Tk = k_in.shape[1]
        hd = H // n_heads
        Q = (q_in @ wq + bq).reshape(B, Tq, n_heads, hd).transpose(0, 2, 1, 3)
        K = (k_in @ wk + bk).reshape(B, Tk, n_heads, hd).transpose(0, 2, 1, 3)
        V = (v_in @ wv + bv).reshape(B, Tk, n_heads, hd).transpose(0, 2, 1, 3)
        energy = jnp.einsum('bhqd,bhkd->bhqk', Q, K) / math.sqrt(hd)
        energy = jnp.where(mask == 0, -1e10, energy)
        attn = jax.nn.softmax(energy, axis=-1)
        x = jnp.einsum('bhqk,bhkd->bhqd', attn, V)
        x = x.transpose(0, 2, 1, 3).reshape(B, Tq, H)
        return x @ wo + bo, attn

    sa_out, _ = mha(trg, trg, trg, trg_mask,
                    sa_wq, sa_bq, sa_wk, sa_bk, sa_wv, sa_bv, sa_wo, sa_bo)
    t1 = layer_norm(trg + sa_out, ln1_g, ln1_b)
    ea_out, attn = mha(t1, enc_src, enc_src, src_mask,
                       ea_wq, ea_bq, ea_wk, ea_bk, ea_wv, ea_bv, ea_wo, ea_bo)
    t2 = layer_norm(t1 + ea_out, ln2_g, ln2_b)
    ff = jnp.maximum(t2 @ ff_w1 + ff_b1, 0.0) @ ff_w2 + ff_b2
    t3 = layer_norm(t2 + ff, ln3_g, ln3_b)
    return t3, attn


# -----------------------------------------------------------------------------
if __name__ == "__main__":
    B, T, S, H, N_HEADS, PF = 2, 8, 10, 32, 4, 64

    key = jax.random.PRNGKey(0)
    k_trg, k_enc, k_par = jax.random.split(key, 3)

    trg = jax.random.normal(k_trg, (B, T, H), jnp.float32)
    enc_src = jax.random.normal(k_enc, (B, S, H), jnp.float32)

    # causal target mask [B,1,T,T]; source mask [B,1,1,S] with last 2 keys masked
    trg_mask = jnp.broadcast_to(
        jnp.tril(jnp.ones((T, T), jnp.float32))[None, None], (B, 1, T, T))
    src_mask = jnp.concatenate(
        [jnp.ones((B, 1, 1, S - 2), jnp.float32),
         jnp.zeros((B, 1, 1, 2), jnp.float32)], axis=-1)

    params = init_params(k_par, H, PF)

    out, attn = decoder_layer(trg, enc_src, trg_mask, src_mask, params, N_HEADS)
    out, attn = jax.block_until_ready((out, attn))

    ref_out, ref_attn = reference(trg, enc_src, trg_mask, src_mask, params, N_HEADS)
    assert out.shape == (B, T, H) and attn.shape == (B, N_HEADS, T, S)
    # bf16 MXU inputs (f32 accumulation) vs. the pure-f32 reference -> looser tolerance.
    assert jnp.allclose(out, ref_out, rtol=5e-2, atol=5e-2)
    assert jnp.allclose(attn, ref_attn, rtol=5e-2, atol=5e-2)

    print("KERNEL_OK")
</pallas_src>

<mosaic_0001>
module attributes {stable_mosaic.version = 11 : i64} {
  func.func @kernel(%arg0: i32, %arg1: i32, %arg2: memref<1x8x32xf32, #tpu.memory_space<vmem>>, %arg3: memref<1x8x32xf32, #tpu.memory_space<vmem>>, %arg4: memref<1x10x32xf32, #tpu.memory_space<vmem>>, %arg5: memref<1x1x8x8xf32, #tpu.memory_space<vmem>>, %arg6: memref<1x1x1x10xf32, #tpu.memory_space<vmem>>, %arg7: memref<4x32x8xbf16, #tpu.memory_space<vmem>>, %arg8: memref<4x1x8xf32, #tpu.memory_space<vmem>>, %arg9: memref<4x32x8xbf16, #tpu.memory_space<vmem>>, %arg10: memref<4x1x8xf32, #tpu.memory_space<vmem>>, %arg11: memref<4x32x8xbf16, #tpu.memory_space<vmem>>, %arg12: memref<4x1x8xf32, #tpu.memory_space<vmem>>, %arg13: memref<4x8x32xbf16, #tpu.memory_space<vmem>>, %arg14: memref<1x32xf32, #tpu.memory_space<vmem>>, %arg15: memref<4x32x8xbf16, #tpu.memory_space<vmem>>, %arg16: memref<4x1x8xf32, #tpu.memory_space<vmem>>, %arg17: memref<4x32x8xbf16, #tpu.memory_space<vmem>>, %arg18: memref<4x1x8xf32, #tpu.memory_space<vmem>>, %arg19: memref<4x32x8xbf16, #tpu.memory_space<vmem>>, %arg20: memref<4x1x8xf32, #tpu.memory_space<vmem>>, %arg21: memref<4x8x32xbf16, #tpu.memory_space<vmem>>, %arg22: memref<1x32xf32, #tpu.memory_space<vmem>>, %arg23: memref<1x32xf32, #tpu.memory_space<vmem>>, %arg24: memref<1x32xf32, #tpu.memory_space<vmem>>, %arg25: memref<1x32xf32, #tpu.memory_space<vmem>>, %arg26: memref<1x32xf32, #tpu.memory_space<vmem>>, %arg27: memref<1x32xf32, #tpu.memory_space<vmem>>, %arg28: memref<1x32xf32, #tpu.memory_space<vmem>>, %arg29: memref<32x64xbf16, #tpu.memory_space<vmem>>, %arg30: memref<1x64xf32, #tpu.memory_space<vmem>>, %arg31: memref<64x32xbf16, #tpu.memory_space<vmem>>, %arg32: memref<1x32xf32, #tpu.memory_space<vmem>>, %arg33: memref<1x8x32xf32, #tpu.memory_space<vmem>>, %arg34: memref<1x4x8x10xf32, #tpu.memory_space<vmem>>) attributes {dimension_semantics = [#tpu.dimension_semantics<parallel>, #tpu.dimension_semantics<parallel>], iteration_bounds = array<i64: 2, 1>, scalar_prefetch = 0 : i64, scratch_operands = 0 : i64, tpu.core_type = #tpu.core_type<tc>, window_params = [{transform_indices = @transform_0, window_bounds = array<i64: 1, 8, 32>}, {transform_indices = @transform_1, window_bounds = array<i64: 1, 8, 32>}, {transform_indices = @transform_2, window_bounds = array<i64: 1, 10, 32>}, {transform_indices = @transform_3, window_bounds = array<i64: 1, 1, 8, 8>}, {transform_indices = @transform_4, window_bounds = array<i64: 1, 1, 1, 10>}, {pipeline_mode = #tpu.pipeline_mode<synchronous>, transform_indices = @transform_5, window_bounds = array<i64: 4, 32, 8>}, {pipeline_mode = #tpu.pipeline_mode<synchronous>, transform_indices = @transform_6, window_bounds = array<i64: 4, 1, 8>}, {pipeline_mode = #tpu.pipeline_mode<synchronous>, transform_indices = @transform_7, window_bounds = array<i64: 4, 32, 8>}, {pipeline_mode = #tpu.pipeline_mode<synchronous>, transform_indices = @transform_8, window_bounds = array<i64: 4, 1, 8>}, {pipeline_mode = #tpu.pipeline_mode<synchronous>, transform_indices = @transform_9, window_bounds = array<i64: 4, 32, 8>}, {pipeline_mode = #tpu.pipeline_mode<synchronous>, transform_indices = @transform_10, window_bounds = array<i64: 4, 1, 8>}, {pipeline_mode = #tpu.pipeline_mode<synchronous>, transform_indices = @transform_11, window_bounds = array<i64: 4, 8, 32>}, {pipeline_mode = #tpu.pipeline_mode<synchronous>, transform_indices = @transform_12, window_bounds = array<i64: 1, 32>}, {pipeline_mode = #tpu.pipeline_mode<synchronous>, transform_indices = @transform_13, window_bounds = array<i64: 4, 32, 8>}, {pipeline_mode = #tpu.pipeline_mode<synchronous>, transform_indices = @transform_14, window_bounds = array<i64: 4, 1, 8>}, {pipeline_mode = #tpu.pipeline_mode<synchronous>, transform_indices = @transform_15, window_bounds = array<i64: 4, 32, 8>}, {pipeline_mode = #tpu.pipeline_mode<synchronous>, transform_indices = @transform_16, window_bounds = array<i64: 4, 1, 8>}, {pipeline_mode = #tpu.pipeline_mode<synchronous>, transform_indices = @transform_17, window_bounds = array<i64: 4, 32, 8>}, {pipeline_mode = #tpu.pipeline_mode<synchronous>, transform_indices = @transform_18, window_bounds = array<i64: 4, 1, 8>}, {pipeline_mode = #tpu.pipeline_mode<synchronous>, transform_indices = @transform_19, window_bounds = array<i64: 4, 8, 32>}, {pipeline_mode = #tpu.pipeline_mode<synchronous>, transform_indices = @transform_20, window_bounds = array<i64: 1, 32>}, {pipeline_mode = #tpu.pipeline_mode<synchronous>, transform_indices = @transform_21, window_bounds = array<i64: 1, 32>}, {pipeline_mode = #tpu.pipeline_mode<synchronous>, transform_indices = @transform_22, window_bounds = array<i64: 1, 32>}, {pipeline_mode = #tpu.pipeline_mode<synchronous>, transform_indices = @transform_23, window_bounds = array<i64: 1, 32>}, {pipeline_mode = #tpu.pipeline_mode<synchronous>, transform_indices = @transform_24, window_bounds = array<i64: 1, 32>}, {pipeline_mode = #tpu.pipeline_mode<synchronous>, transform_indices = @transform_25, window_bounds = array<i64: 1, 32>}, {pipeline_mode = #tpu.pipeline_mode<synchronous>, transform_indices = @transform_26, window_bounds = array<i64: 1, 32>}, {pipeline_mode = #tpu.pipeline_mode<synchronous>, transform_indices = @transform_27, window_bounds = array<i64: 32, 64>}, {pipeline_mode = #tpu.pipeline_mode<synchronous>, transform_indices = @transform_28, window_bounds = array<i64: 1, 64>}, {pipeline_mode = #tpu.pipeline_mode<synchronous>, transform_indices = @transform_29, window_bounds = array<i64: 64, 32>}, {pipeline_mode = #tpu.pipeline_mode<synchronous>, transform_indices = @transform_30, window_bounds = array<i64: 1, 32>}, {transform_indices = @transform_31, window_bounds = array<i64: 1, 8, 32>}, {transform_indices = @transform_32, window_bounds = array<i64: 1, 4, 8, 10>}]} {
    %c0 = arith.constant 0 : index
    %c0_0 = arith.constant 0 : index
    %c0_1 = arith.constant 0 : index
    %0 = vector.load %arg7[%c0, %c0_0, %c0_1] : memref<4x32x8xbf16, #tpu.memory_space<vmem>>, vector<4x32x8xbf16>
    %c0_2 = arith.constant 0 : index
    %c0_3 = arith.constant 0 : index
    %c0_4 = arith.constant 0 : index
    %1 = vector.load %arg8[%c0_2, %c0_3, %c0_4] : memref<4x1x8xf32, #tpu.memory_space<vmem>>, vector<4x1x8xf32>
    %c0_5 = arith.constant 0 : index
    %c0_6 = arith.constant 0 : index
    %c0_7 = arith.constant 0 : index
    %2 = vector.load %arg9[%c0_5, %c0_6, %c0_7] : memref<4x32x8xbf16, #tpu.memory_space<vmem>>, vector<4x32x8xbf16>
    %c0_8 = arith.constant 0 : index
    %c0_9 = arith.constant 0 : index
    %c0_10 = arith.constant 0 : index
    %3 = vector.load %arg10[%c0_8, %c0_9, %c0_10] : memref<4x1x8xf32, #tpu.memory_space<vmem>>, vector<4x1x8xf32>
    %c0_11 = arith.constant 0 : index
    %c0_12 = arith.constant 0 : index
    %c0_13 = arith.constant 0 : index
    %4 = vector.load %arg11[%c0_11, %c0_12, %c0_13] : memref<4x32x8xbf16, #tpu.memory_space<vmem>>, vector<4x32x8xbf16>
    %c0_14 = arith.constant 0 : index
    %c0_15 = arith.constant 0 : index
    %c0_16 = arith.constant 0 : index
    %5 = vector.load %arg12[%c0_14, %c0_15, %c0_16] : memref<4x1x8xf32, #tpu.memory_space<vmem>>, vector<4x1x8xf32>
    %c0_17 = arith.constant 0 : index
    %c0_18 = arith.constant 0 : index
    %c0_19 = arith.constant 0 : index
    %6 = vector.load %arg13[%c0_17, %c0_18, %c0_19] : memref<4x8x32xbf16, #tpu.memory_space<vmem>>, vector<4x8x32xbf16>
    %c0_20 = arith.constant 0 : index
    %c0_21 = arith.constant 0 : index
    %7 = vector.load %arg14[%c0_20, %c0_21] : memref<1x32xf32, #tpu.memory_space<vmem>>, vector<1x32xf32>
    %c0_22 = arith.constant 0 : index
    %c0_23 = arith.constant 0 : index
    %c0_24 = arith.constant 0 : index
    %8 = vector.load %arg15[%c0_22, %c0_23, %c0_24] : memref<4x32x8xbf16, #tpu.memory_space<vmem>>, vector<4x32x8xbf16>
    %c0_25 = arith.constant 0 : index
    %c0_26 = arith.constant 0 : index
    %c0_27 = arith.constant 0 : index
    %9 = vector.load %arg16[%c0_25, %c0_26, %c0_27] : memref<4x1x8xf32, #tpu.memory_space<vmem>>, vector<4x1x8xf32>
    %c0_28 = arith.constant 0 : index
    %c0_29 = arith.constant 0 : index
    %c0_30 = arith.constant 0 : index
    %10 = vector.load %arg17[%c0_28, %c0_29, %c0_30] : memref<4x32x8xbf16, #tpu.memory_space<vmem>>, vector<4x32x8xbf16>
    %c0_31 = arith.constant 0 : index
    %c0_32 = arith.constant 0 : index
    %c0_33 = arith.constant 0 : index
    %11 = vector.load %arg18[%c0_31, %c0_32, %c0_33] : memref<4x1x8xf32, #tpu.memory_space<vmem>>, vector<4x1x8xf32>
    %c0_34 = arith.constant 0 : index
    %c0_35 = arith.constant 0 : index
    %c0_36 = arith.constant 0 : index
    %12 = vector.load %arg19[%c0_34, %c0_35, %c0_36] : memref<4x32x8xbf16, #tpu.memory_space<vmem>>, vector<4x32x8xbf16>
    %c0_37 = arith.constant 0 : index
    %c0_38 = arith.constant 0 : index
    %c0_39 = arith.constant 0 : index
    %13 = vector.load %arg20[%c0_37, %c0_38, %c0_39] : memref<4x1x8xf32, #tpu.memory_space<vmem>>, vector<4x1x8xf32>
    %c0_40 = arith.constant 0 : index
    %c0_41 = arith.constant 0 : index
    %c0_42 = arith.constant 0 : index
    %14 = vector.load %arg21[%c0_40, %c0_41, %c0_42] : memref<4x8x32xbf16, #tpu.memory_space<vmem>>, vector<4x8x32xbf16>
    %c0_43 = arith.constant 0 : index
    %c0_44 = arith.constant 0 : index
    %15 = vector.load %arg22[%c0_43, %c0_44] : memref<1x32xf32, #tpu.memory_space<vmem>>, vector<1x32xf32>
    %c0_45 = arith.constant 0 : index
    %c0_46 = arith.constant 0 : index
    %16 = vector.load %arg23[%c0_45, %c0_46] : memref<1x32xf32, #tpu.memory_space<vmem>>, vector<1x32xf32>
    %c0_47 = arith.constant 0 : index
    %c0_48 = arith.constant 0 : index
    %17 = vector.load %arg24[%c0_47, %c0_48] : memref<1x32xf32, #tpu.memory_space<vmem>>, vector<1x32xf32>
    %c0_49 = arith.constant 0 : index
    %c0_50 = arith.constant 0 : index
    %18 = vector.load %arg25[%c0_49, %c0_50] : memref<1x32xf32, #tpu.memory_space<vmem>>, vector<1x32xf32>
    %c0_51 = arith.constant 0 : index
    %c0_52 = arith.constant 0 : index
    %19 = vector.load %arg26[%c0_51, %c0_52] : memref<1x32xf32, #tpu.memory_space<vmem>>, vector<1x32xf32>
    %c0_53 = arith.constant 0 : index
    %c0_54 = arith.constant 0 : index
    %20 = vector.load %arg27[%c0_53, %c0_54] : memref<1x32xf32, #tpu.memory_space<vmem>>, vector<1x32xf32>
    %c0_55 = arith.constant 0 : index
    %c0_56 = arith.constant 0 : index
    %21 = vector.load %arg28[%c0_55, %c0_56] : memref<1x32xf32, #tpu.memory_space<vmem>>, vector<1x32xf32>
    %c0_57 = arith.constant 0 : index
    %c0_58 = arith.constant 0 : index
    %22 = vector.load %arg29[%c0_57, %c0_58] : memref<32x64xbf16, #tpu.memory_space<vmem>>, vector<32x64xbf16>
    %c0_59 = arith.constant 0 : index
    %c0_60 = arith.constant 0 : index
    %23 = vector.load %arg30[%c0_59, %c0_60] : memref<1x64xf32, #tpu.memory_space<vmem>>, vector<1x64xf32>
    %c0_61 = arith.constant 0 : index
    %c0_62 = arith.constant 0 : index
    %24 = vector.load %arg31[%c0_61, %c0_62] : memref<64x32xbf16, #tpu.memory_space<vmem>>, vector<64x32xbf16>
    %c0_63 = arith.constant 0 : index
    %c0_64 = arith.constant 0 : index
    %25 = vector.load %arg32[%c0_63, %c0_64] : memref<1x32xf32, #tpu.memory_space<vmem>>, vector<1x32xf32>
    %c0_65 = arith.constant 0 : index
    %c0_66 = arith.constant 0 : index
    %c0_67 = arith.constant 0 : index
    %26 = vector.load %arg2[%c0_65, %c0_66, %c0_67] : memref<1x8x32xf32, #tpu.memory_space<vmem>>, vector<1x8x32xf32>
    %27 = vector.shape_cast %26 : vector<1x8x32xf32> to vector<8x32xf32>
    %c0_68 = arith.constant 0 : index
    %c0_69 = arith.constant 0 : index
    %c0_70 = arith.constant 0 : index
    %28 = vector.load %arg3[%c0_68, %c0_69, %c0_70] : memref<1x8x32xf32, #tpu.memory_space<vmem>>, vector<1x8x32xf32>
    %29 = vector.shape_cast %28 : vector<1x8x32xf32> to vector<8x32xf32>
    %c0_71 = arith.constant 0 : index
    %c0_72 = arith.constant 0 : index
    %c0_73 = arith.constant 0 : index
    %30 = vector.load %arg4[%c0_71, %c0_72, %c0_73] : memref<1x10x32xf32, #tpu.memory_space<vmem>>, vector<1x10x32xf32>
    %31 = vector.shape_cast %30 : vector<1x10x32xf32> to vector<10x32xf32>
    %c0_74 = arith.constant 0 : index
    %c0_75 = arith.constant 0 : index
    %c0_76 = arith.constant 0 : index
    %c0_77 = arith.constant 0 : index
    %32 = vector.load %arg5[%c0_74, %c0_75, %c0_76, %c0_77] : memref<1x1x8x8xf32, #tpu.memory_space<vmem>>, vector<1x1x8x8xf32>
    %33 = vector.shape_cast %32 : vector<1x1x8x8xf32> to vector<8x8xf32>
    %c0_78 = arith.constant 0 : index
    %c0_79 = arith.constant 0 : index
    %c0_80 = arith.constant 0 : index
    %c0_81 = arith.constant 0 : index
    %34 = vector.load %arg6[%c0_78, %c0_79, %c0_80, %c0_81] : memref<1x1x1x10xf32, #tpu.memory_space<vmem>>, vector<1x1x1x10xf32>
    %35 = vector.shape_cast %34 : vector<1x1x1x10xf32> to vector<1x10xf32>
    %36 = arith.truncf %27 : vector<8x32xf32> to vector<8x32xbf16>
    %37 = arith.truncf %29 : vector<8x32xf32> to vector<8x32xbf16>
    %38 = vector.extract_strided_slice %0 {offsets = [0, 0, 0], sizes = [1, 32, 8], strides = [1, 1, 1]} : vector<4x32x8xbf16> to vector<1x32x8xbf16>
    %39 = vector.shape_cast %38 : vector<1x32x8xbf16> to vector<32x8xbf16>
    %cst = arith.constant dense<0.000000e+00> : vector<8x8xf32>
    %40 = tpu.matmul %36, %39, %cst {dimension_numbers = #tpu.dot_dimension_numbers<[1], [0], [0], [1], [0, 0, 1, 1], [], []>} : vector<8x32xbf16>, vector<32x8xbf16>, vector<8x8xf32> -> vector<8x8xf32>
    %41 = vector.extract_strided_slice %1 {offsets = [0, 0, 0], sizes = [1, 1, 8], strides = [1, 1, 1]} : vector<4x1x8xf32> to vector<1x1x8xf32>
    %42 = vector.shape_cast %41 : vector<1x1x8xf32> to vector<1x8xf32>
    %43 = vector.broadcast %42 : vector<1x8xf32> to vector<8x8xf32>
    %44 = arith.addf %40, %43 : vector<8x8xf32>
    %45 = vector.extract_strided_slice %0 {offsets = [1, 0, 0], sizes = [1, 32, 8], strides = [1, 1, 1]} : vector<4x32x8xbf16> to vector<1x32x8xbf16>
    %46 = vector.shape_cast %45 : vector<1x32x8xbf16> to vector<32x8xbf16>
    %cst_82 = arith.constant dense<0.000000e+00> : vector<8x8xf32>
    %47 = tpu.matmul %36, %46, %cst_82 {dimension_numbers = #tpu.dot_dimension_numbers<[1], [0], [0], [1], [0, 0, 1, 1], [], []>} : vector<8x32xbf16>, vector<32x8xbf16>, vector<8x8xf32> -> vector<8x8xf32>
    %48 = vector.extract_strided_slice %1 {offsets = [1, 0, 0], sizes = [1, 1, 8], strides = [1, 1, 1]} : vector<4x1x8xf32> to vector<1x1x8xf32>
    %49 = vector.shape_cast %48 : vector<1x1x8xf32> to vector<1x8xf32>
    %50 = vector.broadcast %49 : vector<1x8xf32> to vector<8x8xf32>
    %51 = arith.addf %47, %50 : vector<8x8xf32>
    %52 = vector.extract_strided_slice %0 {offsets = [2, 0, 0], sizes = [1, 32, 8], strides = [1, 1, 1]} : vector<4x32x8xbf16> to vector<1x32x8xbf16>
    %53 = vector.shape_cast %52 : vector<1x32x8xbf16> to vector<32x8xbf16>
    %cst_83 = arith.constant dense<0.000000e+00> : vector<8x8xf32>
    %54 = tpu.matmul %36, %53, %cst_83 {dimension_numbers = #tpu.dot_dimension_numbers<[1], [0], [0], [1], [0, 0, 1, 1], [], []>} : vector<8x32xbf16>, vector<32x8xbf16>, vector<8x8xf32> -> vector<8x8xf32>
    %55 = vector.extract_strided_slice %1 {offsets = [2, 0, 0], sizes = [1, 1, 8], strides = [1, 1, 1]} : vector<4x1x8xf32> to vector<1x1x8xf32>
    %56 = vector.shape_cast %55 : vector<1x1x8xf32> to vector<1x8xf32>
    %57 = vector.broadcast %56 : vector<1x8xf32> to vector<8x8xf32>
    %58 = arith.addf %54, %57 : vector<8x8xf32>
    %59 = vector.extract_strided_slice %0 {offsets = [3, 0, 0], sizes = [1, 32, 8], strides = [1, 1, 1]} : vector<4x32x8xbf16> to vector<1x32x8xbf16>
    %60 = vector.shape_cast %59 : vector<1x32x8xbf16> to vector<32x8xbf16>
    %cst_84 = arith.constant dense<0.000000e+00> : vector<8x8xf32>
    %61 = tpu.matmul %36, %60, %cst_84 {dimension_numbers = #tpu.dot_dimension_numbers<[1], [0], [0], [1], [0, 0, 1, 1], [], []>} : vector<8x32xbf16>, vector<32x8xbf16>, vector<8x8xf32> -> vector<8x8xf32>
    %62 = vector.extract_strided_slice %1 {offsets = [3, 0, 0], sizes = [1, 1, 8], strides = [1, 1, 1]} : vector<4x1x8xf32> to vector<1x1x8xf32>
    %63 = vector.shape_cast %62 : vector<1x1x8xf32> to vector<1x8xf32>
    %64 = vector.broadcast %63 : vector<1x8xf32> to vector<8x8xf32>
    %65 = arith.addf %61, %64 : vector<8x8xf32>
    %66 = vector.shape_cast %44 : vector<8x8xf32> to vector<1x8x8xf32>
    %67 = vector.shape_cast %51 : vector<8x8xf32> to vector<1x8x8xf32>
    %68 = vector.shape_cast %58 : vector<8x8xf32> to vector<1x8x8xf32>
    %69 = vector.shape_cast %65 : vector<8x8xf32> to vector<1x8x8xf32>
    %70 = tpu.concatenate %66, %67, %68, %69 in 0 : vector<1x8x8xf32>, vector<1x8x8xf32>, vector<1x8x8xf32>, vector<1x8x8xf32> -> vector<4x8x8xf32>
    %71 = arith.truncf %70 : vector<4x8x8xf32> to vector<4x8x8xbf16>
    %72 = vector.extract_strided_slice %2 {offsets = [0, 0, 0], sizes = [1, 32, 8], strides = [1, 1, 1]} : vector<4x32x8xbf16> to vector<1x32x8xbf16>
    %73 = vector.shape_cast %72 : vector<1x32x8xbf16> to vector<32x8xbf16>
    %cst_85 = arith.constant dense<0.000000e+00> : vector<8x8xf32>
    %74 = tpu.matmul %37, %73, %cst_85 {dimension_numbers = #tpu.dot_dimension_numbers<[1], [0], [0], [1], [0, 0, 1, 1], [], []>} : vector<8x32xbf16>, vector<32x8xbf16>, vector<8x8xf32> -> vector<8x8xf32>
    %75 = vector.extract_strided_slice %3 {offsets = [0, 0, 0], sizes = [1, 1, 8], strides = [1, 1, 1]} : vector<4x1x8xf32> to vector<1x1x8xf32>
    %76 = vector.shape_cast %75 : vector<1x1x8xf32> to vector<1x8xf32>
    %77 = vector.broadcast %76 : vector<1x8xf32> to vector<8x8xf32>
    %78 = arith.addf %74, %77 : vector<8x8xf32>
    %79 = vector.extract_strided_slice %2 {offsets = [1, 0, 0], sizes = [1, 32, 8], strides = [1, 1, 1]} : vector<4x32x8xbf16> to vector<1x32x8xbf16>
    %80 = vector.shape_cast %79 : vector<1x32x8xbf16> to vector<32x8xbf16>
    %cst_86 = arith.constant dense<0.000000e+00> : vector<8x8xf32>
    %81 = tpu.matmul %37, %80, %cst_86 {dimension_numbers = #tpu.dot_dimension_numbers<[1], [0], [0], [1], [0, 0, 1, 1], [], []>} : vector<8x32xbf16>, vector<32x8xbf16>, vector<8x8xf32> -> vector<8x8xf32>
    %82 = vector.extract_strided_slice %3 {offsets = [1, 0, 0], sizes = [1, 1, 8], strides = [1, 1, 1]} : vector<4x1x8xf32> to vector<1x1x8xf32>
    %83 = vector.shape_cast %82 : vector<1x1x8xf32> to vector<1x8xf32>
    %84 = vector.broadcast %83 : vector<1x8xf32> to vector<8x8xf32>
    %85 = arith.addf %81, %84 : vector<8x8xf32>
    %86 = vector.extract_strided_slice %2 {offsets = [2, 0, 0], sizes = [1, 32, 8], strides = [1, 1, 1]} : vector<4x32x8xbf16> to vector<1x32x8xbf16>
    %87 = vector.shape_cast %86 : vector<1x32x8xbf16> to vector<32x8xbf16>
    %cst_87 = arith.constant dense<0.000000e+00> : vector<8x8xf32>
    %88 = tpu.matmul %37, %87, %cst_87 {dimension_numbers = #tpu.dot_dimension_numbers<[1], [0], [0], [1], [0, 0, 1, 1], [], []>} : vector<8x32xbf16>, vector<32x8xbf16>, vector<8x8xf32> -> vector<8x8xf32>
    %89 = vector.extract_strided_slice %3 {offsets = [2, 0, 0], sizes = [1, 1, 8], strides = [1, 1, 1]} : vector<4x1x8xf32> to vector<1x1x8xf32>
    %90 = vector.shape_cast %89 : vector<1x1x8xf32> to vector<1x8xf32>
    %91 = vector.broadcast %90 : vector<1x8xf32> to vector<8x8xf32>
    %92 = arith.addf %88, %91 : vector<8x8xf32>
    %93 = vector.extract_strided_slice %2 {offsets = [3, 0, 0], sizes = [1, 32, 8], strides = [1, 1, 1]} : vector<4x32x8xbf16> to vector<1x32x8xbf16>
    %94 = vector.shape_cast %93 : vector<1x32x8xbf16> to vector<32x8xbf16>
    %cst_88 = arith.constant dense<0.000000e+00> : vector<8x8xf32>
    %95 = tpu.matmul %37, %94, %cst_88 {dimension_numbers = #tpu.dot_dimension_numbers<[1], [0], [0], [1], [0, 0, 1, 1], [], []>} : vector<8x32xbf16>, vector<32x8xbf16>, vector<8x8xf32> -> vector<8x8xf32>
    %96 = vector.extract_strided_slice %3 {offsets = [3, 0, 0], sizes = [1, 1, 8], strides = [1, 1, 1]} : vector<4x1x8xf32> to vector<1x1x8xf32>
    %97 = vector.shape_cast %96 : vector<1x1x8xf32> to vector<1x8xf32>
    %98 = vector.broadcast %97 : vector<1x8xf32> to vector<8x8xf32>
    %99 = arith.addf %95, %98 : vector<8x8xf32>
    %100 = vector.shape_cast %78 : vector<8x8xf32> to vector<1x8x8xf32>
    %101 = vector.shape_cast %85 : vector<8x8xf32> to vector<1x8x8xf32>
    %102 = vector.shape_cast %92 : vector<8x8xf32> to vector<1x8x8xf32>
    %103 = vector.shape_cast %99 : vector<8x8xf32> to vector<1x8x8xf32>
    %104 = tpu.concatenate %100, %101, %102, %103 in 0 : vector<1x8x8xf32>, vector<1x8x8xf32>, vector<1x8x8xf32>, vector<1x8x8xf32> -> vector<4x8x8xf32>
    %105 = arith.truncf %104 : vector<4x8x8xf32> to vector<4x8x8xbf16>
    %106 = vector.extract_strided_slice %4 {offsets = [0, 0, 0], sizes = [1, 32, 8], strides = [1, 1, 1]} : vector<4x32x8xbf16> to vector<1x32x8xbf16>
    %107 = vector.shape_cast %106 : vector<1x32x8xbf16> to vector<32x8xbf16>
    %cst_89 = arith.constant dense<0.000000e+00> : vector<8x8xf32>
    %108 = tpu.matmul %37, %107, %cst_89 {dimension_numbers = #tpu.dot_dimension_numbers<[1], [0], [0], [1], [0, 0, 1, 1], [], []>} : vector<8x32xbf16>, vector<32x8xbf16>, vector<8x8xf32> -> vector<8x8xf32>
    %109 = vector.extract_strided_slice %5 {offsets = [0, 0, 0], sizes = [1, 1, 8], strides = [1, 1, 1]} : vector<4x1x8xf32> to vector<1x1x8xf32>
    %110 = vector.shape_cast %109 : vector<1x1x8xf32> to vector<1x8xf32>
    %111 = vector.broadcast %110 : vector<1x8xf32> to vector<8x8xf32>
    %112 = arith.addf %108, %111 : vector<8x8xf32>
    %113 = vector.extract_strided_slice %4 {offsets = [1, 0, 0], sizes = [1, 32, 8], strides = [1, 1, 1]} : vector<4x32x8xbf16> to vector<1x32x8xbf16>
    %114 = vector.shape_cast %113 : vector<1x32x8xbf16> to vector<32x8xbf16>
    %cst_90 = arith.constant dense<0.000000e+00> : vector<8x8xf32>
    %115 = tpu.matmul %37, %114, %cst_90 {dimension_numbers = #tpu.dot_dimension_numbers<[1], [0], [0], [1], [0, 0, 1, 1], [], []>} : vector<8x32xbf16>, vector<32x8xbf16>, vector<8x8xf32> -> vector<8x8xf32>
    %116 = vector.extract_strided_slice %5 {offsets = [1, 0, 0], sizes = [1, 1, 8], strides = [1, 1, 1]} : vector<4x1x8xf32> to vector<1x1x8xf32>
    %117 = vector.shape_cast %116 : vector<1x1x8xf32> to vector<1x8xf32>
    %118 = vector.broadcast %117 : vector<1x8xf32> to vector<8x8xf32>
    %119 = arith.addf %115, %118 : vector<8x8xf32>
    %120 = vector.extract_strided_slice %4 {offsets = [2, 0, 0], sizes = [1, 32, 8], strides = [1, 1, 1]} : vector<4x32x8xbf16> to vector<1x32x8xbf16>
    %121 = vector.shape_cast %120 : vector<1x32x8xbf16> to vector<32x8xbf16>
    %cst_91 = arith.constant dense<0.000000e+00> : vector<8x8xf32>
    %122 = tpu.matmul %37, %121, %cst_91 {dimension_numbers = #tpu.dot_dimension_numbers<[1], [0], [0], [1], [0, 0, 1, 1], [], []>} : vector<8x32xbf16>, vector<32x8xbf16>, vector<8x8xf32> -> vector<8x8xf32>
    %123 = vector.extract_strided_slice %5 {offsets = [2, 0, 0], sizes = [1, 1, 8], strides = [1, 1, 1]} : vector<4x1x8xf32> to vector<1x1x8xf32>
    %124 = vector.shape_cast %123 : vector<1x1x8xf32> to vector<1x8xf32>
    %125 = vector.broadcast %124 : vector<1x8xf32> to vector<8x8xf32>
    %126 = arith.addf %122, %125 : vector<8x8xf32>
    %127 = vector.extract_strided_slice %4 {offsets = [3, 0, 0], sizes = [1, 32, 8], strides = [1, 1, 1]} : vector<4x32x8xbf16> to vector<1x32x8xbf16>
    %128 = vector.shape_cast %127 : vector<1x32x8xbf16> to vector<32x8xbf16>
    %cst_92 = arith.constant dense<0.000000e+00> : vector<8x8xf32>
    %129 = tpu.matmul %37, %128, %cst_92 {dimension_numbers = #tpu.dot_dimension_numbers<[1], [0], [0], [1], [0, 0, 1, 1], [], []>} : vector<8x32xbf16>, vector<32x8xbf16>, vector<8x8xf32> -> vector<8x8xf32>
    %130 = vector.extract_strided_slice %5 {offsets = [3, 0, 0], sizes = [1, 1, 8], strides = [1, 1, 1]} : vector<4x1x8xf32> to vector<1x1x8xf32>
    %131 = vector.shape_cast %130 : vector<1x1x8xf32> to vector<1x8xf32>
    %132 = vector.broadcast %131 : vector<1x8xf32> to vector<8x8xf32>
    %133 = arith.addf %129, %132 : vector<8x8xf32>
    %134 = vector.shape_cast %112 : vector<8x8xf32> to vector<1x8x8xf32>
    %135 = vector.shape_cast %119 : vector<8x8xf32> to vector<1x8x8xf32>
    %136 = vector.shape_cast %126 : vector<8x8xf32> to vector<1x8x8xf32>
    %137 = vector.shape_cast %133 : vector<8x8xf32> to vector<1x8x8xf32>
    %138 = tpu.concatenate %134, %135, %136, %137 in 0 : vector<1x8x8xf32>, vector<1x8x8xf32>, vector<1x8x8xf32>, vector<1x8x8xf32> -> vector<4x8x8xf32>
    %139 = arith.truncf %138 : vector<4x8x8xf32> to vector<4x8x8xbf16>
    "tpu.trace_start"() <{level = 10 : i32, message = "hqd,hkd->hqk"}> : () -> ()
    %cst_93 = arith.constant dense<0.000000e+00> : vector<4x8x8xf32>
    %140 = tpu.matmul %71, %105, %cst_93 {dimension_numbers = #tpu.dot_dimension_numbers<[2], [2], [1], [1], [0, 0, 0, 1, 1, 1], [0], [0]>} : vector<4x8x8xbf16>, vector<4x8x8xbf16>, vector<4x8x8xf32> -> vector<4x8x8xf32>
    "tpu.trace_stop"() : () -> ()
    %141 = vector.shape_cast %33 : vector<8x8xf32> to vector<1x8x8xf32>
    %142 = vector.broadcast %141 : vector<1x8x8xf32> to vector<4x8x8xf32>
    %143 = arith.addf %140, %142 : vector<4x8x8xf32>
    %cst_94 = arith.constant dense<0xFF800000> : vector<4x8xf32>
    %144 = vector.multi_reduction <maximumf>, %143, %cst_94 [2] : vector<4x8x8xf32> to vector<4x8xf32>
    %145 = vector.shape_cast %144 : vector<4x8xf32> to vector<4x8x1xf32>
    %146 = vector.broadcast %145 : vector<4x8x1xf32> to vector<4x8x8xf32>
    %147 = arith.subf %143, %146 : vector<4x8x8xf32>
    %148 = math.exp %147 : vector<4x8x8xf32>
    %cst_95 = arith.constant dense<0.000000e+00> : vector<4x8xf32>
    %149 = vector.multi_reduction <add>, %148, %cst_95 [2] : vector<4x8x8xf32> to vector<4x8xf32>
    %150 = vector.shape_cast %149 : vector<4x8xf32> to vector<4x8x1xf32>
    %151 = tpu.reciprocal %150 {approx = true} : vector<4x8x1xf32> -> vector<4x8x1xf32>
    %152 = vector.broadcast %151 : vector<4x8x1xf32> to vector<4x8x8xf32>
    %153 = arith.mulf %148, %152 : vector<4x8x8xf32>
    %154 = arith.truncf %153 : vector<4x8x8xf32> to vector<4x8x8xbf16>
    "tpu.trace_start"() <{level = 10 : i32, message = "hqk,hkd->hqd"}> : () -> ()
    %cst_96 = arith.constant dense<0.000000e+00> : vector<4x8x8xf32>
    %155 = tpu.matmul %154, %139, %cst_96 {dimension_numbers = #tpu.dot_dimension_numbers<[2], [1], [1], [2], [0, 0, 0, 1, 1, 2], [0], [0]>} : vector<4x8x8xbf16>, vector<4x8x8xbf16>, vector<4x8x8xf32> -> vector<4x8x8xf32>
    "tpu.trace_stop"() : () -> ()
    %156 = vector.extract_strided_slice %155 {offsets = [0, 0, 0], sizes = [1, 8, 8], strides = [1, 1, 1]} : vector<4x8x8xf32> to vector<1x8x8xf32>
    %157 = vector.shape_cast %156 : vector<1x8x8xf32> to vector<8x8xf32>
    %158 = arith.truncf %157 : vector<8x8xf32> to vector<8x8xbf16>
    %159 = vector.extract_strided_slice %6 {offsets = [0, 0, 0], sizes = [1, 8, 32], strides = [1, 1, 1]} : vector<4x8x32xbf16> to vector<1x8x32xbf16>
    %160 = vector.shape_cast %159 : vector<1x8x32xbf16> to vector<8x32xbf16>
    %cst_97 = arith.constant dense<0.000000e+00> : vector<8x32xf32>
    %161 = tpu.matmul %158, %160, %cst_97 {dimension_numbers = #tpu.dot_dimension_numbers<[1], [0], [0], [1], [0, 0, 1, 1], [], []>} : vector<8x8xbf16>, vector<8x32xbf16>, vector<8x32xf32> -> vector<8x32xf32>
    %162 = vector.broadcast %7 : vector<1x32xf32> to vector<8x32xf32>
    %163 = arith.addf %162, %161 : vector<8x32xf32>
    %164 = vector.extract_strided_slice %155 {offsets = [1, 0, 0], sizes = [1, 8, 8], strides = [1, 1, 1]} : vector<4x8x8xf32> to vector<1x8x8xf32>
    %165 = vector.shape_cast %164 : vector<1x8x8xf32> to vector<8x8xf32>
    %166 = arith.truncf %165 : vector<8x8xf32> to vector<8x8xbf16>
    %167 = vector.extract_strided_slice %6 {offsets = [1, 0, 0], sizes = [1, 8, 32], strides = [1, 1, 1]} : vector<4x8x32xbf16> to vector<1x8x32xbf16>
    %168 = vector.shape_cast %167 : vector<1x8x32xbf16> to vector<8x32xbf16>
    %cst_98 = arith.constant dense<0.000000e+00> : vector<8x32xf32>
    %169 = tpu.matmul %166, %168, %cst_98 {dimension_numbers = #tpu.dot_dimension_numbers<[1], [0], [0], [1], [0, 0, 1, 1], [], []>} : vector<8x8xbf16>, vector<8x32xbf16>, vector<8x32xf32> -> vector<8x32xf32>
    %170 = arith.addf %163, %169 : vector<8x32xf32>
    %171 = vector.extract_strided_slice %155 {offsets = [2, 0, 0], sizes = [1, 8, 8], strides = [1, 1, 1]} : vector<4x8x8xf32> to vector<1x8x8xf32>
    %172 = vector.shape_cast %171 : vector<1x8x8xf32> to vector<8x8xf32>
    %173 = arith.truncf %172 : vector<8x8xf32> to vector<8x8xbf16>
    %174 = vector.extract_strided_slice %6 {offsets = [2, 0, 0], sizes = [1, 8, 32], strides = [1, 1, 1]} : vector<4x8x32xbf16> to vector<1x8x32xbf16>
    %175 = vector.shape_cast %174 : vector<1x8x32xbf16> to vector<8x32xbf16>
    %cst_99 = arith.constant dense<0.000000e+00> : vector<8x32xf32>
    %176 = tpu.matmul %173, %175, %cst_99 {dimension_numbers = #tpu.dot_dimension_numbers<[1], [0], [0], [1], [0, 0, 1, 1], [], []>} : vector<8x8xbf16>, vector<8x32xbf16>, vector<8x32xf32> -> vector<8x32xf32>
    %177 = arith.addf %170, %176 : vector<8x32xf32>
    %178 = vector.extract_strided_slice %155 {offsets = [3, 0, 0], sizes = [1, 8, 8], strides = [1, 1, 1]} : vector<4x8x8xf32> to vector<1x8x8xf32>
    %179 = vector.shape_cast %178 : vector<1x8x8xf32> to vector<8x8xf32>
    %180 = arith.truncf %179 : vector<8x8xf32> to vector<8x8xbf16>
    %181 = vector.extract_strided_slice %6 {offsets = [3, 0, 0], sizes = [1, 8, 32], strides = [1, 1, 1]} : vector<4x8x32xbf16> to vector<1x8x32xbf16>
    %182 = vector.shape_cast %181 : vector<1x8x32xbf16> to vector<8x32xbf16>
    %cst_100 = arith.constant dense<0.000000e+00> : vector<8x32xf32>
    %183 = tpu.matmul %180, %182, %cst_100 {dimension_numbers = #tpu.dot_dimension_numbers<[1], [0], [0], [1], [0, 0, 1, 1], [], []>} : vector<8x8xbf16>, vector<8x32xbf16>, vector<8x32xf32> -> vector<8x32xf32>
    %184 = arith.addf %177, %183 : vector<8x32xf32>
    %185 = arith.addf %27, %184 : vector<8x32xf32>
    %cst_101 = arith.constant dense<0.000000e+00> : vector<8xf32>
    %186 = vector.multi_reduction <add>, %185, %cst_101 [1] : vector<8x32xf32> to vector<8xf32>
    %187 = vector.shape_cast %186 : vector<8xf32> to vector<8x1xf32>
    %cst_102 = arith.constant 3.200000e+01 : f32
    %188 = vector.broadcast %cst_102 : f32 to vector<8x1xf32>
    %189 = arith.divf %187, %188 : vector<8x1xf32>
    %190 = vector.broadcast %189 : vector<8x1xf32> to vector<8x32xf32>
    %191 = arith.subf %185, %190 : vector<8x32xf32>
    %192 = arith.mulf %191, %191 : vector<8x32xf32>
    %cst_103 = arith.constant dense<0.000000e+00> : vector<8xf32>
    %193 = vector.multi_reduction <add>, %192, %cst_103 [1] : vector<8x32xf32> to vector<8xf32>
    %194 = vector.shape_cast %193 : vector<8xf32> to vector<8x1xf32>
    %cst_104 = arith.constant 3.200000e+01 : f32
    %195 = vector.broadcast %cst_104 : f32 to vector<8x1xf32>
    %196 = arith.divf %194, %195 : vector<8x1xf32>
    %197 = vector.broadcast %189 : vector<8x1xf32> to vector<8x32xf32>
    %198 = arith.subf %185, %197 : vector<8x32xf32>
    %cst_105 = arith.constant 9.99999974E-6 : f32
    %199 = vector.broadcast %cst_105 : f32 to vector<8x1xf32>
    %200 = arith.addf %196, %199 : vector<8x1xf32>
    %201 = math.rsqrt %200 : vector<8x1xf32>
    %202 = vector.broadcast %201 : vector<8x1xf32> to vector<8x32xf32>
    %203 = arith.mulf %198, %202 : vector<8x32xf32>
    %204 = vector.broadcast %16 : vector<1x32xf32> to vector<8x32xf32>
    %205 = arith.mulf %203, %204 : vector<8x32xf32>
    %206 = vector.broadcast %17 : vector<1x32xf32> to vector<8x32xf32>
    %207 = arith.addf %205, %206 : vector<8x32xf32>
    %208 = arith.truncf %207 : vector<8x32xf32> to vector<8x32xbf16>
    %209 = arith.truncf %31 : vector<10x32xf32> to vector<10x32xbf16>
    %210 = vector.extract_strided_slice %8 {offsets = [0, 0, 0], sizes = [1, 32, 8], strides = [1, 1, 1]} : vector<4x32x8xbf16> to vector<1x32x8xbf16>
    %211 = vector.shape_cast %210 : vector<1x32x8xbf16> to vector<32x8xbf16>
    %cst_106 = arith.constant dense<0.000000e+00> : vector<8x8xf32>
    %212 = tpu.matmul %208, %211, %cst_106 {dimension_numbers = #tpu.dot_dimension_numbers<[1], [0], [0], [1], [0, 0, 1, 1], [], []>} : vector<8x32xbf16>, vector<32x8xbf16>, vector<8x8xf32> -> vector<8x8xf32>
    %213 = vector.extract_strided_slice %9 {offsets = [0, 0, 0], sizes = [1, 1, 8], strides = [1, 1, 1]} : vector<4x1x8xf32> to vector<1x1x8xf32>
    %214 = vector.shape_cast %213 : vector<1x1x8xf32> to vector<1x8xf32>
    %215 = vector.broadcast %214 : vector<1x8xf32> to vector<8x8xf32>
    %216 = arith.addf %212, %215 : vector<8x8xf32>
    %217 = vector.extract_strided_slice %8 {offsets = [1, 0, 0], sizes = [1, 32, 8], strides = [1, 1, 1]} : vector<4x32x8xbf16> to vector<1x32x8xbf16>
    %218 = vector.shape_cast %217 : vector<1x32x8xbf16> to vector<32x8xbf16>
    %cst_107 = arith.constant dense<0.000000e+00> : vector<8x8xf32>
    %219 = tpu.matmul %208, %218, %cst_107 {dimension_numbers = #tpu.dot_dimension_numbers<[1], [0], [0], [1], [0, 0, 1, 1], [], []>} : vector<8x32xbf16>, vector<32x8xbf16>, vector<8x8xf32> -> vector<8x8xf32>
    %220 = vector.extract_strided_slice %9 {offsets = [1, 0, 0], sizes = [1, 1, 8], strides = [1, 1, 1]} : vector<4x1x8xf32> to vector<1x1x8xf32>
    %221 = vector.shape_cast %220 : vector<1x1x8xf32> to vector<1x8xf32>
    %222 = vector.broadcast %221 : vector<1x8xf32> to vector<8x8xf32>
    %223 = arith.addf %219, %222 : vector<8x8xf32>
    %224 = vector.extract_strided_slice %8 {offsets = [2, 0, 0], sizes = [1, 32, 8], strides = [1, 1, 1]} : vector<4x32x8xbf16> to vector<1x32x8xbf16>
    %225 = vector.shape_cast %224 : vector<1x32x8xbf16> to vector<32x8xbf16>
    %cst_108 = arith.constant dense<0.000000e+00> : vector<8x8xf32>
    %226 = tpu.matmul %208, %225, %cst_108 {dimension_numbers = #tpu.dot_dimension_numbers<[1], [0], [0], [1], [0, 0, 1, 1], [], []>} : vector<8x32xbf16>, vector<32x8xbf16>, vector<8x8xf32> -> vector<8x8xf32>
    %227 = vector.extract_strided_slice %9 {offsets = [2, 0, 0], sizes = [1, 1, 8], strides = [1, 1, 1]} : vector<4x1x8xf32> to vector<1x1x8xf32>
    %228 = vector.shape_cast %227 : vector<1x1x8xf32> to vector<1x8xf32>
    %229 = vector.broadcast %228 : vector<1x8xf32> to vector<8x8xf32>
    %230 = arith.addf %226, %229 : vector<8x8xf32>
    %231 = vector.extract_strided_slice %8 {offsets = [3, 0, 0], sizes = [1, 32, 8], strides = [1, 1, 1]} : vector<4x32x8xbf16> to vector<1x32x8xbf16>
    %232 = vector.shape_cast %231 : vector<1x32x8xbf16> to vector<32x8xbf16>
    %cst_109 = arith.constant dense<0.000000e+00> : vector<8x8xf32>
    %233 = tpu.matmul %208, %232, %cst_109 {dimension_numbers = #tpu.dot_dimension_numbers<[1], [0], [0], [1], [0, 0, 1, 1], [], []>} : vector<8x32xbf16>, vector<32x8xbf16>, vector<8x8xf32> -> vector<8x8xf32>
    %234 = vector.extract_strided_slice %9 {offsets = [3, 0, 0], sizes = [1, 1, 8], strides = [1, 1, 1]} : vector<4x1x8xf32> to vector<1x1x8xf32>
    %235 = vector.shape_cast %234 : vector<1x1x8xf32> to vector<1x8xf32>
    %236 = vector.broadcast %235 : vector<1x8xf32> to vector<8x8xf32>
    %237 = arith.addf %233, %236 : vector<8x8xf32>
    %238 = vector.shape_cast %216 : vector<8x8xf32> to vector<1x8x8xf32>
    %239 = vector.shape_cast %223 : vector<8x8xf32> to vector<1x8x8xf32>
    %240 = vector.shape_cast %230 : vector<8x8xf32> to vector<1x8x8xf32>
    %241 = vector.shape_cast %237 : vector<8x8xf32> to vector<1x8x8xf32>
    %242 = tpu.concatenate %238, %239, %240, %241 in 0 : vector<1x8x8xf32>, vector<1x8x8xf32>, vector<1x8x8xf32>, vector<1x8x8xf32> -> vector<4x8x8xf32>
    %243 = arith.truncf %242 : vector<4x8x8xf32> to vector<4x8x8xbf16>
    %244 = vector.extract_strided_slice %10 {offsets = [0, 0, 0], sizes = [1, 32, 8], strides = [1, 1, 1]} : vector<4x32x8xbf16> to vector<1x32x8xbf16>
    %245 = vector.shape_cast %244 : vector<1x32x8xbf16> to vector<32x8xbf16>
    %cst_110 = arith.constant dense<0.000000e+00> : vector<10x8xf32>
    %246 = tpu.matmul %209, %245, %cst_110 {dimension_numbers = #tpu.dot_dimension_numbers<[1], [0], [0], [1], [0, 0, 1, 1], [], []>} : vector<10x32xbf16>, vector<32x8xbf16>, vector<10x8xf32> -> vector<10x8xf32>
    %247 = vector.extract_strided_slice %11 {offsets = [0, 0, 0], sizes = [1, 1, 8], strides = [1, 1, 1]} : vector<4x1x8xf32> to vector<1x1x8xf32>
    %248 = vector.shape_cast %247 : vector<1x1x8xf32> to vector<1x8xf32>
    %249 = vector.broadcast %248 : vector<1x8xf32> to vector<10x8xf32>
    %250 = arith.addf %246, %249 : vector<10x8xf32>
    %251 = vector.extract_strided_slice %10 {offsets = [1, 0, 0], sizes = [1, 32, 8], strides = [1, 1, 1]} : vector<4x32x8xbf16> to vector<1x32x8xbf16>
    %252 = vector.shape_cast %251 : vector<1x32x8xbf16> to vector<32x8xbf16>
    %cst_111 = arith.constant dense<0.000000e+00> : vector<10x8xf32>
    %253 = tpu.matmul %209, %252, %cst_111 {dimension_numbers = #tpu.dot_dimension_numbers<[1], [0], [0], [1], [0, 0, 1, 1], [], []>} : vector<10x32xbf16>, vector<32x8xbf16>, vector<10x8xf32> -> vector<10x8xf32>
    %254 = vector.extract_strided_slice %11 {offsets = [1, 0, 0], sizes = [1, 1, 8], strides = [1, 1, 1]} : vector<4x1x8xf32> to vector<1x1x8xf32>
    %255 = vector.shape_cast %254 : vector<1x1x8xf32> to vector<1x8xf32>
    %256 = vector.broadcast %255 : vector<1x8xf32> to vector<10x8xf32>
    %257 = arith.addf %253, %256 : vector<10x8xf32>
    %258 = vector.extract_strided_slice %10 {offsets = [2, 0, 0], sizes = [1, 32, 8], strides = [1, 1, 1]} : vector<4x32x8xbf16> to vector<1x32x8xbf16>
    %259 = vector.shape_cast %258 : vector<1x32x8xbf16> to vector<32x8xbf16>
    %cst_112 = arith.constant dense<0.000000e+00> : vector<10x8xf32>
    %260 = tpu.matmul %209, %259, %cst_112 {dimension_numbers = #tpu.dot_dimension_numbers<[1], [0], [0], [1], [0, 0, 1, 1], [], []>} : vector<10x32xbf16>, vector<32x8xbf16>, vector<10x8xf32> -> vector<10x8xf32>
    %261 = vector.extract_strided_slice %11 {offsets = [2, 0, 0], sizes = [1, 1, 8], strides = [1, 1, 1]} : vector<4x1x8xf32> to vector<1x1x8xf32>
    %262 = vector.shape_cast %261 : vector<1x1x8xf32> to vector<1x8xf32>
    %263 = vector.broadcast %262 : vector<1x8xf32> to vector<10x8xf32>
    %264 = arith.addf %260, %263 : vector<10x8xf32>
    %265 = vector.extract_strided_slice %10 {offsets = [3, 0, 0], sizes = [1, 32, 8], strides = [1, 1, 1]} : vector<4x32x8xbf16> to vector<1x32x8xbf16>
    %266 = vector.shape_cast %265 : vector<1x32x8xbf16> to vector<32x8xbf16>
    %cst_113 = arith.constant dense<0.000000e+00> : vector<10x8xf32>
    %267 = tpu.matmul %209, %266, %cst_113 {dimension_numbers = #tpu.dot_dimension_numbers<[1], [0], [0], [1], [0, 0, 1, 1], [], []>} : vector<10x32xbf16>, vector<32x8xbf16>, vector<10x8xf32> -> vector<10x8xf32>
    %268 = vector.extract_strided_slice %11 {offsets = [3, 0, 0], sizes = [1, 1, 8], strides = [1, 1, 1]} : vector<4x1x8xf32> to vector<1x1x8xf32>
    %269 = vector.shape_cast %268 : vector<1x1x8xf32> to vector<1x8xf32>
    %270 = vector.broadcast %269 : vector<1x8xf32> to vector<10x8xf32>
    %271 = arith.addf %267, %270 : vector<10x8xf32>
    %272 = vector.shape_cast %250 : vector<10x8xf32> to vector<1x10x8xf32>
    %273 = vector.shape_cast %257 : vector<10x8xf32> to vector<1x10x8xf32>
    %274 = vector.shape_cast %264 : vector<10x8xf32> to vector<1x10x8xf32>
    %275 = vector.shape_cast %271 : vector<10x8xf32> to vector<1x10x8xf32>
    %276 = tpu.concatenate %272, %273, %274, %275 in 0 : vector<1x10x8xf32>, vector<1x10x8xf32>, vector<1x10x8xf32>, vector<1x10x8xf32> -> vector<4x10x8xf32>
    %277 = arith.truncf %276 : vector<4x10x8xf32> to vector<4x10x8xbf16>
    %278 = vector.extract_strided_slice %12 {offsets = [0, 0, 0], sizes = [1, 32, 8], strides = [1, 1, 1]} : vector<4x32x8xbf16> to vector<1x32x8xbf16>
    %279 = vector.shape_cast %278 : vector<1x32x8xbf16> to vector<32x8xbf16>
    %cst_114 = arith.constant dense<0.000000e+00> : vector<10x8xf32>
    %280 = tpu.matmul %209, %279, %cst_114 {dimension_numbers = #tpu.dot_dimension_numbers<[1], [0], [0], [1], [0, 0, 1, 1], [], []>} : vector<10x32xbf16>, vector<32x8xbf16>, vector<10x8xf32> -> vector<10x8xf32>
    %281 = vector.extract_strided_slice %13 {offsets = [0, 0, 0], sizes = [1, 1, 8], strides = [1, 1, 1]} : vector<4x1x8xf32> to vector<1x1x8xf32>
    %282 = vector.shape_cast %281 : vector<1x1x8xf32> to vector<1x8xf32>
    %283 = vector.broadcast %282 : vector<1x8xf32> to vector<10x8xf32>
    %284 = arith.addf %280, %283 : vector<10x8xf32>
    %285 = vector.extract_strided_slice %12 {offsets = [1, 0, 0], sizes = [1, 32, 8], strides = [1, 1, 1]} : vector<4x32x8xbf16> to vector<1x32x8xbf16>
    %286 = vector.shape_cast %285 : vector<1x32x8xbf16> to vector<32x8xbf16>
    %cst_115 = arith.constant dense<0.000000e+00> : vector<10x8xf32>
    %287 = tpu.matmul %209, %286, %cst_115 {dimension_numbers = #tpu.dot_dimension_numbers<[1], [0], [0], [1], [0, 0, 1, 1], [], []>} : vector<10x32xbf16>, vector<32x8xbf16>, vector<10x8xf32> -> vector<10x8xf32>
    %288 = vector.extract_strided_slice %13 {offsets = [1, 0, 0], sizes = [1, 1, 8], strides = [1, 1, 1]} : vector<4x1x8xf32> to vector<1x1x8xf32>
    %289 = vector.shape_cast %288 : vector<1x1x8xf32> to vector<1x8xf32>
    %290 = vector.broadcast %289 : vector<1x8xf32> to vector<10x8xf32>
    %291 = arith.addf %287, %290 : vector<10x8xf32>
    %292 = vector.extract_strided_slice %12 {offsets = [2, 0, 0], sizes = [1, 32, 8], strides = [1, 1, 1]} : vector<4x32x8xbf16> to vector<1x32x8xbf16>
    %293 = vector.shape_cast %292 : vector<1x32x8xbf16> to vector<32x8xbf16>
    %cst_116 = arith.constant dense<0.000000e+00> : vector<10x8xf32>
    %294 = tpu.matmul %209, %293, %cst_116 {dimension_numbers = #tpu.dot_dimension_numbers<[1], [0], [0], [1], [0, 0, 1, 1], [], []>} : vector<10x32xbf16>, vector<32x8xbf16>, vector<10x8xf32> -> vector<10x8xf32>
    %295 = vector.extract_strided_slice %13 {offsets = [2, 0, 0], sizes = [1, 1, 8], strides = [1, 1, 1]} : vector<4x1x8xf32> to vector<1x1x8xf32>
    %296 = vector.shape_cast %295 : vector<1x1x8xf32> to vector<1x8xf32>
    %297 = vector.broadcast %296 : vector<1x8xf32> to vector<10x8xf32>
    %298 = arith.addf %294, %297 : vector<10x8xf32>
    %299 = vector.extract_strided_slice %12 {offsets = [3, 0, 0], sizes = [1, 32, 8], strides = [1, 1, 1]} : vector<4x32x8xbf16> to vector<1x32x8xbf16>
    %300 = vector.shape_cast %299 : vector<1x32x8xbf16> to vector<32x8xbf16>
    %cst_117 = arith.constant dense<0.000000e+00> : vector<10x8xf32>
    %301 = tpu.matmul %209, %300, %cst_117 {dimension_numbers = #tpu.dot_dimension_numbers<[1], [0], [0], [1], [0, 0, 1, 1], [], []>} : vector<10x32xbf16>, vector<32x8xbf16>, vector<10x8xf32> -> vector<10x8xf32>
    %302 = vector.extract_strided_slice %13 {offsets = [3, 0, 0], sizes = [1, 1, 8], strides = [1, 1, 1]} : vector<4x1x8xf32> to vector<1x1x8xf32>
    %303 = vector.shape_cast %302 : vector<1x1x8xf32> to vector<1x8xf32>
    %304 = vector.broadcast %303 : vector<1x8xf32> to vector<10x8xf32>
    %305 = arith.addf %301, %304 : vector<10x8xf32>
    %306 = vector.shape_cast %284 : vector<10x8xf32> to vector<1x10x8xf32>
    %307 = vector.shape_cast %291 : vector<10x8xf32> to vector<1x10x8xf32>
    %308 = vector.shape_cast %298 : vector<10x8xf32> to vector<1x10x8xf32>
    %309 = vector.shape_cast %305 : vector<10x8xf32> to vector<1x10x8xf32>
    %310 = tpu.concatenate %306, %307, %308, %309 in 0 : vector<1x10x8xf32>, vector<1x10x8xf32>, vector<1x10x8xf32>, vector<1x10x8xf32> -> vector<4x10x8xf32>
    %311 = arith.truncf %310 : vector<4x10x8xf32> to vector<4x10x8xbf16>
    "tpu.trace_start"() <{level = 10 : i32, message = "hqd,hkd->hqk"}> : () -> ()
    %cst_118 = arith.constant dense<0.000000e+00> : vector<4x8x10xf32>
    %312 = tpu.matmul %243, %277, %cst_118 {dimension_numbers = #tpu.dot_dimension_numbers<[2], [2], [1], [1], [0, 0, 0, 1, 1, 1], [0], [0]>} : vector<4x8x8xbf16>, vector<4x10x8xbf16>, vector<4x8x10xf32> -> vector<4x8x10xf32>
    "tpu.trace_stop"() : () -> ()
    %313 = vector.shape_cast %35 : vector<1x10xf32> to vector<1x1x10xf32>
    %314 = vector.broadcast %313 : vector<1x1x10xf32> to vector<4x8x10xf32>
    %315 = arith.addf %312, %314 : vector<4x8x10xf32>
    %cst_119 = arith.constant dense<0xFF800000> : vector<4x8xf32>
    %316 = vector.multi_reduction <maximumf>, %315, %cst_119 [2] : vector<4x8x10xf32> to vector<4x8xf32>
    %317 = vector.shape_cast %316 : vector<4x8xf32> to vector<4x8x1xf32>
    %318 = vector.broadcast %317 : vector<4x8x1xf32> to vector<4x8x10xf32>
    %319 = arith.subf %315, %318 : vector<4x8x10xf32>
    %320 = math.exp %319 : vector<4x8x10xf32>
    %cst_120 = arith.constant dense<0.000000e+00> : vector<4x8xf32>
    %321 = vector.multi_reduction <add>, %320, %cst_120 [2] : vector<4x8x10xf32> to vector<4x8xf32>
    %322 = vector.shape_cast %321 : vector<4x8xf32> to vector<4x8x1xf32>
    %323 = tpu.reciprocal %322 {approx = true} : vector<4x8x1xf32> -> vector<4x8x1xf32>
    %324 = vector.broadcast %323 : vector<4x8x1xf32> to vector<4x8x10xf32>
    %325 = arith.mulf %320, %324 : vector<4x8x10xf32>
    %326 = arith.truncf %325 : vector<4x8x10xf32> to vector<4x8x10xbf16>
    "tpu.trace_start"() <{level = 10 : i32, message = "hqk,hkd->hqd"}> : () -> ()
    %cst_121 = arith.constant dense<0.000000e+00> : vector<4x8x8xf32>
    %327 = tpu.matmul %326, %311, %cst_121 {dimension_numbers = #tpu.dot_dimension_numbers<[2], [1], [1], [2], [0, 0, 0, 1, 1, 2], [0], [0]>} : vector<4x8x10xbf16>, vector<4x10x8xbf16>, vector<4x8x8xf32> -> vector<4x8x8xf32>
    "tpu.trace_stop"() : () -> ()
    %328 = vector.extract_strided_slice %327 {offsets = [0, 0, 0], sizes = [1, 8, 8], strides = [1, 1, 1]} : vector<4x8x8xf32> to vector<1x8x8xf32>
    %329 = vector.shape_cast %328 : vector<1x8x8xf32> to vector<8x8xf32>
    %330 = arith.truncf %329 : vector<8x8xf32> to vector<8x8xbf16>
    %331 = vector.extract_strided_slice %14 {offsets = [0, 0, 0], sizes = [1, 8, 32], strides = [1, 1, 1]} : vector<4x8x32xbf16> to vector<1x8x32xbf16>
    %332 = vector.shape_cast %331 : vector<1x8x32xbf16> to vector<8x32xbf16>
    %cst_122 = arith.constant dense<0.000000e+00> : vector<8x32xf32>
    %333 = tpu.matmul %330, %332, %cst_122 {dimension_numbers = #tpu.dot_dimension_numbers<[1], [0], [0], [1], [0, 0, 1, 1], [], []>} : vector<8x8xbf16>, vector<8x32xbf16>, vector<8x32xf32> -> vector<8x32xf32>
    %334 = vector.broadcast %15 : vector<1x32xf32> to vector<8x32xf32>
    %335 = arith.addf %334, %333 : vector<8x32xf32>
    %336 = vector.extract_strided_slice %327 {offsets = [1, 0, 0], sizes = [1, 8, 8], strides = [1, 1, 1]} : vector<4x8x8xf32> to vector<1x8x8xf32>
    %337 = vector.shape_cast %336 : vector<1x8x8xf32> to vector<8x8xf32>
    %338 = arith.truncf %337 : vector<8x8xf32> to vector<8x8xbf16>
    %339 = vector.extract_strided_slice %14 {offsets = [1, 0, 0], sizes = [1, 8, 32], strides = [1, 1, 1]} : vector<4x8x32xbf16> to vector<1x8x32xbf16>
    %340 = vector.shape_cast %339 : vector<1x8x32xbf16> to vector<8x32xbf16>
    %cst_123 = arith.constant dense<0.000000e+00> : vector<8x32xf32>
    %341 = tpu.matmul %338, %340, %cst_123 {dimension_numbers = #tpu.dot_dimension_numbers<[1], [0], [0], [1], [0, 0, 1, 1], [], []>} : vector<8x8xbf16>, vector<8x32xbf16>, vector<8x32xf32> -> vector<8x32xf32>
    %342 = arith.addf %335, %341 : vector<8x32xf32>
    %343 = vector.extract_strided_slice %327 {offsets = [2, 0, 0], sizes = [1, 8, 8], strides = [1, 1, 1]} : vector<4x8x8xf32> to vector<1x8x8xf32>
    %344 = vector.shape_cast %343 : vector<1x8x8xf32> to vector<8x8xf32>
    %345 = arith.truncf %344 : vector<8x8xf32> to vector<8x8xbf16>
    %346 = vector.extract_strided_slice %14 {offsets = [2, 0, 0], sizes = [1, 8, 32], strides = [1, 1, 1]} : vector<4x8x32xbf16> to vector<1x8x32xbf16>
    %347 = vector.shape_cast %346 : vector<1x8x32xbf16> to vector<8x32xbf16>
    %cst_124 = arith.constant dense<0.000000e+00> : vector<8x32xf32>
    %348 = tpu.matmul %345, %347, %cst_124 {dimension_numbers = #tpu.dot_dimension_numbers<[1], [0], [0], [1], [0, 0, 1, 1], [], []>} : vector<8x8xbf16>, vector<8x32xbf16>, vector<8x32xf32> -> vector<8x32xf32>
    %349 = arith.addf %342, %348 : vector<8x32xf32>
    %350 = vector.extract_strided_slice %327 {offsets = [3, 0, 0], sizes = [1, 8, 8], strides = [1, 1, 1]} : vector<4x8x8xf32> to vector<1x8x8xf32>
    %351 = vector.shape_cast %350 : vector<1x8x8xf32> to vector<8x8xf32>
    %352 = arith.truncf %351 : vector<8x8xf32> to vector<8x8xbf16>
    %353 = vector.extract_strided_slice %14 {offsets = [3, 0, 0], sizes = [1, 8, 32], strides = [1, 1, 1]} : vector<4x8x32xbf16> to vector<1x8x32xbf16>
    %354 = vector.shape_cast %353 : vector<1x8x32xbf16> to vector<8x32xbf16>
    %cst_125 = arith.constant dense<0.000000e+00> : vector<8x32xf32>
    %355 = tpu.matmul %352, %354, %cst_125 {dimension_numbers = #tpu.dot_dimension_numbers<[1], [0], [0], [1], [0, 0, 1, 1], [], []>} : vector<8x8xbf16>, vector<8x32xbf16>, vector<8x32xf32> -> vector<8x32xf32>
    %356 = arith.addf %349, %355 : vector<8x32xf32>
    %357 = arith.addf %207, %356 : vector<8x32xf32>
    %cst_126 = arith.constant dense<0.000000e+00> : vector<8xf32>
    %358 = vector.multi_reduction <add>, %357, %cst_126 [1] : vector<8x32xf32> to vector<8xf32>
    %359 = vector.shape_cast %358 : vector<8xf32> to vector<8x1xf32>
    %cst_127 = arith.constant 3.200000e+01 : f32
    %360 = vector.broadcast %cst_127 : f32 to vector<8x1xf32>
    %361 = arith.divf %359, %360 : vector<8x1xf32>
    %362 = vector.broadcast %361 : vector<8x1xf32> to vector<8x32xf32>
    %363 = arith.subf %357, %362 : vector<8x32xf32>
    %364 = arith.mulf %363, %363 : vector<8x32xf32>
    %cst_128 = arith.constant dense<0.000000e+00> : vector<8xf32>
    %365 = vector.multi_reduction <add>, %364, %cst_128 [1] : vector<8x32xf32> to vector<8xf32>
    %366 = vector.shape_cast %365 : vector<8xf32> to vector<8x1xf32>
    %cst_129 = arith.constant 3.200000e+01 : f32
    %367 = vector.broadcast %cst_129 : f32 to vector<8x1xf32>
    %368 = arith.divf %366, %367 : vector<8x1xf32>
    %369 = vector.broadcast %361 : vector<8x1xf32> to vector<8x32xf32>
    %370 = arith.subf %357, %369 : vector<8x32xf32>
    %cst_130 = arith.constant 9.99999974E-6 : f32
    %371 = vector.broadcast %cst_130 : f32 to vector<8x1xf32>
    %372 = arith.addf %368, %371 : vector<8x1xf32>
    %373 = math.rsqrt %372 : vector<8x1xf32>
    %374 = vector.broadcast %373 : vector<8x1xf32> to vector<8x32xf32>
    %375 = arith.mulf %370, %374 : vector<8x32xf32>
    %376 = vector.broadcast %18 : vector<1x32xf32> to vector<8x32xf32>
    %377 = arith.mulf %375, %376 : vector<8x32xf32>
    %378 = vector.broadcast %19 : vector<1x32xf32> to vector<8x32xf32>
    %379 = arith.addf %377, %378 : vector<8x32xf32>
    %380 = arith.truncf %379 : vector<8x32xf32> to vector<8x32xbf16>
    %cst_131 = arith.constant dense<0.000000e+00> : vector<8x64xf32>
    %381 = tpu.matmul %380, %22, %cst_131 {dimension_numbers = #tpu.dot_dimension_numbers<[1], [0], [0], [1], [0, 0, 1, 1], [], []>} : vector<8x32xbf16>, vector<32x64xbf16>, vector<8x64xf32> -> vector<8x64xf32>
    %382 = vector.broadcast %23 : vector<1x64xf32> to vector<8x64xf32>
    %383 = arith.addf %381, %382 : vector<8x64xf32>
    %cst_132 = arith.constant 0.000000e+00 : f32
    %384 = vector.broadcast %cst_132 : f32 to vector<8x64xf32>
    %385 = arith.maximumf %383, %384 : vector<8x64xf32>
    %386 = arith.truncf %385 : vector<8x64xf32> to vector<8x64xbf16>
    %cst_133 = arith.constant dense<0.000000e+00> : vector<8x32xf32>
    %387 = tpu.matmul %386, %24, %cst_133 {dimension_numbers = #tpu.dot_dimension_numbers<[1], [0], [0], [1], [0, 0, 1, 1], [], []>} : vector<8x64xbf16>, vector<64x32xbf16>, vector<8x32xf32> -> vector<8x32xf32>
    %388 = vector.broadcast %25 : vector<1x32xf32> to vector<8x32xf32>
    %389 = arith.addf %387, %388 : vector<8x32xf32>
    %390 = arith.addf %379, %389 : vector<8x32xf32>
    %cst_134 = arith.constant dense<0.000000e+00> : vector<8xf32>
    %391 = vector.multi_reduction <add>, %390, %cst_134 [1] : vector<8x32xf32> to vector<8xf32>
    %392 = vector.shape_cast %391 : vector<8xf32> to vector<8x1xf32>
    %cst_135 = arith.constant 3.200000e+01 : f32
    %393 = vector.broadcast %cst_135 : f32 to vector<8x1xf32>
    %394 = arith.divf %392, %393 : vector<8x1xf32>
    %395 = vector.broadcast %394 : vector<8x1xf32> to vector<8x32xf32>
    %396 = arith.subf %390, %395 : vector<8x32xf32>
    %397 = arith.mulf %396, %396 : vector<8x32xf32>
    %cst_136 = arith.constant dense<0.000000e+00> : vector<8xf32>
    %398 = vector.multi_reduction <add>, %397, %cst_136 [1] : vector<8x32xf32> to vector<8xf32>
    %399 = vector.shape_cast %398 : vector<8xf32> to vector<8x1xf32>
    %cst_137 = arith.constant 3.200000e+01 : f32
    %400 = vector.broadcast %cst_137 : f32 to vector<8x1xf32>
    %401 = arith.divf %399, %400 : vector<8x1xf32>
    %402 = vector.broadcast %394 : vector<8x1xf32> to vector<8x32xf32>
    %403 = arith.subf %390, %402 : vector<8x32xf32>
    %cst_138 = arith.constant 9.99999974E-6 : f32
    %404 = vector.broadcast %cst_138 : f32 to vector<8x1xf32>
    %405 = arith.addf %401, %404 : vector<8x1xf32>
    %406 = math.rsqrt %405 : vector<8x1xf32>
    %407 = vector.broadcast %406 : vector<8x1xf32> to vector<8x32xf32>
    %408 = arith.mulf %403, %407 : vector<8x32xf32>
    %409 = vector.broadcast %20 : vector<1x32xf32> to vector<8x32xf32>
    %410 = arith.mulf %408, %409 : vector<8x32xf32>
    %411 = vector.broadcast %21 : vector<1x32xf32> to vector<8x32xf32>
    %412 = arith.addf %410, %411 : vector<8x32xf32>
    %c0_139 = arith.constant 0 : index
    %c0_140 = arith.constant 0 : index
    %c0_141 = arith.constant 0 : index
    %413 = vector.load %arg33[%c0_139, %c0_140, %c0_141] : memref<1x8x32xf32, #tpu.memory_space<vmem>>, vector<1x8x32xf32>
    %414 = vector.shape_cast %413 : vector<1x8x32xf32> to vector<8x32xf32>
    %415 = vector.shape_cast %412 : vector<8x32xf32> to vector<1x8x32xf32>
    tpu.vector_store %arg33[%c0_139, %c0_140, %c0_141], %415 {strides = array<i32>} : memref<1x8x32xf32, #tpu.memory_space<vmem>>, vector<1x8x32xf32>,
    %c0_142 = arith.constant 0 : index
    %c0_143 = arith.constant 0 : index
    %c0_144 = arith.constant 0 : index
    %c0_145 = arith.constant 0 : index
    %416 = vector.load %arg34[%c0_142, %c0_143, %c0_144, %c0_145] : memref<1x4x8x10xf32, #tpu.memory_space<vmem>>, vector<1x4x8x10xf32>
    %417 = vector.shape_cast %416 : vector<1x4x8x10xf32> to vector<4x8x10xf32>
    %418 = vector.shape_cast %325 : vector<4x8x10xf32> to vector<1x4x8x10xf32>
    tpu.vector_store %arg34[%c0_142, %c0_143, %c0_144, %c0_145], %418 {strides = array<i32>} : memref<1x4x8x10xf32, #tpu.memory_space<vmem>>, vector<1x4x8x10xf32>,
    return
  }
  func.func @transform_0(%arg0: i32, %arg1: i32) -> (i32, i32, i32) {
    %c0_i32 = arith.constant 0 : i32
    %c0_i32_0 = arith.constant 0 : i32
    return %arg0, %arg1, %c0_i32 : i32, i32, i32
  }
  func.func @transform_1(%arg0: i32, %arg1: i32) -> (i32, i32, i32) {
    %c0_i32 = arith.constant 0 : i32
    %c0_i32_0 = arith.constant 0 : i32
    %c0_i32_1 = arith.constant 0 : i32
    return %arg0, %c0_i32, %c0_i32_0 : i32, i32, i32
  }
  func.func @transform_2(%arg0: i32, %arg1: i32) -> (i32, i32, i32) {
    %c0_i32 = arith.constant 0 : i32
    %c0_i32_0 = arith.constant 0 : i32
    %c0_i32_1 = arith.constant 0 : i32
    return %arg0, %c0_i32, %c0_i32_0 : i32, i32, i32
  }
  func.func @transform_3(%arg0: i32, %arg1: i32) -> (i32, i32, i32, i32) {
    %c0_i32 = arith.constant 0 : i32
    %c0_i32_0 = arith.constant 0 : i32
    %c0_i32_1 = arith.constant 0 : i32
    return %arg0, %c0_i32, %arg1, %c0_i32_0 : i32, i32, i32, i32
  }
  func.func @transform_4(%arg0: i32, %arg1: i32) -> (i32, i32, i32, i32) {
    %c0_i32 = arith.constant 0 : i32
    %c0_i32_0 = arith.constant 0 : i32
    %c0_i32_1 = arith.constant 0 : i32
    %c0_i32_2 = arith.constant 0 : i32
    return %arg0, %c0_i32, %c0_i32_0, %c0_i32_1 : i32, i32, i32, i32
  }
  func.func @transform_5(%arg0: i32, %arg1: i32) -> (i32, i32, i32) {
    %c0_i32 = arith.constant 0 : i32
    %c0_i32_0 = arith.constant 0 : i32
    %c0_i32_1 = arith.constant 0 : i32
    %c0_i32_2 = arith.constant 0 : i32
    return %c0_i32, %c0_i32_0, %c0_i32_1 : i32, i32, i32
  }
  func.func @transform_6(%arg0: i32, %arg1: i32) -> (i32, i32, i32) {
    %c0_i32 = arith.constant 0 : i32
    %c0_i32_0 = arith.constant 0 : i32
    %c0_i32_1 = arith.constant 0 : i32
    %c0_i32_2 = arith.constant 0 : i32
    return %c0_i32, %c0_i32_0, %c0_i32_1 : i32, i32, i32
  }
  func.func @transform_7(%arg0: i32, %arg1: i32) -> (i32, i32, i32) {
    %c0_i32 = arith.constant 0 : i32
    %c0_i32_0 = arith.constant 0 : i32
    %c0_i32_1 = arith.constant 0 : i32
    %c0_i32_2 = arith.constant 0 : i32
    return %c0_i32, %c0_i32_0, %c0_i32_1 : i32, i32, i32
  }
  func.func @transform_8(%arg0: i32, %arg1: i32) -> (i32, i32, i32) {
    %c0_i32 = arith.constant 0 : i32
    %c0_i32_0 = arith.constant 0 : i32
    %c0_i32_1 = arith.constant 0 : i32
    %c0_i32_2 = arith.constant 0 : i32
    return %c0_i32, %c0_i32_0, %c0_i32_1 : i32, i32, i32
  }
  func.func @transform_9(%arg0: i32, %arg1: i32) -> (i32, i32, i32) {
    %c0_i32 = arith.constant 0 : i32
    %c0_i32_0 = arith.constant 0 : i32
    %c0_i32_1 = arith.constant 0 : i32
    %c0_i32_2 = arith.constant 0 : i32
    return %c0_i32, %c0_i32_0, %c0_i32_1 : i32, i32, i32
  }
  func.func @transform_10(%arg0: i32, %arg1: i32) -> (i32, i32, i32) {
    %c0_i32 = arith.constant 0 : i32
    %c0_i32_0 = arith.constant 0 : i32
    %c0_i32_1 = arith.constant 0 : i32
    %c0_i32_2 = arith.constant 0 : i32
    return %c0_i32, %c0_i32_0, %c0_i32_1 : i32, i32, i32
  }
  func.func @transform_11(%arg0: i32, %arg1: i32) -> (i32, i32, i32) {
    %c0_i32 = arith.constant 0 : i32
    %c0_i32_0 = arith.constant 0 : i32
    %c0_i32_1 = arith.constant 0 : i32
    %c0_i32_2 = arith.constant 0 : i32
    return %c0_i32, %c0_i32_0, %c0_i32_1 : i32, i32, i32
  }
  func.func @transform_12(%arg0: i32, %arg1: i32) -> (i32, i32) {
    %c0_i32 = arith.constant 0 : i32
    %c0_i32_0 = arith.constant 0 : i32
    %c0_i32_1 = arith.constant 0 : i32
    return %c0_i32, %c0_i32_0 : i32, i32
  }
  func.func @transform_13(%arg0: i32, %arg1: i32) -> (i32, i32, i32) {
    %c0_i32 = arith.constant 0 : i32
    %c0_i32_0 = arith.constant 0 : i32
    %c0_i32_1 = arith.constant 0 : i32
    %c0_i32_2 = arith.constant 0 : i32
    return %c0_i32, %c0_i32_0, %c0_i32_1 : i32, i32, i32
  }
  func.func @transform_14(%arg0: i32, %arg1: i32) -> (i32, i32, i32) {
    %c0_i32 = arith.constant 0 : i32
    %c0_i32_0 = arith.constant 0 : i32
    %c0_i32_1 = arith.constant 0 : i32
    %c0_i32_2 = arith.constant 0 : i32
    return %c0_i32, %c0_i32_0, %c0_i32_1 : i32, i32, i32
  }
  func.func @transform_15(%arg0: i32, %arg1: i32) -> (i32, i32, i32) {
    %c0_i32 = arith.constant 0 : i32
    %c0_i32_0 = arith.constant 0 : i32
    %c0_i32_1 = arith.constant 0 : i32
    %c0_i32_2 = arith.constant 0 : i32
    return %c0_i32, %c0_i32_0, %c0_i32_1 : i32, i32, i32
  }
  func.func @transform_16(%arg0: i32, %arg1: i32) -> (i32, i32, i32) {
    %c0_i32 = arith.constant 0 : i32
    %c0_i32_0 = arith.constant 0 : i32
    %c0_i32_1 = arith.constant 0 : i32
    %c0_i32_2 = arith.constant 0 : i32
    return %c0_i32, %c0_i32_0, %c0_i32_1 : i32, i32, i32
  }
  func.func @transform_17(%arg0: i32, %arg1: i32) -> (i32, i32, i32) {
    %c0_i32 = arith.constant 0 : i32
    %c0_i32_0 = arith.constant 0 : i32
    %c0_i32_1 = arith.constant 0 : i32
    %c0_i32_2 = arith.constant 0 : i32
    return %c0_i32, %c0_i32_0, %c0_i32_1 : i32, i32, i32
  }
  func.func @transform_18(%arg0: i32, %arg1: i32) -> (i32, i32, i32) {
    %c0_i32 = arith.constant 0 : i32
    %c0_i32_0 = arith.constant 0 : i32
    %c0_i32_1 = arith.constant 0 : i32
    %c0_i32_2 = arith.constant 0 : i32
    return %c0_i32, %c0_i32_0, %c0_i32_1 : i32, i32, i32
  }
  func.func @transform_19(%arg0: i32, %arg1: i32) -> (i32, i32, i32) {
    %c0_i32 = arith.constant 0 : i32
    %c0_i32_0 = arith.constant 0 : i32
    %c0_i32_1 = arith.constant 0 : i32
    %c0_i32_2 = arith.constant 0 : i32
    return %c0_i32, %c0_i32_0, %c0_i32_1 : i32, i32, i32
  }
  func.func @transform_20(%arg0: i32, %arg1: i32) -> (i32, i32) {
    %c0_i32 = arith.constant 0 : i32
    %c0_i32_0 = arith.constant 0 : i32
    %c0_i32_1 = arith.constant 0 : i32
    return %c0_i32, %c0_i32_0 : i32, i32
  }
  func.func @transform_21(%arg0: i32, %arg1: i32) -> (i32, i32) {
    %c0_i32 = arith.constant 0 : i32
    %c0_i32_0 = arith.constant 0 : i32
    %c0_i32_1 = arith.constant 0 : i32
    return %c0_i32, %c0_i32_0 : i32, i32
  }
  func.func @transform_22(%arg0: i32, %arg1: i32) -> (i32, i32) {
    %c0_i32 = arith.constant 0 : i32
    %c0_i32_0 = arith.constant 0 : i32
    %c0_i32_1 = arith.constant 0 : i32
    return %c0_i32, %c0_i32_0 : i32, i32
  }
  func.func @transform_23(%arg0: i32, %arg1: i32) -> (i32, i32) {
    %c0_i32 = arith.constant 0 : i32
    %c0_i32_0 = arith.constant 0 : i32
    %c0_i32_1 = arith.constant 0 : i32
    return %c0_i32, %c0_i32_0 : i32, i32
  }
  func.func @transform_24(%arg0: i32, %arg1: i32) -> (i32, i32) {
    %c0_i32 = arith.constant 0 : i32
    %c0_i32_0 = arith.constant 0 : i32
    %c0_i32_1 = arith.constant 0 : i32
    return %c0_i32, %c0_i32_0 : i32, i32
  }
  func.func @transform_25(%arg0: i32, %arg1: i32) -> (i32, i32) {
    %c0_i32 = arith.constant 0 : i32
    %c0_i32_0 = arith.constant 0 : i32
    %c0_i32_1 = arith.constant 0 : i32
    return %c0_i32, %c0_i32_0 : i32, i32
  }
  func.func @transform_26(%arg0: i32, %arg1: i32) -> (i32, i32) {
    %c0_i32 = arith.constant 0 : i32
    %c0_i32_0 = arith.constant 0 : i32
    %c0_i32_1 = arith.constant 0 : i32
    return %c0_i32, %c0_i32_0 : i32, i32
  }
  func.func @transform_27(%arg0: i32, %arg1: i32) -> (i32, i32) {
    %c0_i32 = arith.constant 0 : i32
    %c0_i32_0 = arith.constant 0 : i32
    %c0_i32_1 = arith.constant 0 : i32
    return %c0_i32, %c0_i32_0 : i32, i32
  }
  func.func @transform_28(%arg0: i32, %arg1: i32) -> (i32, i32) {
    %c0_i32 = arith.constant 0 : i32
    %c0_i32_0 = arith.constant 0 : i32
    %c0_i32_1 = arith.constant 0 : i32
    return %c0_i32, %c0_i32_0 : i32, i32
  }
  func.func @transform_29(%arg0: i32, %arg1: i32) -> (i32, i32) {
    %c0_i32 = arith.constant 0 : i32
    %c0_i32_0 = arith.constant 0 : i32
    %c0_i32_1 = arith.constant 0 : i32
    return %c0_i32, %c0_i32_0 : i32, i32
  }
  func.func @transform_30(%arg0: i32, %arg1: i32) -> (i32, i32) {
    %c0_i32 = arith.constant 0 : i32
    %c0_i32_0 = arith.constant 0 : i32
    %c0_i32_1 = arith.constant 0 : i32
    return %c0_i32, %c0_i32_0 : i32, i32
  }
  func.func @transform_31(%arg0: i32, %arg1: i32) -> (i32, i32, i32) {
    %c0_i32 = arith.constant 0 : i32
    %c0_i32_0 = arith.constant 0 : i32
    return %arg0, %arg1, %c0_i32 : i32, i32, i32
  }
  func.func @transform_32(%arg0: i32, %arg1: i32) -> (i32, i32, i32, i32) {
    %c0_i32 = arith.constant 0 : i32
    %c0_i32_0 = arith.constant 0 : i32
    %c0_i32_1 = arith.constant 0 : i32
    return %arg0, %c0_i32, %arg1, %c0_i32_0 : i32, i32, i32, i32
  }
}

</mosaic_0001>

<bundles_post_ra>
// kernel: tpu_custom_call.1
= control target key start
LH: loop header
LB: loop body
LE: loop exit
PB: predicated region body
PF: predicated region fallthrough
CT: control target
= control target key end

     0   :  { %s5329_s6 = smov 1   ;;  %s5330_s10 = smov 2   ;;  %s6089_s0 = inlined_call_operand.smem [shape: u32[33], index: -1, kind: input, shape index: {}] }
   0x1   :  { %s5375_s5 = sld [smem:[%s6089_s0]]   ;;  %s5331_s14 = smov 3  }
   0x2   :  { %s5380_s9 = sld [smem:[%s6089_s0 + %s5329_s6]]   ;;  %s5332_s18 = smov 4  }
   0x3   :  { %s5385_s13 = sld [smem:[%s6089_s0 + %s5330_s10]]   ;;  %s5333_s22 = smov 5  }
   0x4   :  { %s5390_s17 = sld [smem:[%s6089_s0 + %s5331_s14]]   ;;  %s5334_s26 = smov 6  }
   0x5   :  { %s5395_s21 = sld [smem:[%s6089_s0 + %s5332_s18]]   ;;  %s5335_s30 = smov 7  }
   0x6   :  { %s5400_s25 = sld [smem:[%s6089_s0 + %s5333_s22]]   ;;  %s5336_s4 = smov 8  }
   0x7   :  { %6110 = sst [smem:[#allocation8_spill]] %s5375_s5  ;;  %s5337_s10 = smov 9  }
   0x8   :  { %6111 = sst [smem:[#allocation9_spill]] %s5380_s9  ;;  %s5338_s15 = smov 10  }
   0x9   :  { %6112 = sst [smem:[#allocation10_spill]] %s5385_s13  ;;  %s5339_s20 = smov 11  }
   0xa   :  { %6113 = sst [smem:[#allocation11_spill]] %s5390_s17  ;;  %s5341_s1 = smov 13  }
   0xb   :  { %6114 = sst [smem:[#allocation12_spill]] %s5395_s21  ;;  %s5342_s7 = smov 14  }
   0xc   :  { %s5405_s29 = sld [smem:[%s6089_s0 + %s5334_s26]]   ;;  %s5340_s26 = smov 12  }
   0xd   :  { %s5410_s3 = sld [smem:[%s6089_s0 + %s5335_s30]]   ;;  %s5344_s22 = smov 16  }
   0xe   :  { %s5415_s8 = sld [smem:[%s6089_s0 + %s5336_s4]]   ;;  %s5345_s28 = smov 17  }
   0xf   :  { %s5420_s14 = sld [smem:[%s6089_s0 + %s5337_s10]]  }
  0x10   :  { %s5425_s19 = sld [smem:[%s6089_s0 + %s5338_s15]]   ;;  %s5343_s15 = smov 15  }
  0x11   :  { %s5430_s24 = sld [smem:[%s6089_s0 + %s5339_s20]]  }
  0x12   :  { %s5435_s30 = sld [smem:[%s6089_s0 + %s5340_s26]]  }
  0x13   :  { %6115 = sst [smem:[#allocation13_spill]] %s5410_s3 }
  0x14   :  { %6116 = sst [smem:[#allocation14_spill]] %s5415_s8 }
  0x15   :  { %6117 = sst [smem:[#allocation15_spill]] %s5420_s14 }
  0x16   :  { %6118 = sst [smem:[#allocation16_spill]] %s5425_s19 }
  0x17   :  { %s5440_s6 = sld [smem:[%s6089_s0 + %s5341_s1]]  }
  0x18   :  { %s5445_s12 = sld [smem:[%s6089_s0 + %s5342_s7]]   ;;  %s5346_s7 = smov 18  }
  0x19   :  { %s5450_s20 = sld [smem:[%s6089_s0 + %s5343_s15]]   ;;  %s5347_s15 = smov 19  }
  0x1a   :  { %s5455_s27 = sld [smem:[%s6089_s0 + %s5344_s22]]   ;;  %s5348_s22 = smov 20  }
  0x1b   :  { %s5460_s4 = sld [smem:[%s6089_s0 + %s5345_s28]]   ;;  %s5349_s28 = smov 21  }
  0x1c   :  { %s5465_s21 = sld [smem:[%s6089_s0 + %s5346_s7]]   ;;  %s5350_s7 = smov 22  }
  0x1d   :  { %6119 = sst [smem:[#allocation17_spill]] %s5440_s6 }
  0x1e   :  { %6120 = sst [smem:[#allocation18_spill]] %s5445_s12 }
  0x1f   :  { %6121 = sst [smem:[#allocation19_spill]] %s5450_s20 }
  0x20   :  { %6122 = sst [smem:[#allocation20_spill]] %s5455_s27 }
  0x21   :  { %6123 = sst [smem:[#allocation21_spill]] %s5460_s4 }
  0x22   :  { %6124 = sst [smem:[#allocation22_spill]] %s5465_s21 }
  0x23   :  { %s5470_s12 = sld [smem:[%s6089_s0 + %s5347_s15]]   ;;  %s5351_s15 = smov 23  }
  0x24   :  { %s5475_s27 = sld [smem:[%s6089_s0 + %s5348_s22]]   ;;  %s5352_s22 = smov 24  }
  0x25   :  { %s5480_s4 = sld [smem:[%s6089_s0 + %s5349_s28]]   ;;  %s5353_s28 = smov 25  }
  0x26   :  { %s5485_s21 = sld [smem:[%s6089_s0 + %s5350_s7]]   ;;  %s5354_s7 = smov 26  }
  0x27   :  { %s5500_s20 = sld [smem:[%s6089_s0 + %s5353_s28]]   ;;  %s5357_s28 = smov 29  }
  0x28   :  { %s5505_s13 = sld [smem:[%s6089_s0 + %s5354_s7]]   ;;  %s5358_s7 = smov 30  }
  0x29   :  { %6125 = sst [smem:[#allocation23_spill]] %s5470_s12 }
  0x2a   :  { %6126 = sst [smem:[#allocation24_spill]] %s5475_s27 }
  0x2b   :  { %6127 = sst [smem:[#allocation25_spill]] %s5480_s4 }
  0x2c   :  { %s5490_s12 = sld [smem:[%s6089_s0 + %s5351_s15]]   ;;  %s5355_s15 = smov 27  }
  0x2d   :  { %s5495_s27 = sld [smem:[%s6089_s0 + %s5352_s22]]   ;;  %s5356_s22 = smov 28  }
  0x2e   :  { %6130 = sst [smem:[#allocation28_spill]] %s5500_s20 }
  0x2f   :  { %6131 = sst [smem:[#allocation29_spill]] %s5505_s13 }
  0x30   :  { %s5520_s20 = sld [smem:[%s6089_s0 + %s5357_s28]]  }
  0x31   :  { %s5525_s13 = sld [smem:[%s6089_s0 + %s5358_s7]]  }
  0x32   :  { %6128 = sst [smem:[#allocation26_spill]] %s5490_s12 }
  0x33   :  { %6129 = sst [smem:[#allocation27_spill]] %s5495_s27 }
  0x34   :  { %s5510_s12 = sld [smem:[%s6089_s0 + %s5355_s15]]   ;;  %s5359_s15 = smov 31  }
  0x35   :  { %s5515_s27 = sld [smem:[%s6089_s0 + %s5356_s22]]   ;;  %s5360_s22 = smov 32  }
  0x36   :  { %6134 = sst [smem:[#allocation32_spill]] %s5520_s20 }
  0x37   :  { %6135 = sst [smem:[#allocation33_spill]] %s5525_s13 }
  0x3a   :  { %6132 = sst [smem:[#allocation30_spill]] %s5510_s12 }
  0x3b   :  { %6133 = sst [smem:[#allocation31_spill]] %s5515_s27 }
  0x3c   :  { %s5530_s12 = sld [smem:[%s6089_s0 + %s5359_s15]]  }
  0x3d   :  { %s5535_s27 = sld [smem:[%s6089_s0 + %s5360_s22]]  }
  0x42   :  { %6136 = sst [smem:[#allocation34_spill]] %s5530_s12 }
  0x43   :  { %71 = vsyncpa [#allocation3], 0 }
  0x44   :  { %73 = vsyncpa [#allocation3 + $0x1], 0 }
  0x45   :  { %74 = vsyncpa [#allocation5], 0 }
  0x46   :  { %76 = vsyncpa [#allocation5 + $0x1], 0  ;;  %s5537_s28 = smov 0   ;;  %s5539_s1 = smov 0  }
  0x47   :  { %s5541_s2 = smov 0   ;;  %s5543_s7 = smov 0  }
  0x48   :  { %s5545_s10 = smov 0   ;;  %s5547_s11 = smov 0  }
  0x49 LB: > { %s6137_s20 = sld [smem:[#allocation32_spill]]  ;;  %s6139_s14 = sld [smem:[#allocation15_spill]]  ;;  %s5327_s11 = sphi %s5547_s11, %s82_s11   ;;  %s5323_s10 = sphi %s5545_s10, %s6170_s10   ;;  %s5319_s7 = sphi %s5543_s7, %s6169_s7   ;;  %s5315_s2 = sphi %s5541_s2, %s6168_s2   ;;  %s5311_s1 = sphi %s5539_s1, %s6167_s1   ;;  %s5307_s28 = sphi %s5537_s28, %s6166_s28  }
  0x4a   : > { %s6138_s19 = sld [smem:[#allocation16_spill]]  ;;  %s6140_s8 = sld [smem:[#allocation14_spill]] }
  0x4b   : > { %s6141_s6 = sld [smem:[#allocation17_spill]]  ;;  %s6142_s3 = sld [smem:[#allocation13_spill]] }
  0x4c   : > { %s4385_s0 = sadd.s32 4294967295, %s5327_s11   ;;  %s4386_s15 = sadd.s32 4294967294, %s5327_s11  }
  0x4d   : > { %s94_s16 = sadd.s32 1, %s5323_s10  ;;  %s783_s18 = sadd.s32 1, %s5315_s2 }
  0x4e   : > { %p96_p0 = scmp.ge.s32.totalorder %s94_s16, 2  ;;  %p793_p1 = scmp.ne.s32.totalorder %s5315_s2, %s5311_s1 }
  0x4f   : > { %p794_p2 = scmp.eq.s32.totalorder %s4385_s0, 1  ;;  %p799_p3 = scmp.ne.s32.totalorder %s5311_s1, %s5307_s28 }
  0x50   : > { %s6172_s16 = smov (%p96_p0, %s94_s16), 0  ;;  %p800_p5 = scmp.eq.s32.totalorder %s4386_s15, 1 }
  0x51   : > { %p5577_p4 = por %p794_p2, %p793_p1  ;;  %s778_s23 = ssub.s32 %s5323_s10, %s6172_s16 }
  0x52   : > { %p4389_p6 = scmp.ge.s32.totalorder %s5327_s11, 1  ;;  %p781_p7 = scmp.eq.s32.totalorder %s778_s23, 0 }
  0x53   : > { %p5584_p8 = por %p800_p5, %p799_p3  ;;  %p965_p9 = scmp.lt.s32.totalorder %s5327_s11, 3 }
  0x54   : > { %s5590_s12 = scalar_select %p781_p7, %s5315_s2, %s783_s18  }
  0x55   : > { %p966_p10 = pnand %p4389_p6, %p965_p9 }
  0x56   : > { %v5125_v0 = vld [vmem:[%s5400_s25] sm:$0xff] (!%p966_p10)   ;;  %v5361_v1 = vmov (!%p966_p10), 0.0   ;;  %s6145_s5 = sld [smem:[#allocation8_spill]] (!%p966_p10)  ;;  %v5126_v2 = vld [vmem:[%s5400_s25 + $0x10] sm:$0xff] (!%p966_p10)   ;;  %v5127_v3 = vld [vmem:[%s5400_s25 + $0x8] sm:$0xff] (!%p966_p10)   ;;  %vm5362_vm0 = vmmov (!%p966_p10), 0  }
  0x57   : > { %969 = sbr.rel (%p966_p10) target bundleno = 3917 (0xf4d), region = 144  ;;  %4673 = vmatprep.subr.bf16.mxu0 (!%p966_p10), %v5361_v1  ;;  %4681 = vmatprep.subr.bf16.mxu1 (!%p966_p10), %v5361_v1  ;;  %p1073_p11 = scmp.lt.s32.totalorder (!%p966_p10), %s5319_s7, 1  ;;  %v5128_v4 = vld [vmem:[%s5400_s25 + $0x18] sm:$0xff] (!%p966_p10)   ;;  %vm1276_vm1 = vcmask (!%p966_p10), 261120   ;;  %v5129_v6 = vld [vmem:[%s5400_s25 + $0x20] sm:$0xff] (!%p966_p10)   ;;  %v5130_v7 = vld [vmem:[%s5400_s25 + $0x30] sm:$0xff] (!%p966_p10)  }
  0x58   : > { %4674 = vmatpush3.bf16.msra.mxu0 (!%p966_p10), %v5125_v0  ;;  %4677 = vmatprep.mubr.msk.bf16.mxu0 (!%p966_p10), %vm5362_vm0, %v5361_v1  ;;  %s6146_s9 = sld [smem:[#allocation9_spill]] (!%p966_p10)  ;;  %v5131_v9 = vld [vmem:[%s5400_s25 + $0x28] sm:$0xff] (!%p966_p10)   ;;  %v5132_v10 = vld [vmem:[%s5400_s25 + $0x38] sm:$0xff] (!%p966_p10)   ;;  %v5133_v11 = vld [vmem:[%s6142_s3] sm:$0xff] (!%p966_p10)   ;;  %vm1973_vm2 = vcmask (!%p966_p10), 64512   ;;  %vm2209_vm3 = vcmask (!%p966_p10), 1043456  }
  0x59   : > { %4682 = vmatpush3.bf16.msra.mxu1 (!%p966_p10), %v5126_v2  ;;  %4675 = vmatprep.subr.bf16.mxu0 (!%p966_p10), %v5361_v1  ;;  %v5134_v12 = vld [vmem:[%s6142_s3 + $0x10] sm:$0xff] (!%p966_p10)   ;;  %v5135_v14 = vld [vmem:[%s6142_s3 + $0x8] sm:$0xff] (!%p966_p10)   ;;  %v5136_v15 = vld [vmem:[%s6142_s3 + $0x18] sm:$0xff] (!%p966_p10)   ;;  %s6147_s17 = sld [smem:[#allocation11_spill]] (!%p966_p10)  ;;  %s6148_s4 = sld [smem:[#allocation25_spill]] (!%p966_p10)  ;;  %vm3584_vm4 = vcmask (!%p966_p10), 1044480  }
  0x5a   : > { %4683 = vmatprep.subr.bf16.mxu1 (!%p966_p10), %v5361_v1  ;;  %4685 = vmatprep.mubr.msk.bf16.mxu1 (!%p966_p10), %vm5362_vm0, %v5361_v1  ;;  %v5137_v16 = vld [vmem:[%s6142_s3 + $0x20] sm:$0xff] (!%p966_p10)   ;;  %v5138_v17 = vld [vmem:[%s6142_s3 + $0x30] sm:$0xff] (!%p966_p10)   ;;  %v5139_v19 = vld [vmem:[%s6142_s3 + $0x28] sm:$0xff] (!%p966_p10)   ;;  %vm3532_vm5 = vcmask (!%p966_p10), 80896   ;;  %s6162_s13 = sld [smem:[#allocation33_spill]] (!%p966_p10)  ;;  %vm4086_vm6 = vcmask (!%p966_p10), 523264  }
  0x5b   : > { %v5140_v20 = vld [vmem:[%s6142_s3 + $0x38] sm:$0xff] (!%p966_p10)   ;;  %v5141_v21 = vld [vmem:[%s6139_s14] sm:$0xff] (!%p966_p10)   ;;  %v5142_v22 = vld [vmem:[%s6139_s14 + $0x10] sm:$0xff] (!%p966_p10)  }
  0x5c   : > { %4676 = vmatpush3.bf16.msra.mxu0 (!%p966_p10), %v5127_v3  ;;  %v5143_v23 = vld [vmem:[%s6139_s14 + $0x8] sm:$0xff] (!%p966_p10)   ;;  %v5144_v24 = vld [vmem:[%s6139_s14 + $0x18] sm:$0xff] (!%p966_p10)   ;;  %v5145_v25 = vld [vmem:[%s6139_s14 + $0x20] sm:$0xff] (!%p966_p10)  }
  0x5d   : > { %4684 = vmatpush3.bf16.msra.mxu1 (!%p966_p10), %v5128_v4  ;;  %4689 = vmatprep.subr.bf16.mxu0 (!%p966_p10), %v5361_v1  ;;  %v5146_v26 = vld [vmem:[%s6139_s14 + $0x30] sm:$0xff] (!%p966_p10)   ;;  %v5147_v27 = vld [vmem:[%s6139_s14 + $0x28] sm:$0xff] (!%p966_p10)   ;;  %v5148_v28 = vld [vmem:[%s6139_s14 + $0x38] sm:$0xff] (!%p966_p10)  }
  0x5e   : > { %s5606_s0 = scalar_select %p1073_p11, %s5319_s7, 1  ;;  %4697 = vmatprep.subr.bf16.mxu1 %v5361_v1  ;;  %v4413_v45 = vld [vmem:[%s6140_s8] ss:$0 sm:$0xff]  ;;  %v4417_v46 = vld [vmem:[%s6140_s8 + $0x1] ss:$0 sm:$0xff] }
  0x5f   : > { %v4397_v59 = vld [vmem:[%s5405_s29] ss:$0 sm:$0xff]  ;;  %v4401_v60 = vld [vmem:[%s5405_s29 + $0x1] ss:$0 sm:$0xff]  ;;  %v4421_v63 = vld [vmem:[%s6140_s8 + $0x2] ss:$0 sm:$0xff] }
  0x60   : > { %s5609_s15 = sshll.u32 %s5606_s0, 3  ;;  %v4425_v0 = vld [vmem:[%s6140_s8 + $0x3] ss:$0 sm:$0xff]  ;;  %s6161_s8 = sld [smem:[#allocation31_spill]] }
  0x61   : > { %s1079_s18 = scalar_lea.vmem %s6145_s5, %s5609_s15  ;;  %s1083_s23 = scalar_lea.vmem %s6146_s9, %s5609_s15 }
  0x62   : > { %v5614_v5 = vld [vmem:[%s1079_s18] sm:$0xff]  ;;  %s1095_s18 = scalar_lea.vmem %s6147_s17, %s5609_s15  ;;  %s6149_s15 = sld [smem:[#allocation10_spill]] }
  0x63   : > { %v1256_v8 = vpack.c.bf16 %v5614_v5, %v5614_v5  ;;  %v1251_v13 = vld [vmem:[%s1083_s23] sm:$0xff]  ;;  %s6150_s23 = sld [smem:[#allocation19_spill]] }
  0x64   : > { %v1257_v18 = vpack.c.bf16 %v1251_v13, %v1251_v13 }
  0x65   : > { %4678 = vmatmul.mubr.msk.bf16.vlgmr.msra.gmra.mrb[0].mxu0 %vm1276_vm1, %v1256_v8  ;;  %4686 = vmatmul.mubr.msk.bf16.vlgmr.msra.gmra.mrb[0].mxu1 %vm1276_vm1, %v1256_v8 }
  0x66   : > { %4690 = vmatpush3.bf16.msra.mxu0 %v5129_v6  ;;  %4698 = vmatpush3.bf16.msra.mxu1 %v5130_v7 }
  0x67   : > { %4691 = vmatprep.subr.bf16.mxu0 %v5361_v1  ;;  %4699 = vmatprep.subr.bf16.mxu1 %v5361_v1 }
  0x68   : > { %4693 = vmatprep.mubr.msk.bf16.mxu0 %vm5362_vm0, %v5361_v1  ;;  %4701 = vmatprep.mubr.msk.bf16.mxu1 %vm5362_vm0, %v5361_v1 }
  0x6a   : > { %4692 = vmatpush3.bf16.msra.mxu0 %v5131_v9  ;;  %4700 = vmatpush3.bf16.msra.mxu1 %v5132_v10 }
  0x6b   : > { %4705 = vmatprep.subr.bf16.mxu0 %v5361_v1  ;;  %4713 = vmatprep.subr.bf16.mxu1 %v5361_v1 }
  0x6d   : > { %4694 = vmatmul.mubr.msk.bf16.vlgmr.msra.gmra.mrb[4].mxu0 %vm1276_vm1, %v1256_v8  ;;  %4702 = vmatmul.mubr.msk.bf16.vlgmr.msra.gmra.mrb[4].mxu1 %vm1276_vm1, %v1256_v8 }
  0x6e   : > { %4706 = vmatpush3.bf16.msra.mxu0 %v5133_v11  ;;  %4714 = vmatpush3.bf16.msra.mxu1 %v5134_v12 }
  0x6f   : > { %4707 = vmatprep.subr.bf16.mxu0 %v5361_v1  ;;  %4715 = vmatprep.subr.bf16.mxu1 %v5361_v1 }
  0x70   : > { %4709 = vmatprep.mubr.msk.bf16.mxu0 %vm5362_vm0, %v5361_v1  ;;  %4717 = vmatprep.mubr.msk.bf16.mxu1 %vm5362_vm0, %v5361_v1 }
  0x72   : > { %4708 = vmatpush3.bf16.msra.mxu0 %v5135_v14  ;;  %4716 = vmatpush3.bf16.msra.mxu1 %v5136_v15 }
  0x73   : > { %4721 = vmatprep.subr.bf16.mxu0 %v5361_v1  ;;  %4729 = vmatprep.subr.bf16.mxu1 %v5361_v1 }
  0x75   : > { %4710 = vmatmul.mubr.msk.bf16.vlgmr.msra.gmra.mrb[8].mxu0 %vm1276_vm1, %v1257_v18  ;;  %4718 = vmatmul.mubr.msk.bf16.vlgmr.msra.gmra.mrb[8].mxu1 %vm1276_vm1, %v1257_v18 }
  0x76   : > { %4722 = vmatpush3.bf16.msra.mxu0 %v5137_v16  ;;  %4730 = vmatpush3.bf16.msra.mxu1 %v5138_v17 }
  0x77   : > { %4723 = vmatprep.subr.bf16.mxu0 %v5361_v1  ;;  %4731 = vmatprep.subr.bf16.mxu1 %v5361_v1 }
  0x78   : > { %4725 = vmatprep.mubr.msk.bf16.mxu0 %vm5362_vm0, %v5361_v1  ;;  %4733 = vmatprep.mubr.msk.bf16.mxu1 %vm5362_vm0, %v5361_v1 }
  0x7a   : > { %4724 = vmatpush3.bf16.msra.mxu0 %v5139_v19  ;;  %4732 = vmatpush3.bf16.msra.mxu1 %v5140_v20  ;;  %v4405_v19 = vld [vmem:[%s5405_s29 + $0x2] ss:$0 sm:$0xff]  ;;  %v4409_v20 = vld [vmem:[%s5405_s29 + $0x3] ss:$0 sm:$0xff] }
  0x7b   : > { %4737 = vmatprep.subr.bf16.mxu0 %v5361_v1  ;;  %4745 = vmatprep.subr.bf16.mxu1 %v5361_v1 }
  0x7d   : > { %4726 = vmatmul.mubr.msk.bf16.vlgmr.msra.gmra.mrb[12].mxu0 %vm1276_vm1, %v1257_v18  ;;  %4734 = vmatmul.mubr.msk.bf16.vlgmr.msra.gmra.mrb[12].mxu1 %vm1276_vm1, %v1257_v18 }
  0x7e   : > { %4738 = vmatpush3.bf16.msra.mxu0 %v5141_v21  ;;  %4741 = vmatprep.mubr.msk.bf16.mxu0 %vm5362_vm0, %v5361_v1 }
  0x7f   : > { %4739 = vmatprep.subr.bf16.mxu0 %v5361_v1  ;;  %4749 = vmatprep.mubr.msk.bf16.mxu1 %vm5362_vm0, %v5361_v1 }
  0x80   : > { %4746 = vmatpush3.bf16.msra.mxu1 %v5142_v22 }
  0x81   : > { %4747 = vmatprep.subr.bf16.mxu1 %v5361_v1 }
  0x82   : > { %4740 = vmatpush3.bf16.msra.mxu0 %v5143_v23 }
  0x83   : > { %4753 = vmatprep.subr.bf16.mxu0 %v5361_v1 }
  0x84   : > { %4748 = vmatpush3.bf16.msra.mxu1 %v5144_v24 }
  0x85   : > { %4742 = vmatmul.mubr.msk.bf16.vlgmr.msra.gmra.mrb[16].mxu0 %vm1276_vm1, %v1257_v18  ;;  %4761 = vmatprep.subr.bf16.mxu1 %v5361_v1 }
  0x86   : > { %4757 = vmatprep.mubr.msk.bf16.mxu0 %vm5362_vm0, %v5361_v1  ;;  %4754 = vmatpush3.bf16.msra.mxu0 %v5145_v25 }
  0x87   : > { %4750 = vmatmul.mubr.msk.bf16.vlgmr.msra.gmra.mrb[16].mxu1 %vm1276_vm1, %v1257_v18  ;;  %4755 = vmatprep.subr.bf16.mxu0 %v5361_v1 }
  0x88   : > { %4762 = vmatpush3.bf16.msra.mxu1 %v5146_v26  ;;  %4765 = vmatprep.mubr.msk.bf16.mxu1 %vm5362_vm0, %v5361_v1 }
  0x89   : > { %4763 = vmatprep.subr.bf16.mxu1 %v5361_v1 }
  0x8a   : > { %4756 = vmatpush3.bf16.msra.mxu0 %v5147_v27  ;;  %v4429_v27 = vld [vmem:[%s6138_s19] ss:$0 sm:$0xff] }
  0x8b   : > { %4769 = vmatprep.subr.bf16.mxu0 %v5361_v1 }
  0x8c   : > { %4764 = vmatpush3.bf16.msra.mxu1 %v5148_v28 }
  0x8d   : > { %4775 = vmatprep.subr.bf16.mxu1 %v5361_v1  ;;  %4758 = vmatmul.mubr.msk.bf16.vlgmr.msra.gmra.mrb[20].mxu0 %vm1276_vm1, %v1257_v18 }
  0x8e   : > { %4771 = vmatprep.mubr.msk.bf16.mxu0 %vm5362_vm0, %v5361_v1 }
  0x8f   : > { %4766 = vmatmul.mubr.msk.bf16.vlgmr.msra.gmra.mrb[20].mxu1 %vm1276_vm1, %v1257_v18 }
  0x90   : > { %4777 = vmatprep.mubr.msk.bf16.mxu1 %vm5362_vm0, %v5361_v1 }
 0x138   : > { %v1314_v29 = vpop.f32.mrb[0].mxu0  ;;  %v1372_v30 = vpop.f32.mrb[0].mxu1 }
 0x139   : > { %v4679_v31 = vpop.f32.mrb[1].mxu0  ;;  %v4687_v32 = vpop.f32.mrb[1].mxu1  ;;  %v1315_v2 = vadd.f32 %v4397_v59, %v1314_v29  ;;  %v1373_v3 = vadd.f32 %v4401_v60, %v1372_v30  ;;  %v4433_v29 = vld [vmem:[%s6138_s19 + $0x1] ss:$0 sm:$0xff] }
 0x13a   : > { %v1317_v33 = vpop.f32.mrb[2].mxu0  ;;  %v1375_v34 = vpop.f32.mrb[2].mxu1 }
 0x13b   : > { %v4680_v35 = vpop.f32.mrb[3].mxu0  ;;  %v4688_v36 = vpop.f32.mrb[3].mxu1  ;;  %v1494_v13 = vpack.c.bf16 %v1315_v2, %v1315_v2  ;;  %v1495_v14 = vpack.c.bf16 %v1373_v3, %v1373_v3 }
 0x140   : > { %v1430_v37 = vpop.f32.mrb[4].mxu0  ;;  %v1488_v38 = vpop.f32.mrb[4].mxu1 }
 0x141   : > { %v4695_v39 = vpop.f32.mrb[5].mxu0  ;;  %v4703_v40 = vpop.f32.mrb[5].mxu1  ;;  %v1431_v23 = vadd.f32 %v4405_v19, %v1430_v37  ;;  %v1489_v24 = vadd.f32 %v4409_v20, %v1488_v38 }
 0x142   : > { %v1433_v41 = vpop.f32.mrb[6].mxu0  ;;  %v1491_v42 = vpop.f32.mrb[6].mxu1 }
 0x143   : > { %v4696_v43 = vpop.f32.mrb[7].mxu0  ;;  %v4704_v44 = vpop.f32.mrb[7].mxu1  ;;  %v1496_v25 = vpack.c.bf16 %v1431_v23, %v1431_v23  ;;  %v1497_v26 = vpack.c.bf16 %v1489_v24, %v1489_v24 }
 0x148   : > { %v1553_v47 = vpop.f32.mrb[8].mxu0  ;;  %v1611_v48 = vpop.f32.mrb[8].mxu1 }
 0x149   : > { %v1554_v49 = vadd.f32 %v4413_v45, %v1553_v47  ;;  %v1612_v50 = vadd.f32 %v4417_v46, %v1611_v48  ;;  %v4711_v51 = vpop.f32.mrb[9].mxu0  ;;  %v4719_v52 = vpop.f32.mrb[9].mxu1 }
 0x14a   : > { %v1556_v53 = vpop.f32.mrb[10].mxu0  ;;  %v1614_v54 = vpop.f32.mrb[10].mxu1  ;;  %v1254_v51 = vld [vmem:[%s1095_s18] sm:$0xff]  ;;  %s4543_s18 = sshll.u32 %s5606_s0, 4 }
 0x14b   : > { %v1733_v55 = vpack.c.bf16 %v1554_v49, %v1554_v49  ;;  %v1734_v56 = vpack.c.bf16 %v1612_v50, %v1612_v50  ;;  %v4712_v57 = vpop.f32.mrb[11].mxu0  ;;  %v4720_v58 = vpop.f32.mrb[11].mxu1  ;;  %s1088_s3 = scalar_lea.vmem %s6149_s15, %s4543_s18  ;;  %s6152_s15 = sld [smem:[#allocation20_spill]] }
 0x14c   : > { %s6153_s18 = sld [smem:[#allocation18_spill]] }
 0x14d   : > { %v1978_v61 = vsel %vm1973_vm2, %v1733_v55, 0  ;;  %v2024_v62 = vsel %vm1973_vm2, %v1734_v56, 0 }
 0x14e   : > { %4770 = vmatpush3.bf16.xpose.msra.mxu0 %v1978_v61  ;;  %4776 = vmatpush3.bf16.xpose.msra.mxu1 %v2024_v62 }
 0x14f   : > { %4781 = vmatprep.subr.bf16.mxu0 %v5361_v1  ;;  %4787 = vmatprep.subr.bf16.mxu1 %v5361_v1 }
 0x150   : > { %v1669_v4 = vpop.f32.mrb[12].mxu0  ;;  %v1727_v6 = vpop.f32.mrb[12].mxu1 }
 0x151   : > { %v1670_v7 = vadd.f32 %v4421_v63, %v1669_v4  ;;  %v1728_v8 = vadd.f32 %v4425_v0, %v1727_v6  ;;  %v4727_v9 = vpop.f32.mrb[13].mxu0  ;;  %v4735_v10 = vpop.f32.mrb[13].mxu1 }
 0x152   : > { %v1672_v11 = vpop.f32.mrb[14].mxu0  ;;  %v1730_v12 = vpop.f32.mrb[14].mxu1 }
 0x153   : > { %v1735_v15 = vpack.c.bf16 %v1670_v7, %v1670_v7  ;;  %v1736_v16 = vpack.c.bf16 %v1728_v8, %v1728_v8  ;;  %v4728_v17 = vpop.f32.mrb[15].mxu0  ;;  %v4736_v18 = vpop.f32.mrb[15].mxu1 }
 0x155   : > { %v2070_v21 = vsel %vm1973_vm2, %v1735_v15, 0  ;;  %v2116_v22 = vsel %vm1973_vm2, %v1736_v16, 0  ;;  %4772 = vmatmul.mubr.msk.bf16.vlgmr.msra.gmra.mrb[24].mxu0 %vm1973_vm2, %v1494_v13  ;;  %4778 = vmatmul.mubr.msk.bf16.vlgmr.msra.gmra.mrb[24].mxu1 %vm1973_vm2, %v1495_v14 }
 0x156   : > { %4782 = vmatpush3.bf16.xpose.msra.mxu0 %v2070_v21  ;;  %4788 = vmatpush3.bf16.xpose.msra.mxu1 %v2116_v22 }
 0x157   : > { %4783 = vmatprep.mubr.msk.bf16.mxu0 %vm5362_vm0, %v5361_v1  ;;  %4789 = vmatprep.mubr.msk.bf16.mxu1 %vm5362_vm0, %v5361_v1 }
 0x158   : > { %4793 = vmatprep.subr.bf16.mxu0 %v5361_v1  ;;  %4799 = vmatprep.subr.bf16.mxu1 %v5361_v1  ;;  %v1789_v28 = vpop.f32.mrb[16].mxu0 }
 0x159   : > { %v1790_v30 = vadd.f32 %v4429_v27, %v1789_v28  ;;  %v4743_v31 = vpop.f32.mrb[17].mxu0 }
 0x15a   : > { %v1792_v32 = vpop.f32.mrb[18].mxu0  ;;  %v1847_v33 = vpop.f32.mrb[16].mxu1 }
 0x15b   : > { %v1969_v34 = vpack.c.bf16 %v1790_v30, %v1790_v30  ;;  %v4744_v35 = vpop.f32.mrb[19].mxu0  ;;  %v1848_v36 = vadd.f32 %v4433_v29, %v1847_v33  ;;  %v4751_v37 = vpop.f32.mrb[17].mxu1 }
 0x15c   : > { %v1850_v38 = vpop.f32.mrb[18].mxu1 }
 0x15d   : > { %4784 = vmatmul.mubr.msk.bf16.vlgmr.msra.gmra.mrb[28].mxu0 %vm1973_vm2, %v1496_v25  ;;  %4790 = vmatmul.mubr.msk.bf16.vlgmr.msra.gmra.mrb[28].mxu1 %vm1973_vm2, %v1497_v26  ;;  %v2211_v39 = vsel %vm2209_vm3, %v1969_v34, 0  ;;  %v1970_v40 = vpack.c.bf16 %v1848_v36, %v1848_v36  ;;  %v4752_v41 = vpop.f32.mrb[19].mxu1  ;;  %v4437_v36 = vld [vmem:[%s6138_s19 + $0x2] ss:$0 sm:$0xff] }
 0x15e   : > { %4795 = vmatprep.mubr.msk.bf16.mxu0 %vm5362_vm0, %v5361_v1  ;;  %4801 = vmatprep.mubr.msk.bf16.mxu1 %vm5362_vm0, %v5361_v1 }
 0x15f   : > { %4794 = vmatpush3.bf16.msra.mxu0 %v2211_v39  ;;  %v2257_v42 = vsel %vm2209_vm3, %v1970_v40, 0  ;;  %v4441_v39 = vld [vmem:[%s6138_s19 + $0x3] ss:$0 sm:$0xff] }
 0x160   : > { %4805 = vmatprep.subr.bf16.mxu0 %v5361_v1  ;;  %4800 = vmatpush3.bf16.msra.mxu1 %v2257_v42  ;;  %v5731_v43 = vpop.f32.mrb[20].mxu0 }
 0x161   : > { %4811 = vmatprep.subr.bf16.mxu1 %v5361_v1  ;;  %v4759_v45 = vpop.f32.mrb[21].mxu0  ;;  %v1906_v37 = vadd.f32 %v4437_v36, %v5731_v43 }
 0x162   : > { %v5733_v44 = vpop.f32.mrb[20].mxu1  ;;  %v1908_v47 = vpop.f32.mrb[22].mxu0 }
 0x163   : > { %v4767_v46 = vpop.f32.mrb[21].mxu1  ;;  %v4760_v49 = vpop.f32.mrb[23].mxu0  ;;  %v1971_v41 = vpack.c.bf16 %v1906_v37, %v1906_v37  ;;  %v1964_v42 = vadd.f32 %v4441_v39, %v5733_v44  ;;  %v1160_v44 = vld [vmem:[%s5430_s24] sm:$0xf] }
 0x164   : > { %v1966_v48 = vpop.f32.mrb[22].mxu1 }
 0x165   : > { %v4768_v50 = vpop.f32.mrb[23].mxu1  ;;  %v2303_v49 = vsel %vm2209_vm3, %v1971_v41, 0 }
 0x166   : > { %v1972_v50 = vpack.c.bf16 %v1964_v42, %v1964_v42 }
 0x228   : > { %v2014_v52 = vpop.f32.mrb[24].mxu0  ;;  %v2060_v53 = vpop.f32.mrb[24].mxu1 }
 0x229   : > { %v2015_v54 = vadd.f32 %v2014_v52, %v1254_v51  ;;  %v4773_v55 = vpop.f32.mrb[25].mxu0  ;;  %v4779_v56 = vpop.f32.mrb[25].mxu1  ;;  %v2061_v59 = vadd.f32 %v2060_v53, %v1254_v51  ;;  %v2349_v53 = vsel %vm2209_vm3, %v1972_v50, 0 }
 0x22a   : > { %v2017_v57 = vpop.f32.mrb[26].mxu0  ;;  %v2063_v58 = vpop.f32.mrb[26].mxu1  ;;  %v2396_v56 = vsel %vm2209_vm3, %v1160_v44, 0  ;;  %v5149_v44 = vld [vmem:[%s6141_s6] sm:$0xff]  }
 0x22b   : > { %v4774_v60 = vpop.f32.mrb[27].mxu0  ;;  %v4780_v61 = vpop.f32.mrb[27].mxu1  ;;  %v2158_v62 = vsel %vm1973_vm2, %v2015_v54, -inf  ;;  %v2161_v63 = vsel %vm1973_vm2, %v2061_v59, -inf }
 0x22c   : > { %2159 = vmax.xlane.f32.xlu0 %v2158_v62  ;;  %v1161_v60 = vld [vmem:[%s5430_s24 + $0x4] sm:$0xf]  ;;  %v1162_v62 = vld [vmem:[%s5430_s24 + $0x8] sm:$0xf] }
 0x22d   : > { %v2450_v61 = vsel %vm2209_vm3, %v1161_v60, 0 }
 0x230   : > { %v2152_v0 = vpop.f32.mrb[28].mxu1  ;;  %2162 = vmax.xlane.f32.xlu0 %v2161_v63  ;;  %v2106_v2 = vpop.f32.mrb[28].mxu0 }
 0x231   : > { %v2107_v3 = vadd.f32 %v2106_v2, %v1254_v51  ;;  %v4785_v4 = vpop.f32.mrb[29].mxu0  ;;  %v4791_v6 = vpop.f32.mrb[29].mxu1  ;;  %v2153_v9 = vadd.f32 %v2152_v0, %v1254_v51 }
 0x232   : > { %v2109_v7 = vpop.f32.mrb[30].mxu0  ;;  %v2155_v8 = vpop.f32.mrb[30].mxu1  ;;  %v1163_v6 = vld [vmem:[%s5430_s24 + $0xc] sm:$0xf] }
 0x233   : > { %v4786_v10 = vpop.f32.mrb[31].mxu0  ;;  %v4792_v11 = vpop.f32.mrb[31].mxu1  ;;  %v2164_v12 = vsel %vm1973_vm2, %v2107_v3, -inf  ;;  %v2167_v13 = vsel %vm1973_vm2, %v2153_v9, -inf }
 0x234   : > { %2165 = vmax.xlane.f32.xlu1 %v2164_v12  ;;  %v2546_v11 = vsel %vm2209_vm3, %v1163_v6, 0  ;;  %v5156_v6 = vld [vmem:[%s6141_s6 + $0x38] sm:$0xff]  }
 0x238   : > { %2168 = vmax.xlane.f32.xlu1 %v2167_v13 }
 0x2b9   : > { %v2160_v14 = vpop.xlane.xlu0 %2159 }
 0x2ba   : > { %v2170_v15 = vsub.f32 %v2015_v54, %v2160_v14 }
 0x2bc   : > { %v2174_v16 = vmul.f32 1.442695, %v2170_v15 }
 0x2bd   : > { %v2163_v17 = vpop.xlane.xlu0 %2162 }
 0x2be   : > { %5179 = vpow2.f32 %v2174_v16  ;;  %v2171_v18 = vsub.f32 %v2061_v59, %v2163_v17 }
 0x2c0   : > { %v2176_v19 = vmul.f32 1.442695, %v2171_v18 }
 0x2c1   : > { %v2166_v20 = vpop.xlane.xlu1 %2165 }
 0x2c2   : > { %5181 = vpow2.f32 %v2176_v19  ;;  %v2172_v21 = vsub.f32 %v2107_v3, %v2166_v20  ;;  %v2498_v3 = vsel %vm2209_vm3, %v1162_v62, 0 }
 0x2c4   : > { %v2178_v22 = vmul.f32 1.442695, %v2172_v21 }
 0x2c5   : > { %v2169_v23 = vpop.xlane.xlu1 %2168 }
 0x2c6   : > { %5183 = vpow2.f32 %v2178_v22  ;;  %v2173_v24 = vsub.f32 %v2153_v9, %v2169_v23 }
 0x2c8   : > { %v5180_v25 = vpop.eup %5179  ;;  %v2180_v26 = vmul.f32 1.442695, %v2173_v24  ;;  %v4454_v24 = vld [vmem:[%s5435_s30] ss:$0 sm:$0xff] }
 0x2c9   : > { %v2182_v27 = vsel %vm1973_vm2, %v5180_v25, 0.0 }
 0x2ca   : > { %5185 = vpow2.f32 %v2180_v26  ;;  %2183 = vadd.xlane.f32.xlu0 %v2182_v27 }
 0x2cc   : > { %v5182_v28 = vpop.eup %5181 }
 0x2cd   : > { %v2185_v29 = vsel %vm1973_vm2, %v5182_v28, 0.0 }
 0x2ce   : > { %2186 = vadd.xlane.f32.xlu1 %v2185_v29 }
 0x2d0   : > { %v5184_v30 = vpop.eup %5183 }
 0x2d1   : > { %v2188_v31 = vsel %vm1973_vm2, %v5184_v30, 0.0 }
 0x2d2   : > { %2189 = vadd.xlane.f32.xlu0 %v2188_v31 }
 0x2d4   : > { %v5186_v32 = vpop.eup %5185 }
 0x2d5   : > { %v2191_v33 = vsel %vm1973_vm2, %v5186_v32, 0.0 }
 0x2d6   : > { %2192 = vadd.xlane.f32.xlu1 %v2191_v33 }
 0x357   : > { %v2184_v34 = vpop.xlane.xlu0 %2183 }
 0x358   : > { %5187 = vrcp.f32 %v2184_v34 }
 0x35b   : > { %v2187_v35 = vpop.xlane.xlu1 %2186 }
 0x35c   : > { %5189 = vrcp.f32 %v2187_v35 }
 0x35f   : > { %v2190_v38 = vpop.xlane.xlu0 %2189 }
 0x360   : > { %5191 = vrcp.f32 %v2190_v38 }
 0x362   : > { %v5188_v40 = vpop.eup %5187 }
 0x363   : > { %v2198_v45 = vmul.f32 %v5188_v40, %v5180_v25  ;;  %v2193_v46 = vpop.xlane.xlu1 %2192 }
 0x364   : > { %5193 = vrcp.f32 %v2193_v46 }
 0x365   : > { %v2202_v47 = vpack.c.bf16 %v2198_v45, %v2198_v45 }
 0x366   : > { %v5190_v48 = vpop.eup %5189 }
 0x367   : > { %v2199_v51 = vmul.f32 %v5190_v48, %v5182_v28  ;;  %4796 = vmatmul.mubr.msk.bf16.vlgmr.msra.gmra.mrb[32].mxu0 %vm1973_vm2, %v2202_v47 }
 0x368   : > { %4806 = vmatpush3.bf16.msra.mxu0 %v2303_v49  ;;  %4807 = vmatprep.mubr.msk.bf16.mxu0 %vm5362_vm0, %v5361_v1 }
 0x369   : > { %v2203_v43 = vpack.c.bf16 %v2199_v51, %v2199_v51  ;;  %4817 = vmatprep.subr.bf16.mxu0 %v5361_v1 }
 0x36a   : > { %v5192_v52 = vpop.eup %5191 }
 0x36b   : > { %v2200_v54 = vmul.f32 %v5192_v52, %v5184_v30  ;;  %4802 = vmatmul.mubr.msk.bf16.vlgmr.msra.gmra.mrb[32].mxu1 %vm1973_vm2, %v2203_v43 }
 0x36c   : > { %4812 = vmatpush3.bf16.msra.mxu1 %v2349_v53  ;;  %4813 = vmatprep.mubr.msk.bf16.mxu1 %vm5362_vm0, %v5361_v1  ;;  %v5150_v53 = vld [vmem:[%s6141_s6 + $0x10] sm:$0xff]  }
 0x36d   : > { %v2204_v55 = vpack.c.bf16 %v2200_v54, %v2200_v54  ;;  %4823 = vmatprep.subr.bf16.mxu1 %v5361_v1  ;;  %v5151_v54 = vld [vmem:[%s6141_s6 + $0x8] sm:$0xff]  }
 0x36e   : > { %v5194_v57 = vpop.eup %5193 }
 0x36f   : > { %v2201_v58 = vmul.f32 %v5194_v57, %v5186_v32  ;;  %4808 = vmatmul.mubr.msk.bf16.vlgmr.msra.gmra.mrb[36].mxu0 %vm1973_vm2, %v2204_v55  ;;  %v5152_v55 = vld [vmem:[%s6141_s6 + $0x18] sm:$0xff]  }
 0x370   : > { %4818 = vmatpush3.bf16.msra.mxu0 %v2396_v56  ;;  %4819 = vmatprep.mubr.msk.bf16.mxu0 %vm5362_vm0, %v5361_v1 }
 0x371   : > { %v2205_v59 = vpack.c.bf16 %v2201_v58, %v2201_v58  ;;  %4829 = vmatprep.subr.bf16.mxu0 %v5361_v1 }
 0x373   : > { %4814 = vmatmul.mubr.msk.bf16.vlgmr.msra.gmra.mrb[36].mxu1 %vm1973_vm2, %v2205_v59  ;;  %v4458_v59 = vld [vmem:[%s6148_s4] ss:$0 sm:$0xff]  ;;  %s6155_s4 = sld [smem:[#allocation12_spill]] }
 0x374   : > { %4825 = vmatprep.mubr.msk.bf16.mxu1 %vm5362_vm0, %v5361_v1  ;;  %4824 = vmatpush3.bf16.msra.mxu1 %v2450_v61  ;;  %v4459_v61 = vld [vmem:[%s5485_s21] ss:$0 sm:$0xff] }
 0x375   : > { %4835 = vmatprep.subr.bf16.mxu1 %v5361_v1 }
 0x43a   : > { %v2247_v63 = vpop.f32.mrb[32].mxu0 }
 0x43b   : > { %v2391_v0 = vpack.c.bf16 %v2247_v63, %v2247_v63  ;;  %v4797_v2 = vpop.f32.mrb[33].mxu0 }
 0x43c   : > { %v2250_v4 = vpop.f32.mrb[34].mxu0  ;;  %v5154_v2 = vld [vmem:[%s6141_s6 + $0x30] sm:$0xff]  }
 0x43d   : > { %v4798_v7 = vpop.f32.mrb[35].mxu0  ;;  %4820 = vmatmul.mubr.msk.bf16.vlgmr.msra.gmra.mrb[40].mxu0 %vm1973_vm2, %v2391_v0  ;;  %v5153_v0 = vld [vmem:[%s6141_s6 + $0x20] sm:$0xff]   ;;  %v5155_v4 = vld [vmem:[%s6141_s6 + $0x28] sm:$0xff]   ;;  %s6160_s6 = sld [smem:[#allocation27_spill]] }
 0x43e   : > { %v2293_v8 = vpop.f32.mrb[32].mxu1  ;;  %4830 = vmatpush3.bf16.msra.mxu0 %v2498_v3  ;;  %4831 = vmatprep.mubr.msk.bf16.mxu0 %vm5362_vm0, %v5361_v1  ;;  %v5157_v7 = vld [vmem:[%s6150_s23] sm:$0xff]  }
 0x43f   : > { %v2445_v9 = vpack.c.bf16 %v2293_v8, %v2293_v8  ;;  %v4803_v10 = vpop.f32.mrb[33].mxu1  ;;  %4841 = vmatprep.subr.bf16.mxu0 %v5361_v1  ;;  %v5158_v8 = vld [vmem:[%s6150_s23 + $0x10] sm:$0xff]  }
 0x440   : > { %v2296_v12 = vpop.f32.mrb[34].mxu1  ;;  %v1253_v10 = vld [vmem:[%s1088_s3 + $0x8] sm:$0x3] }
 0x441   : > { %v4804_v13 = vpop.f32.mrb[35].mxu1  ;;  %4826 = vmatmul.mubr.msk.bf16.vlgmr.msra.gmra.mrb[40].mxu1 %vm1973_vm2, %v2445_v9  ;;  %v1252_v9 = vld [vmem:[%s1088_s3] sm:$0xff]  ;;  %v5160_v12 = vld [vmem:[%s6150_s23 + $0x18] sm:$0xff]   ;;  %s6151_s3 = sld [smem:[#allocation21_spill]] }
 0x442   : > { %v2339_v14 = vpop.f32.mrb[36].mxu0  ;;  %4836 = vmatpush3.bf16.msra.mxu1 %v2546_v11  ;;  %4837 = vmatprep.mubr.msk.bf16.mxu1 %vm5362_vm0, %v5361_v1  ;;  %v5159_v11 = vld [vmem:[%s6150_s23 + $0x8] sm:$0xff]   ;;  %v2619_v13 = vpack.c.bf16 %v1253_v10, %v1252_v9 }
 0x443   : > { %v2493_v15 = vpack.c.bf16 %v2339_v14, %v2339_v14  ;;  %v4809_v16 = vpop.f32.mrb[37].mxu0  ;;  %4849 = vmatprep.subr.bf16.mxu1 %v5361_v1  ;;  %v5161_v14 = vld [vmem:[%s6150_s23 + $0x20] sm:$0xff]  }
 0x444   : > { %v2342_v17 = vpop.f32.mrb[38].mxu0  ;;  %v5163_v16 = vld [vmem:[%s6150_s23 + $0x28] sm:$0xff]  }
 0x445   : > { %v4810_v18 = vpop.f32.mrb[39].mxu0  ;;  %4832 = vmatmul.mubr.msk.bf16.vlgmr.msra.gmra.mrb[44].mxu0 %vm1973_vm2, %v2493_v15  ;;  %v5162_v15 = vld [vmem:[%s6150_s23 + $0x30] sm:$0xff]   ;;  %v5164_v17 = vld [vmem:[%s6150_s23 + $0x38] sm:$0xff]  }
 0x446   : > { %v2385_v19 = vpop.f32.mrb[36].mxu1  ;;  %4845 = vmatprep.mubr.msk.bf16.mxu0 %vm5362_vm0, %v5361_v1  ;;  %4842 = vmatpush3.bf16.msra.mxu0 %v5149_v44 }
 0x447   : > { %v2541_v20 = vpack.c.bf16 %v2385_v19, %v2385_v19  ;;  %v4815_v21 = vpop.f32.mrb[37].mxu1  ;;  %4843 = vmatprep.subr.bf16.mxu0 %v5361_v1  ;;  %v5165_v18 = vld [vmem:[%s6151_s3] sm:$0xff]   ;;  %v5166_v19 = vld [vmem:[%s6151_s3 + $0x10] sm:$0xff]  }
 0x448   : > { %v2388_v22 = vpop.f32.mrb[38].mxu1  ;;  %v5168_v21 = vld [vmem:[%s6151_s3 + $0x18] sm:$0xff]  }
 0x449   : > { %v4816_v23 = vpop.f32.mrb[39].mxu1  ;;  %4838 = vmatmul.mubr.msk.bf16.vlgmr.msra.gmra.mrb[44].mxu1 %vm1973_vm2, %v2541_v20  ;;  %v5167_v20 = vld [vmem:[%s6151_s3 + $0x8] sm:$0xff]   ;;  %v5169_v22 = vld [vmem:[%s6151_s3 + $0x20] sm:$0xff]  }
 0x44a   : > { %4853 = vmatprep.mubr.msk.bf16.mxu1 %vm5362_vm0, %v5361_v1  ;;  %4850 = vmatpush3.bf16.msra.mxu1 %v5150_v53  ;;  %v5170_v23 = vld [vmem:[%s6151_s3 + $0x30] sm:$0xff]  }
 0x44b   : > { %4851 = vmatprep.subr.bf16.mxu1 %v5361_v1  ;;  %4844 = vmatpush3.bf16.msra.mxu0 %v5151_v54 }
 0x44c   : > { %4857 = vmatprep.subr.bf16.mxu0 %v5361_v1 }
 0x44e   : > { %4852 = vmatpush3.bf16.msra.mxu1 %v5152_v55 }
 0x44f   : > { %4865 = vmatprep.subr.bf16.mxu1 %v5361_v1 }
 0x510   : > { %v2432_v25 = vpop.f32.mrb[40].mxu0 }
 0x511   : > { %v4821_v26 = vpop.f32.mrb[41].mxu0  ;;  %v2444_v28 = vadd.f32 %v4454_v24, %v2432_v25  ;;  %v5171_v24 = vld [vmem:[%s6151_s3 + $0x28] sm:$0xff]   ;;  %v5172_v25 = vld [vmem:[%s6151_s3 + $0x38] sm:$0xff]   ;;  %s6154_s3 = sld [smem:[#allocation22_spill]] }
 0x512   : > { %v2435_v27 = vpop.f32.mrb[42].mxu0 }
 0x513   : > { %v4822_v29 = vpop.f32.mrb[43].mxu0 }
 0x514   : > { %v2486_v30 = vpop.f32.mrb[40].mxu1 }
 0x515   : > { %v2492_v31 = vadd.f32 %v2486_v30, %v2444_v28  ;;  %v4827_v32 = vpop.f32.mrb[41].mxu1 }
 0x516   : > { %v2489_v33 = vpop.f32.mrb[42].mxu1 }
 0x517   : > { %v4828_v34 = vpop.f32.mrb[43].mxu1 }
 0x518   : > { %v2534_v35 = vpop.f32.mrb[44].mxu0 }
 0x519   : > { %v2540_v36 = vadd.f32 %v2534_v35, %v2492_v31  ;;  %v4833_v37 = vpop.f32.mrb[45].mxu0 }
 0x51a   : > { %v2537_v38 = vpop.f32.mrb[46].mxu0 }
 0x51b   : > { %v4834_v39 = vpop.f32.mrb[47].mxu0 }
 0x51c   : > { %v2582_v40 = vpop.f32.mrb[44].mxu1 }
 0x51d   : > { %v2588_v41 = vadd.f32 %v2582_v40, %v2540_v36  ;;  %v4839_v42 = vpop.f32.mrb[45].mxu1 }
 0x51e   : > { %v2585_v45 = vpop.f32.mrb[46].mxu1  ;;  %v4480_v42 = vld [vmem:[%s6152_s15 + $0x1] ss:$0 sm:$0xff] }
 0x51f   : > { %v4840_v46 = vpop.f32.mrb[47].mxu1  ;;  %v2589_v47 = vadd.f32 %v2588_v41, %v5614_v5  ;;  %v4476_v45 = vld [vmem:[%s6152_s15] ss:$0 sm:$0xff] }
 0x521   : > { %v2590_v48 = vsel %vm1276_vm1, %v2589_v47, 0.0 }
 0x522   : > { %2591 = vadd.xlane.f32.xlu0 %v2590_v48 }
 0x5af   : > { %v2592_v49 = vpop.xlane.xlu0 %2591 }
 0x5b0   : > { %v2594_v50 = vmul.f32 0.03125, %v2592_v49 }
 0x5b2   : > { %v2595_v51 = vsub.f32 %v2589_v47, %v2594_v50 }
 0x5b4   : > { %v2596_v43 = vmul.f32 %v2595_v51, %v2595_v51 }
 0x5b6   : > { %v2597_v52 = vsel %vm1276_vm1, %v2596_v43, 0.0 }
 0x5b7   : > { %2598 = vadd.xlane.f32.xlu1 %v2597_v52 }
 0x644   : > { %v2599_v5 = vpop.xlane.xlu1 %2598 }
 0x645   : > { %v2600_v56 = vmul.f32 0.03125, %v2599_v5 }
 0x647   : > { %v2601_v57 = vadd.f32 1e-05, %v2600_v56 }
 0x649   : > { %5195 = vrsqrt.f32 %v2601_v57  ;;  %v4460_v57 = vld [vmem:[%s6153_s18] ss:$0 sm:$0xff] }
 0x653   : > { %v5196_v58 = vpop.eup %5195 }
 0x654   : > { %v2603_v60 = vmul.f32 %v5196_v58, %v2595_v51  ;;  %v4464_v58 = vld [vmem:[%s6153_s18 + $0x1] ss:$0 sm:$0xff] }
 0x656   : > { %v2610_v62 = vmul.f32 %v4458_v59, %v2603_v60  ;;  %v4488_v59 = vld [vmem:[%s6152_s15 + $0x3] ss:$0 sm:$0xff] }
 0x658   : > { %v5803_v63 = vadd.f32 %v4459_v61, %v2610_v62  ;;  %v4484_v62 = vld [vmem:[%s6152_s15 + $0x2] ss:$0 sm:$0xff] }
 0x65a   : > { %v2618_v3 = vpack.c.bf16 %v5803_v63, %v5803_v63 }
 0x65c   : > { %4846 = vmatmul.mubr.msk.bf16.vlgmr.msra.gmra.mrb[48].mxu0 %vm1276_vm1, %v2618_v3  ;;  %4854 = vmatmul.mubr.msk.bf16.vlgmr.msra.gmra.mrb[48].mxu1 %vm1276_vm1, %v2618_v3 }
 0x65d   : > { %4858 = vmatpush3.bf16.msra.mxu0 %v5153_v0  ;;  %4866 = vmatpush3.bf16.msra.mxu1 %v5154_v2 }
 0x65e   : > { %4859 = vmatprep.subr.bf16.mxu0 %v5361_v1  ;;  %4867 = vmatprep.subr.bf16.mxu1 %v5361_v1 }
 0x65f   : > { %4861 = vmatprep.mubr.msk.bf16.mxu0 %vm5362_vm0, %v5361_v1  ;;  %4869 = vmatprep.mubr.msk.bf16.mxu1 %vm5362_vm0, %v5361_v1 }
 0x661   : > { %4860 = vmatpush3.bf16.msra.mxu0 %v5155_v4  ;;  %4868 = vmatpush3.bf16.msra.mxu1 %v5156_v6 }
 0x662   : > { %4873 = vmatprep.subr.bf16.mxu0 %v5361_v1  ;;  %4881 = vmatprep.subr.bf16.mxu1 %v5361_v1 }
 0x664   : > { %4862 = vmatmul.mubr.msk.bf16.vlgmr.msra.gmra.mrb[52].mxu0 %vm1276_vm1, %v2618_v3  ;;  %4870 = vmatmul.mubr.msk.bf16.vlgmr.msra.gmra.mrb[52].mxu1 %vm1276_vm1, %v2618_v3 }
 0x665   : > { %4874 = vmatpush3.bf16.msra.mxu0 %v5157_v7  ;;  %4882 = vmatpush3.bf16.msra.mxu1 %v5158_v8 }
 0x666   : > { %4875 = vmatprep.subr.bf16.mxu0 %v5361_v1  ;;  %4883 = vmatprep.subr.bf16.mxu1 %v5361_v1 }
 0x667   : > { %4877 = vmatprep.mubr.msk.bf16.mxu0 %vm5362_vm0, %v5361_v1  ;;  %4885 = vmatprep.mubr.msk.bf16.mxu1 %vm5362_vm0, %v5361_v1 }
 0x669   : > { %4876 = vmatpush3.bf16.msra.mxu0 %v5159_v11  ;;  %4884 = vmatpush3.bf16.msra.mxu1 %v5160_v12 }
 0x66a   : > { %4889 = vmatprep.subr.bf16.mxu0 %v5361_v1  ;;  %4897 = vmatprep.subr.bf16.mxu1 %v5361_v1 }
 0x66c   : > { %4878 = vmatmul.mubr.msk.bf16.vlgmr.msra.gmra.mrb[56].mxu0 %vm1276_vm1, %v2619_v13  ;;  %4886 = vmatmul.mubr.msk.bf16.vlgmr.msra.gmra.mrb[56].mxu1 %vm1276_vm1, %v2619_v13 }
 0x66d   : > { %4890 = vmatpush3.bf16.msra.mxu0 %v5161_v14  ;;  %4898 = vmatpush3.bf16.msra.mxu1 %v5162_v15 }
 0x66e   : > { %4891 = vmatprep.subr.bf16.mxu0 %v5361_v1  ;;  %4899 = vmatprep.subr.bf16.mxu1 %v5361_v1 }
 0x66f   : > { %4893 = vmatprep.mubr.msk.bf16.mxu0 %vm5362_vm0, %v5361_v1  ;;  %4901 = vmatprep.mubr.msk.bf16.mxu1 %vm5362_vm0, %v5361_v1 }
 0x671   : > { %4892 = vmatpush3.bf16.msra.mxu0 %v5163_v16  ;;  %4900 = vmatpush3.bf16.msra.mxu1 %v5164_v17 }
 0x672   : > { %4905 = vmatprep.subr.bf16.mxu0 %v5361_v1  ;;  %4913 = vmatprep.subr.bf16.mxu1 %v5361_v1 }
 0x674   : > { %4894 = vmatmul.mubr.msk.bf16.vlgmr.msra.gmra.mrb[60].mxu0 %vm1276_vm1, %v2619_v13  ;;  %4902 = vmatmul.mubr.msk.bf16.vlgmr.msra.gmra.mrb[60].mxu1 %vm1276_vm1, %v2619_v13 }
 0x675   : > { %4909 = vmatprep.mubr.msk.bf16.mxu0 %vm5362_vm0, %v5361_v1  ;;  %4917 = vmatprep.mubr.msk.bf16.mxu1 %vm5362_vm0, %v5361_v1 }
 0x676   : > { %4906 = vmatpush3.bf16.msra.mxu0 %v5165_v18  ;;  %4914 = vmatpush3.bf16.msra.mxu1 %v5166_v19 }
 0x677   : > { %4907 = vmatprep.subr.bf16.mxu0 %v5361_v1  ;;  %4915 = vmatprep.subr.bf16.mxu1 %v5361_v1 }
 0x67a   : > { %4908 = vmatpush3.bf16.msra.mxu0 %v5167_v20  ;;  %4916 = vmatpush3.bf16.msra.mxu1 %v5168_v21  ;;  %v4468_v20 = vld [vmem:[%s6153_s18 + $0x2] ss:$0 sm:$0xff]  ;;  %v4472_v21 = vld [vmem:[%s6153_s18 + $0x3] ss:$0 sm:$0xff] }
 0x67b   : > { %4921 = vmatprep.subr.bf16.mxu0 %v5361_v1  ;;  %4929 = vmatprep.subr.bf16.mxu1 %v5361_v1 }
 0x67d   : > { %4910 = vmatmul.mubr.msk.bf16.vlgmr.msra.gmra.mrb[64].mxu0 %vm1276_vm1, %v2619_v13  ;;  %4918 = vmatmul.mubr.msk.bf16.vlgmr.msra.gmra.mrb[64].mxu1 %vm1276_vm1, %v2619_v13 }
 0x67e   : > { %4925 = vmatprep.mubr.msk.bf16.mxu0 %vm5362_vm0, %v5361_v1  ;;  %4922 = vmatpush3.bf16.msra.mxu0 %v5169_v22 }
 0x67f   : > { %4930 = vmatpush3.bf16.msra.mxu1 %v5170_v23  ;;  %4923 = vmatprep.subr.bf16.mxu0 %v5361_v1 }
 0x680   : > { %4931 = vmatprep.subr.bf16.mxu1 %v5361_v1  ;;  %4933 = vmatprep.mubr.msk.bf16.mxu1 %vm5362_vm0, %v5361_v1 }
 0x682   : > { %4924 = vmatpush3.bf16.msra.mxu0 %v5171_v24 }
 0x683   : > { %4932 = vmatpush3.bf16.msra.mxu1 %v5172_v25  ;;  %4937 = vmatprep.subr.bf16.mxu0 %v5361_v1 }
 0x684   : > { %4943 = vmatprep.subr.bf16.mxu1 %v5361_v1 }
 0x685   : > { %4926 = vmatmul.mubr.msk.bf16.vlgmr.msra.gmra.mrb[68].mxu0 %vm1276_vm1, %v2619_v13 }
 0x686   : > { %4934 = vmatmul.mubr.msk.bf16.vlgmr.msra.gmra.mrb[68].mxu1 %vm1276_vm1, %v2619_v13  ;;  %4939 = vmatprep.mubr.msk.bf16.mxu0 %vm5362_vm0, %v5361_v1 }
 0x687   : > { %4945 = vmatprep.mubr.msk.bf16.mxu1 %vm5362_vm0, %v5361_v1 }
 0x72f   : > { %v2675_v26 = vpop.f32.mrb[48].mxu0  ;;  %v2733_v27 = vpop.f32.mrb[48].mxu1 }
 0x730   : > { %v4847_v28 = vpop.f32.mrb[49].mxu0  ;;  %v4855_v29 = vpop.f32.mrb[49].mxu1  ;;  %v2676_v3 = vadd.f32 %v4460_v57, %v2675_v26  ;;  %v2734_v4 = vadd.f32 %v4464_v58, %v2733_v27 }
 0x731   : > { %v2678_v30 = vpop.f32.mrb[50].mxu0  ;;  %v2736_v31 = vpop.f32.mrb[50].mxu1  ;;  %v4492_v28 = vld [vmem:[%s6154_s3] ss:$0 sm:$0xff] }
 0x732   : > { %v4848_v32 = vpop.f32.mrb[51].mxu0  ;;  %v4856_v33 = vpop.f32.mrb[51].mxu1  ;;  %v2855_v16 = vpack.c.bf16 %v2676_v3, %v2676_v3  ;;  %v2856_v17 = vpack.c.bf16 %v2734_v4, %v2734_v4  ;;  %v4496_v30 = vld [vmem:[%s6154_s3 + $0x1] ss:$0 sm:$0xff] }
 0x737   : > { %v2791_v34 = vpop.f32.mrb[52].mxu0  ;;  %v2849_v35 = vpop.f32.mrb[52].mxu1 }
 0x738   : > { %v4863_v36 = vpop.f32.mrb[53].mxu0  ;;  %v4871_v37 = vpop.f32.mrb[53].mxu1  ;;  %v2792_v24 = vadd.f32 %v4468_v20, %v2791_v34  ;;  %v2850_v25 = vadd.f32 %v4472_v21, %v2849_v35 }
 0x739   : > { %v2794_v38 = vpop.f32.mrb[54].mxu0  ;;  %v2852_v39 = vpop.f32.mrb[54].mxu1 }
 0x73a   : > { %v4864_v40 = vpop.f32.mrb[55].mxu0  ;;  %v4872_v41 = vpop.f32.mrb[55].mxu1  ;;  %v2857_v26 = vpack.c.bf16 %v2792_v24, %v2792_v24  ;;  %v2858_v27 = vpack.c.bf16 %v2850_v25, %v2850_v25 }
 0x73f   : > { %v2914_v46 = vpop.f32.mrb[56].mxu0  ;;  %v2973_v47 = vpop.f32.mrb[56].mxu1 }
 0x740   : > { %v2974_v48 = vadd.f32 %v4480_v42, %v2973_v47  ;;  %v4879_v49 = vpop.f32.mrb[57].mxu0  ;;  %v4887_v50 = vpop.f32.mrb[57].mxu1  ;;  %v2915_v52 = vadd.f32 %v4476_v45, %v2914_v46  ;;  %v4500_v47 = vld [vmem:[%s6154_s3 + $0x2] ss:$0 sm:$0xff] }
 0x741   : > { %v2917_v51 = vpop.f32.mrb[58].mxu0  ;;  %v2976_v43 = vpop.f32.mrb[58].mxu1 }
 0x742   : > { %v2918_v44 = vadd.f32 %v4476_v45, %v2917_v51  ;;  %v2977_v53 = vadd.f32 %v4480_v42, %v2976_v43  ;;  %v4880_v54 = vpop.f32.mrb[59].mxu0  ;;  %v4888_v55 = vpop.f32.mrb[59].mxu1 }
 0x744   : > { %v3098_v5 = vpack.c.bf16 %v2918_v44, %v2915_v52  ;;  %v3099_v56 = vpack.c.bf16 %v2977_v53, %v2974_v48  ;;  %v4504_v48 = vld [vmem:[%s6154_s3 + $0x3] ss:$0 sm:$0xff]  ;;  %s1098_s3 = scalar_lea.vmem %s6155_s4, %s5606_s0  ;;  %s5938_s4 = sand.u32 1, %s5311_s1  }
 0x745   : > { %s4391_s0 = sshll.u32 %s5938_s4, 5 }
 0x746   : > { %v3352_v60 = vsel %vm1973_vm2, %v3098_v5, 0  ;;  %v3398_v61 = vsel %vm1973_vm2, %v3099_v56, 0  ;;  %s5941_s5 = scalar_lea.vmem [#allocation4], %s4391_s0  ;;  %s6157_s0 = sld [smem:[#allocation24_spill]] }
 0x747   : > { %v3032_v0 = vpop.f32.mrb[60].mxu0  ;;  %v3091_v2 = vpop.f32.mrb[60].mxu1  ;;  %4938 = vmatpush3.bf16.xpose.msra.mxu0 %v3352_v60  ;;  %4944 = vmatpush3.bf16.xpose.msra.mxu1 %v3398_v61 }
 0x748   : > { %v3092_v6 = vadd.f32 %v4488_v59, %v3091_v2  ;;  %v4895_v7 = vpop.f32.mrb[61].mxu0  ;;  %v4903_v8 = vpop.f32.mrb[61].mxu1  ;;  %4949 = vmatprep.subr.bf16.mxu0 %v5361_v1  ;;  %4955 = vmatprep.subr.bf16.mxu1 %v5361_v1  ;;  %v3033_v11 = vadd.f32 %v4484_v62, %v3032_v0  ;;  %v4508_v0 = vld [vmem:[%s1098_s3] ss:$0 sm:$0xff]  ;;  %s6156_s3 = sld [smem:[#allocation23_spill]] }
 0x749   : > { %v3035_v9 = vpop.f32.mrb[62].mxu0  ;;  %v3094_v10 = vpop.f32.mrb[62].mxu1 }
 0x74a   : > { %v3036_v12 = vadd.f32 %v4484_v62, %v3035_v9  ;;  %v3095_v13 = vadd.f32 %v4488_v59, %v3094_v10  ;;  %v4896_v14 = vpop.f32.mrb[63].mxu0  ;;  %v4904_v15 = vpop.f32.mrb[63].mxu1 }
 0x74c   : > { %v3100_v18 = vpack.c.bf16 %v3036_v12, %v3033_v11  ;;  %v3101_v19 = vpack.c.bf16 %v3095_v13, %v3092_v6 }
 0x74e   : > { %4940 = vmatmul.mubr.msk.bf16.vlgmr.msra.gmra.mrb[72].mxu0 %vm1973_vm2, %v2855_v16  ;;  %4946 = vmatmul.mubr.msk.bf16.vlgmr.msra.gmra.mrb[72].mxu1 %vm1973_vm2, %v2856_v17  ;;  %v3444_v22 = vsel %vm1973_vm2, %v3100_v18, 0  ;;  %v3490_v23 = vsel %vm1973_vm2, %v3101_v19, 0 }
 0x74f   : > { %4950 = vmatpush3.bf16.xpose.msra.mxu0 %v3444_v22  ;;  %4956 = vmatpush3.bf16.xpose.msra.mxu1 %v3490_v23 }
 0x750   : > { %4951 = vmatprep.mubr.msk.bf16.mxu0 %vm5362_vm0, %v5361_v1  ;;  %4957 = vmatprep.mubr.msk.bf16.mxu1 %vm5362_vm0, %v5361_v1  ;;  %v3154_v29 = vpop.f32.mrb[64].mxu0  ;;  %v3213_v34 = vpop.f32.mrb[64].mxu1 }
 0x751   : > { %4961 = vmatprep.subr.bf16.mxu0 %v5361_v1  ;;  %4967 = vmatprep.subr.bf16.mxu1 %v5361_v1  ;;  %v3155_v31 = vadd.f32 %v4492_v28, %v3154_v29  ;;  %v4911_v32 = vpop.f32.mrb[65].mxu0  ;;  %v3214_v36 = vadd.f32 %v4496_v30, %v3213_v34  ;;  %v4919_v38 = vpop.f32.mrb[65].mxu1 }
 0x752   : > { %v3157_v33 = vpop.f32.mrb[66].mxu0  ;;  %v3216_v39 = vpop.f32.mrb[66].mxu1 }
 0x753   : > { %v3158_v35 = vadd.f32 %v4492_v28, %v3157_v33  ;;  %v4912_v37 = vpop.f32.mrb[67].mxu0  ;;  %v3217_v41 = vadd.f32 %v4496_v30, %v3216_v39  ;;  %v4920_v42 = vpop.f32.mrb[67].mxu1 }
 0x755   : > { %v3338_v40 = vpack.c.bf16 %v3158_v35, %v3155_v31  ;;  %v3339_v45 = vpack.c.bf16 %v3217_v41, %v3214_v36 }
 0x756   : > { %4952 = vmatmul.mubr.msk.bf16.vlgmr.msra.gmra.mrb[76].mxu0 %vm1973_vm2, %v2857_v26  ;;  %4958 = vmatmul.mubr.msk.bf16.vlgmr.msra.gmra.mrb[76].mxu1 %vm1973_vm2, %v2858_v27 }
 0x757   : > { %4963 = vmatprep.mubr.msk.bf16.mxu0 %vm5362_vm0, %v5361_v1  ;;  %4969 = vmatprep.mubr.msk.bf16.mxu1 %vm5362_vm0, %v5361_v1  ;;  %v3586_v46 = vsel %vm3584_vm4, %v3338_v40, 0  ;;  %v3632_v49 = vsel %vm3584_vm4, %v3339_v45, 0 }
 0x758   : > { %4962 = vmatpush3.bf16.msra.mxu0 %v3586_v46  ;;  %4968 = vmatpush3.bf16.msra.mxu1 %v3632_v49  ;;  %v3272_v50 = vpop.f32.mrb[68].mxu0 }
 0x759   : > { %4973 = vmatprep.subr.bf16.mxu0 %v5361_v1  ;;  %v3331_v51 = vpop.f32.mrb[68].mxu1  ;;  %v3273_v43 = vadd.f32 %v4500_v47, %v3272_v50  ;;  %v4927_v52 = vpop.f32.mrb[69].mxu0  ;;  %4979 = vmatprep.subr.bf16.mxu1 %v5361_v1 }
 0x75a   : > { %v3332_v44 = vadd.f32 %v4504_v48, %v3331_v51  ;;  %v4935_v53 = vpop.f32.mrb[69].mxu1  ;;  %v3275_v54 = vpop.f32.mrb[70].mxu0 }
 0x75b   : > { %v3334_v55 = vpop.f32.mrb[70].mxu1  ;;  %v3276_v5 = vadd.f32 %v4500_v47, %v3275_v54  ;;  %v4928_v56 = vpop.f32.mrb[71].mxu0 }
 0x75c   : > { %v3335_v57 = vadd.f32 %v4504_v48, %v3334_v55  ;;  %v4936_v58 = vpop.f32.mrb[71].mxu1 }
 0x75d   : > { %v3340_v59 = vpack.c.bf16 %v3276_v5, %v3273_v43 }
 0x75e   : > { %v3341_v60 = vpack.c.bf16 %v3335_v57, %v3332_v44  ;;  %v1226_v57 = vld [vmem:[%s6156_s3 + $0x4] sm:$0xf] }
 0x75f   : > { %v5922_v61 = vsel %vm3584_vm4, %v3340_v59, 0 }
 0x760   : > { %v5925_v62 = vsel %vm3584_vm4, %v3341_v60, 0  ;;  %v1225_v60 = vld [vmem:[%s6156_s3] sm:$0xf] }
 0x821   : > { %v3388_v2 = vpop.f32.mrb[72].mxu0  ;;  %v3434_v3 = vpop.f32.mrb[72].mxu1 }
 0x822   : > { %v3389_v4 = vadd.f32 %v4508_v0, %v3388_v2  ;;  %v3435_v6 = vadd.f32 %v4508_v0, %v3434_v3  ;;  %v4941_v7 = vpop.f32.mrb[73].mxu0  ;;  %v4947_v8 = vpop.f32.mrb[73].mxu1  ;;  %v3771_v3 = vsel %vm2209_vm3, %v1225_v60, 0 }
 0x823   : > { %v3391_v9 = vpop.f32.mrb[74].mxu0  ;;  %v3437_v10 = vpop.f32.mrb[74].mxu1 }
 0x824   : > { %v4942_v11 = vpop.f32.mrb[75].mxu0  ;;  %v4948_v12 = vpop.f32.mrb[75].mxu1  ;;  %v3536_v13 = vsel %vm3532_vm5, %v3435_v6, -inf  ;;  %v3533_v14 = vsel %vm3532_vm5, %v3389_v4, -inf }
 0x825   : > { %3537 = vmax.xlane.f32.xlu1 %v3536_v13  ;;  %3534 = vmax.xlane.f32.xlu0 %v3533_v14 }
 0x829   : > { %v3480_v15 = vpop.f32.mrb[76].mxu0  ;;  %v3526_v16 = vpop.f32.mrb[76].mxu1 }
 0x82a   : > { %v3481_v17 = vadd.f32 %v4508_v0, %v3480_v15  ;;  %v3527_v18 = vadd.f32 %v4508_v0, %v3526_v16  ;;  %v4953_v19 = vpop.f32.mrb[77].mxu0  ;;  %v4959_v20 = vpop.f32.mrb[77].mxu1  ;;  %v3825_v0 = vsel %vm2209_vm3, %v1226_v57, 0 }
 0x82b   : > { %v3483_v21 = vpop.f32.mrb[78].mxu0  ;;  %v3529_v22 = vpop.f32.mrb[78].mxu1 }
 0x82c   : > { %v4954_v23 = vpop.f32.mrb[79].mxu0  ;;  %v4960_v24 = vpop.f32.mrb[79].mxu1  ;;  %v3542_v25 = vsel %vm3532_vm5, %v3527_v18, -inf  ;;  %v3539_v26 = vsel %vm3532_vm5, %v3481_v17, -inf }
 0x82d   : > { %3543 = vmax.xlane.f32.xlu1 %v3542_v25  ;;  %3540 = vmax.xlane.f32.xlu0 %v3539_v26 }
 0x8b2   : > { %v3538_v27 = vpop.xlane.xlu1 %3537  ;;  %v3535_v28 = vpop.xlane.xlu0 %3534 }
 0x8b3   : > { %v3546_v29 = vsub.f32 %v3435_v6, %v3538_v27  ;;  %v3545_v30 = vsub.f32 %v3389_v4, %v3535_v28  ;;  %v1228_v4 = vld [vmem:[%s6156_s3 + $0xc] sm:$0xf]  ;;  %v1227_v6 = vld [vmem:[%s6156_s3 + $0x8] sm:$0xf]  ;;  %s6158_s3 = sld [smem:[#allocation30_spill]] }
 0x8b4   : > { %v3921_v11 = vsel %vm2209_vm3, %v1228_v4, 0  ;;  %v3873_v15 = vsel %vm2209_vm3, %v1227_v6, 0 }
 0x8b5   : > { %v3551_v31 = vmul.f32 1.442695, %v3546_v29  ;;  %v3549_v32 = vmul.f32 1.442695, %v3545_v30  ;;  %v4518_v29 = vld [vmem:[%s6157_s0] ss:$0 sm:$0xff] }
 0x8b6   : > { %s6159_s0 = sld [smem:[#allocation26_spill]] }
 0x8b7   : > { %5197 = vpow2.f32 %v3551_v31 }
 0x8b8   : > { %5199 = vpow2.f32 %v3549_v32 }
 0x8b9   : > { %v5174_v57 = vld [vmem:[%s6158_s3 + $0x8] sm:$0xff]  }
 0x8ba   : > { %v3544_v33 = vpop.xlane.xlu1 %3543  ;;  %v3541_v34 = vpop.xlane.xlu0 %3540 }
 0x8bb   : > { %v3548_v35 = vsub.f32 %v3527_v18, %v3544_v33  ;;  %v3547_v36 = vsub.f32 %v3481_v17, %v3541_v34 }
 0x8bd   : > { %v3555_v37 = vmul.f32 1.442695, %v3548_v35  ;;  %v3553_v38 = vmul.f32 1.442695, %v3547_v36 }
 0x8bf   : > { %5201 = vpow2.f32 %v3555_v37 }
 0x8c0   : > { %5203 = vpow2.f32 %v3553_v38 }
 0x8c1   : > { %v5198_v39 = vpop.eup %5197 }
 0x8c2   : > { %v5200_v40 = vpop.eup %5199  ;;  %v3560_v41 = vsel %vm3532_vm5, %v5198_v39, 0.0 }
 0x8c3   : > { %3561 = vadd.xlane.f32.xlu1 %v3560_v41  ;;  %v3557_v42 = vsel %vm3532_vm5, %v5200_v40, 0.0 }
 0x8c4   : > { %3558 = vadd.xlane.f32.xlu0 %v3557_v42 }
 0x8c9   : > { %v5202_v45 = vpop.eup %5201 }
 0x8ca   : > { %v5204_v46 = vpop.eup %5203  ;;  %v3566_v47 = vsel %vm3532_vm5, %v5202_v45, 0.0 }
 0x8cb   : > { %3567 = vadd.xlane.f32.xlu1 %v3566_v47  ;;  %v3563_v48 = vsel %vm3532_vm5, %v5204_v46, 0.0 }
 0x8cc   : > { %3564 = vadd.xlane.f32.xlu0 %v3563_v48 }
 0x950   : > { %v3562_v49 = vpop.xlane.xlu1 %3561 }
 0x951   : > { %5205 = vrcp.f32 %v3562_v49  ;;  %v3559_v50 = vpop.xlane.xlu0 %3558 }
 0x952   : > { %5207 = vrcp.f32 %v3559_v50 }
 0x958   : > { %v3568_v51 = vpop.xlane.xlu1 %3567 }
 0x959   : > { %5209 = vrcp.f32 %v3568_v51  ;;  %v3565_v43 = vpop.xlane.xlu0 %3564 }
 0x95a   : > { %5211 = vrcp.f32 %v3565_v43 }
 0x95b   : > { %v5206_v52 = vpop.eup %5205 }
 0x95c   : > { %v5208_v44 = vpop.eup %5207  ;;  %v3574_v53 = vmul.f32 %v5206_v52, %v5198_v39 }
 0x95d   : > { %v3573_v54 = vmul.f32 %v5208_v44, %v5200_v40 }
 0x95e   : > { %v3578_v55 = vpack.c.bf16 %v3574_v53, %v3574_v53  ;;  %4160 = vst.msk [vmem:[%s5941_s5 + $0x8] sm:$0xff] %vm3532_vm5, %v3574_v53 }
 0x95f   : > { %v3577_v5 = vpack.c.bf16 %v3573_v54, %v3573_v54  ;;  %4159 = vst.msk [vmem:[%s5941_s5] sm:$0xff] %vm3532_vm5, %v3573_v54 }
 0x960   : > { %4970 = vmatmul.mubr.msk.bf16.vlgmr.msra.gmra.mrb[80].mxu1 %vm3532_vm5, %v3578_v55 }
 0x961   : > { %4964 = vmatmul.mubr.msk.bf16.vlgmr.msra.gmra.mrb[80].mxu0 %vm3532_vm5, %v3577_v5  ;;  %4980 = vmatpush3.bf16.msra.mxu1 %v5925_v62 }
 0x962   : > { %4974 = vmatpush3.bf16.msra.mxu0 %v5922_v61  ;;  %4975 = vmatprep.mubr.msk.bf16.mxu0 %vm5362_vm0, %v5361_v1 }
 0x963   : > { %v5210_v56 = vpop.eup %5209  ;;  %4981 = vmatprep.mubr.msk.bf16.mxu1 %vm5362_vm0, %v5361_v1  ;;  %4985 = vmatprep.subr.bf16.mxu0 %v5361_v1 }
 0x964   : > { %v5212_v58 = vpop.eup %5211  ;;  %v3576_v59 = vmul.f32 %v5210_v56, %v5202_v45  ;;  %4991 = vmatprep.subr.bf16.mxu1 %v5361_v1  ;;  %v5173_v56 = vld [vmem:[%s6158_s3] sm:$0xff]   ;;  %s4169_s3 = scalar_lea.sflag [#allocation5], %s5938_s4 }
 0x965   : > { %v3575_v62 = vmul.f32 %v5212_v58, %v5204_v46  ;;  %v5176_v58 = vld [vmem:[%s6137_s20 + $0x8] sm:$0xff]  }
 0x966   : > { %v3580_v61 = vpack.c.bf16 %v3576_v59, %v3576_v59  ;;  %4162 = vst.msk [vmem:[%s5941_s5 + $0x18] sm:$0xff] %vm3532_vm5, %v3576_v59 }
 0x967   : > { %v3579_v2 = vpack.c.bf16 %v3575_v62, %v3575_v62  ;;  %4161 = vst.msk [vmem:[%s5941_s5 + $0x10] sm:$0xff] %vm3532_vm5, %v3575_v62 }
 0x968   : > { %4982 = vmatmul.mubr.msk.bf16.vlgmr.msra.gmra.mrb[84].mxu1 %vm3532_vm5, %v3580_v61 }
 0x969   : > { %4976 = vmatmul.mubr.msk.bf16.vlgmr.msra.gmra.mrb[84].mxu0 %vm3532_vm5, %v3579_v2  ;;  %4992 = vmatpush3.bf16.msra.mxu1 %v3825_v0  ;;  %v4522_v0 = vld [vmem:[%s6159_s0] ss:$0 sm:$0xff] }
 0x96a   : > { %4986 = vmatpush3.bf16.msra.mxu0 %v3771_v3  ;;  %4987 = vmatprep.mubr.msk.bf16.mxu0 %vm5362_vm0, %v5361_v1  ;;  %v4523_v3 = vld [vmem:[%s6160_s6] ss:$0 sm:$0xff]  ;;  %s4544_s6 = sshll.u32 %s5319_s7, 9 }
 0x96b   : > { %4993 = vmatprep.mubr.msk.bf16.mxu1 %vm5362_vm0, %v5361_v1  ;;  %4997 = vmatprep.subr.bf16.mxu0 %v5361_v1  ;;  %s6017_s0 = scalar_lea.hbm %s5535_s27, %s4544_s6 }
 0x96c   : > { %5003 = vmatprep.subr.bf16.mxu1 %v5361_v1 }
 0xa33   : > { %v3668_v7 = vpop.f32.mrb[80].mxu1 }
 0xa34   : > { %v3622_v8 = vpop.f32.mrb[80].mxu0  ;;  %v3820_v9 = vpack.c.bf16 %v3668_v7, %v3668_v7  ;;  %v4971_v10 = vpop.f32.mrb[81].mxu1 }
 0xa35   : > { %v3766_v12 = vpack.c.bf16 %v3622_v8, %v3622_v8  ;;  %v4965_v13 = vpop.f32.mrb[81].mxu0  ;;  %v3671_v14 = vpop.f32.mrb[82].mxu1  ;;  %v5177_v8 = vld [vmem:[%s6137_s20 + $0x10] sm:$0xff]   ;;  %v4524_v10 = vld [vmem:[%s6161_s8] ss:$0 sm:$0xff]  ;;  %s4197_s8 = sshll.u32 %s5941_s5, 4  ;;  %s6014_s8 = int_to_ptr.vmem [resolvable:$true] %s4197_s8 }
 0xa36   : > { %v3625_v16 = vpop.f32.mrb[82].mxu0  ;;  %v4972_v17 = vpop.f32.mrb[83].mxu1  ;;  %4994 = vmatmul.mubr.msk.bf16.vlgmr.msra.gmra.mrb[88].mxu1 %vm1973_vm2, %v3820_v9  ;;  %v5178_v9 = vld [vmem:[%s6137_s20 + $0x18] sm:$0xff]   ;;  %s5217_s9 = scalar_lea.vmem %s6014_s8, 512 }
 0xa37   : > { %v4966_v18 = vpop.f32.mrb[83].mxu0  ;;  %4988 = vmatmul.mubr.msk.bf16.vlgmr.msra.gmra.mrb[88].mxu0 %vm1973_vm2, %v3766_v12  ;;  %5004 = vmatpush3.bf16.msra.mxu1 %v3921_v11  ;;  %p5218_p12 = scmp.ne.s32.totalorder %s6014_s8, %s5217_s9 }
 0xa38   : > { %4998 = vmatpush3.bf16.msra.mxu0 %v3873_v15  ;;  %4999 = vmatprep.mubr.msk.bf16.mxu0 %vm5362_vm0, %v5361_v1  ;;  %v4528_v18 = vld [vmem:[%s6162_s13] ss:$0 sm:$0xff]  ;;  %s5363_s13 = smov [#allocation4]  }
 0xa39   : > { %5005 = vmatprep.mubr.msk.bf16.mxu1 %vm5362_vm0, %v5361_v1  ;;  %5009 = vmatprep.subr.bf16.mxu0 %v5361_v1  ;;  %p5219_p13 = pnand %p5218_p12, %p5577_p4  ;;  %s5221_s14 = sshll.u32 %s5363_s13, 4  ;;  %s5222_s14 = int_to_ptr.vmem [resolvable:$false] %s5221_s14 }
 0xa3a   : > { %5017 = vmatprep.subr.bf16.mxu1 %v5361_v1  ;;  %s5223_s15 = scalar_lea.vmem %s5222_s14, 1024  ;;  %p5224_p1 = scmp.lt.s32.totalorder %s6014_s8, %s5222_s14 }
 0xa3b   : > { %v3760_v19 = vpop.f32.mrb[84].mxu1  ;;  %p5220_p0 = pneg %p5219_p13  ;;  %p5225_p2 = scmp.lt.s32.totalorder %s5223_s15, %s5217_s9 }
 0xa3c   : > { %v3714_v20 = vpop.f32.mrb[84].mxu0  ;;  %v3916_v21 = vpack.c.bf16 %v3760_v19, %v3760_v19  ;;  %v4983_v22 = vpop.f32.mrb[85].mxu1 }
 0xa3d   : > { %v3868_v23 = vpack.c.bf16 %v3714_v20, %v3714_v20  ;;  %v4977_v24 = vpop.f32.mrb[85].mxu0  ;;  %v3763_v25 = vpop.f32.mrb[86].mxu1  ;;  %p5226_p3 = por %p5225_p2, %p5224_p1 }
 0xa3e   : > { %v3717_v26 = vpop.f32.mrb[86].mxu0  ;;  %v4984_v27 = vpop.f32.mrb[87].mxu1  ;;  %5006 = vmatmul.mubr.msk.bf16.vlgmr.msra.gmra.mrb[92].mxu1 %vm1973_vm2, %v3916_v21 }
 0xa3f   : > { %v4978_v28 = vpop.f32.mrb[87].mxu0  ;;  %5000 = vmatmul.mubr.msk.bf16.vlgmr.msra.gmra.mrb[92].mxu0 %vm1973_vm2, %v3868_v23  ;;  %5025 = vmatprep.mubr.msk.bf16.mxu1 %vm5362_vm0, %v5361_v1  ;;  %p5227_p5 = pnand %p5226_p3, %p5220_p0 }
 0xa40   : > { %5013 = vmatprep.mubr.msk.bf16.mxu0 %vm5362_vm0, %v5361_v1  ;;  %5010 = vmatpush3.bf16.msra.mxu0 %v5173_v56 }
 0xa41   : > { %5011 = vmatprep.subr.bf16.mxu0 %v5361_v1 }
 0xa44   : > { %5012 = vmatpush3.bf16.msra.mxu0 %v5174_v57 }
 0xb09   : > { %v3861_v30 = vpop.f32.mrb[88].mxu1 }
 0xb0a   : > { %v3807_v31 = vpop.f32.mrb[88].mxu0  ;;  %v4995_v32 = vpop.f32.mrb[89].mxu1 }
 0xb0b   : > { %v3819_v33 = vadd.f32 %v4518_v29, %v3807_v31  ;;  %v4989_v34 = vpop.f32.mrb[89].mxu0  ;;  %v3864_v35 = vpop.f32.mrb[90].mxu1 }
 0xb0c   : > { %v3810_v36 = vpop.f32.mrb[90].mxu0  ;;  %v4996_v37 = vpop.f32.mrb[91].mxu1 }
 0xb0d   : > { %v3867_v38 = vadd.f32 %v3861_v30, %v3819_v33  ;;  %v4990_v39 = vpop.f32.mrb[91].mxu0 }
 0xb11   : > { %v3957_v40 = vpop.f32.mrb[92].mxu1 }
 0xb12   : > { %v3909_v41 = vpop.f32.mrb[92].mxu0  ;;  %v5007_v42 = vpop.f32.mrb[93].mxu1 }
 0xb13   : > { %v3915_v45 = vadd.f32 %v3909_v41, %v3867_v38  ;;  %v5001_v46 = vpop.f32.mrb[93].mxu0  ;;  %v3960_v47 = vpop.f32.mrb[94].mxu1 }
 0xb14   : > { %v3912_v48 = vpop.f32.mrb[94].mxu0  ;;  %v5008_v49 = vpop.f32.mrb[95].mxu1 }
 0xb15   : > { %v3963_v50 = vadd.f32 %v3957_v40, %v3915_v45  ;;  %v5002_v51 = vpop.f32.mrb[95].mxu0 }
 0xb17   : > { %v3964_v43 = vadd.f32 %v3963_v50, %v5803_v63  ;;  %v5175_v63 = vld [vmem:[%s6137_s20] sm:$0xff]  }
 0xb18   : > { %5018 = vmatpush3.bf16.msra.mxu1 %v5175_v63 }
 0xb19   : > { %v3965_v52 = vsel %vm1276_vm1, %v3964_v43, 0.0  ;;  %5019 = vmatprep.subr.bf16.mxu1 %v5361_v1 }
 0xb1a   : > { %3966 = vadd.xlane.f32.xlu0 %v3965_v52 }
 0xb1c   : > { %5020 = vmatpush3.bf16.msra.mxu1 %v5176_v58 }
 0xb1d   : > { %5021 = vmatprep.subr.bf16.mxu1 %v5361_v1 }
 0xb20   : > { %5022 = vmatpush3.bf16.msra.mxu1 %v5177_v8 }
 0xb21   : > { %5023 = vmatprep.subr.bf16.mxu1 %v5361_v1 }
 0xb24   : > { %5024 = vmatpush3.bf16.msra.mxu1 %v5178_v9 }
 0xba7   : > { %v3967_v44 = vpop.xlane.xlu0 %3966 }
 0xba8   : > { %v3968_v53 = vmul.f32 0.03125, %v3967_v44 }
 0xbaa   : > { %v3969_v54 = vsub.f32 %v3964_v43, %v3968_v53 }
 0xbac   : > { %v3970_v55 = vmul.f32 %v3969_v54, %v3969_v54 }
 0xbae   : > { %v3971_v5 = vsel %vm1276_vm1, %v3970_v55, 0.0 }
 0xbaf   : > { %3972 = vadd.xlane.f32.xlu1 %v3971_v5 }
 0xc3c   : > { %v3973_v59 = vpop.xlane.xlu1 %3972 }
 0xc3d   : > { %v3974_v60 = vmul.f32 0.03125, %v3973_v59 }
 0xc3f   : > { %v3975_v62 = vadd.f32 1e-05, %v3974_v60 }
 0xc41   : > { %5213 = vrsqrt.f32 %v3975_v62 }
 0xc4b   : > { %v5214_v61 = vpop.eup %5213 }
 0xc4c   : > { %v3977_v2 = vmul.f32 %v5214_v61, %v3969_v54 }
 0xc4e   : > { %v3984_v4 = vmul.f32 %v4522_v0, %v3977_v2 }
 0xc50   : > { %v3991_v6 = vadd.f32 %v4523_v3, %v3984_v4 }
 0xc52   : > { %v3992_v7 = vpack.c.bf16 %v3991_v6, %v3991_v6 }
 0xc54   : > { %5014 = vmatmul.mubr.msk.bf16.vlgmr.msra.gmra.mrb[96].mxu0 %vm1276_vm1, %v3992_v7 }
 0xd27   : > { %v4048_v11 = vpop.f32.mrb[96].mxu0 }
 0xd28   : > { %v4049_v12 = vadd.f32 %v4524_v10, %v4048_v11  ;;  %v5015_v13 = vpop.f32.mrb[97].mxu0 }
 0xd29   : > { %v4051_v14 = vpop.f32.mrb[98].mxu0 }
 0xd2a   : > { %v4054_v15 = vmax.f32 %v4049_v12, 0.0  ;;  %v5016_v16 = vpop.f32.mrb[99].mxu0 }
 0xd2c   : > { %v4055_v17 = vpack.c.bf16 %v4054_v15, %v4054_v15 }
 0xd2e   : > { %5026 = vmatmul.mubr.msk.bf16.vlgmr.msra.gmra.mrb[96].mxu1 %vm4086_vm6, %v4055_v17 }
 0xe01   : > { %v4124_v19 = vpop.f32.mrb[96].mxu1 }
 0xe02   : > { %v4125_v20 = vadd.f32 %v4528_v18, %v4124_v19  ;;  %v5027_v21 = vpop.f32.mrb[97].mxu1 }
 0xe03   : > { %v4127_v1 = vpop.f32.mrb[98].mxu1 }
 0xe04   : > { %v5028_v22 = vpop.f32.mrb[99].mxu1  ;;  %v4130_v23 = vadd.f32 %v4125_v20, %v3991_v6 }
 0xe06   : > { %v4131_v24 = vsel %vm1276_vm1, %v4130_v23, 0.0 }
 0xe07   : > { %4132 = vadd.xlane.f32.xlu0 %v4131_v24 }
 0xe94   : > { %v4133_v25 = vpop.xlane.xlu0 %4132 }
 0xe95   : > { %v4134_v26 = vmul.f32 0.03125, %v4133_v25 }
 0xe97   : > { %v4135_v27 = vsub.f32 %v4130_v23, %v4134_v26 }
 0xe99   : > { %v4136_v28 = vmul.f32 %v4135_v27, %v4135_v27 }
 0xe9b   : > { %v4137_v29 = vsel %vm1276_vm1, %v4136_v28, 0.0 }
 0xe9c   : > { %4138 = vadd.xlane.f32.xlu1 %v4137_v29 }
 0xe9d   : > { %5230 = shalt.err (!%p5227_p5)
}
 0xe9e   : > { %s5231_s5 = scalar_lea.hbm %s6017_s0, 512  ;;  %s5235_s13 = scalar_lea.hbm %s5535_s27, 1024 }
 0xe9f   : > { %p5232_p6 = scmp.ne.s32.totalorder %s6017_s0, %s5231_s5  ;;  %p5236_p10 = scmp.lt.u32.totalorder %s6017_s0, %s5535_s27 }
 0xea0   : > { %p5237_p11 = scmp.lt.u32.totalorder %s5235_s13, %s5231_s5  ;;  %p5239_p13 = scmp.lt.u32.totalorder %s5231_s5, %s6017_s0 }
 0xea1   : > { %p5233_p7 = pnand %p5232_p6, %p5577_p4 }
 0xea2   : > { %p5238_p12 = por %p5237_p11, %p5236_p10 }
 0xea3   : > { %p5234_p9 = pneg %p5233_p7 }
 0xea4   : > { %p5240_p1 = por %p5239_p13, %p5238_p12 }
 0xea6   : > { %p5241_p0 = pnand %p5240_p1, %p5234_p9 }
 0xea8   : > { %5244 = shalt.err (!%p5241_p0)
}
 0xea9   : > { %s5364_s9 = smov 128   ;;  %s6163_s14 = sld [smem:[#allocation28_spill]] }
 0xeaa   : > { %s6164_s15 = sld [smem:[#allocation29_spill]]  ;;  %s5365_s6 = smov 8  }
 0xeab   : > { %s6165_s17 = sld [smem:[#allocation34_spill]]  ;;  %s4390_s5 = sshll.u32 %s5938_s4, 3 }
 0xeac   : > { %5030 = dma.vmem_to_hbm [thread:$0]  (%p5577_p4), %s6014_s8, 512, %s6017_s0, %s4169_s3, %s5364_s9, %s5364_s9, %s5365_s6  }
 0xead   : > { %s4538_s13 = sshll.u32 %s5319_s7, 7  ;;  %s1065_s18 = scalar_lea.vmem [#allocation2], %s4390_s5 }
 0xeae   : > { %s4183_s19 = sshll.u32 %s1065_s18, 4  ;;  %s4164_s3 = scalar_lea.sflag [#allocation3], %s5938_s4  ;;  %s6046_s19 = int_to_ptr.vmem [resolvable:$true] %s4183_s19 }
 0xeaf   : > { %v4534_v34 = vld [vmem:[%s6163_s14] ss:$0 sm:$0xff]  ;;  %s5245_s8 = scalar_lea.vmem %s6046_s19, 128  ;;  %s5366_s7 = smov [#allocation2]  }
 0xeb0   : > { %v4535_v36 = vld [vmem:[%s6164_s15] ss:$0 sm:$0xff]  ;;  %p5246_p2 = scmp.ne.s32.totalorder %s6046_s19, %s5245_s8  ;;  %s5249_s0 = sshll.u32 %s5366_s7, 4  ;;  %s5250_s0 = int_to_ptr.vmem [resolvable:$false] %s5249_s0 }
 0xeb1   : > { %s6044_s20 = scalar_lea.hbm %s6165_s17, %s4538_s13  ;;  %s5251_s9 = scalar_lea.vmem %s5250_s0, 256 }
 0xeb2   : > { %p5247_p3 = pnand %p5246_p2, %p5577_p4  ;;  %p5252_p6 = scmp.lt.s32.totalorder %s6046_s19, %s5250_s0 }
 0xeb3   : > { %p5253_p7 = scmp.lt.s32.totalorder %s5251_s9, %s5245_s8 }
 0xeb4   : > { %p5248_p5 = pneg %p5247_p3 }
 0xeb5   : > { %p5254_p9 = por %p5253_p7, %p5252_p6 }
 0xeb7   : > { %p5255_p10 = pnand %p5254_p9, %p5248_p5 }
 0xf29   : > { %v4139_v30 = vpop.xlane.xlu1 %4138 }
 0xf2a   : > { %v4140_v31 = vmul.f32 0.03125, %v4139_v30 }
 0xf2c   : > { %v4141_v32 = vadd.f32 1e-05, %v4140_v31 }
 0xf2e   : > { %5215 = vrsqrt.f32 %v4141_v32 }
 0xf38   : > { %v5216_v33 = vpop.eup %5215 }
 0xf39   : > { %v4143_v35 = vmul.f32 %v5216_v33, %v4135_v27 }
 0xf3b   : > { %v4150_v37 = vmul.f32 %v4534_v34, %v4143_v35 }
 0xf3d   : > { %v4157_v38 = vadd.f32 %v4535_v36, %v4150_v37 }
 0xf3f   : > { %4158 = vst.msk [vmem:[%s1065_s18] sm:$0xff] %vm1276_vm1, %v4157_v38 }
 0xf40   : > { %5258 = shalt.err (!%p5255_p10)
}
 0xf41   : > { %s5259_s18 = scalar_lea.hbm %s6044_s20, 128  ;;  %s5263_s4 = scalar_lea.hbm %s6165_s17, 256 }
 0xf42   : > { %p5260_p11 = scmp.ne.s32.totalorder %s6044_s20, %s5259_s18  ;;  %p5264_p1 = scmp.lt.u32.totalorder %s6044_s20, %s6165_s17 }
 0xf43   : > { %p5265_p0 = scmp.lt.u32.totalorder %s5263_s4, %s5259_s18  ;;  %p5267_p3 = scmp.lt.u32.totalorder %s5259_s18, %s6044_s20 }
 0xf44   : > { %p5261_p12 = pnand %p5260_p11, %p5577_p4 }
 0xf45   : > { %p5266_p2 = por %p5265_p0, %p5264_p1 }
 0xf46   : > { %p5262_p13 = pneg %p5261_p12 }
 0xf47   : > { %p5268_p6 = por %p5267_p3, %p5266_p2 }
 0xf49   : > { %p5269_p5 = pnand %p5268_p6, %p5262_p13 }
 0xf4b   : > { %5272 = shalt.err (!%p5269_p5)
}
 0xf4c   : > { %5029 = dma.vmem_to_hbm [thread:$0]  (%p5577_p4), %s6046_s19, 128, %s6044_s20, %s4164_s3  }
 0xf4d PF: > { %p5040_p7 = scmp.ge.s32.totalorder %s5327_s11, 2  ;;  %s4212_s14 = sand.u32 1, %s5307_s28  }
 0xf4e   : > { %s4213_s15 = scalar_lea.sflag [#allocation3], %s4212_s14 }
 0xf4f   : > { %p5034_p9 = pnand %p5040_p7, %p5584_p8 }
 0xf51   : > { %5298 = dma.done.wait (!%p5034_p9), %s4213_s15, 128  }
 0xf52   : > { %5300 = vsyncadd (!%p5034_p9), %s4213_s15, 4294967168  ;;  %s4222_s6 = scalar_lea.sflag [#allocation5], %s4212_s14 }
 0xf53   : > { %5302 = dma.done.wait (!%p5034_p9), %s4222_s6, 512  }
 0xf54   : > { %5304 = vsyncadd (!%p5034_p9), %s4222_s6, 4294966784  ;;  %s82_s11 = sadd.s32 1, %s5327_s11   ;;  %s6166_s28 = smov %s5311_s1 }
 0xf55   : > { %p79_p10 = scmp.ge.s32.totalorder %s82_s11, 4   ;;  %s6167_s1 = smov %s5315_s2 }
 0xf56   : > { %s6168_s2 = smov %s5590_s12  ;;  %s6169_s7 = smov %s5323_s10 }
 0xf57   : > { %s6170_s10 = smov %s6172_s16  ;;  %81 = sbr.rel (!%p79_p10) target bundleno = 73 (0x49), region = 240 }
 0xf5e   :  { %4227 = vsyncpa [#allocation3], 1 }
 0xf5f   :  { %4229 = vsyncpa [#allocation3 + $0x1], 1 }
 0xf60   :  { %4230 = vsyncpa [#allocation5], 1 }
 0xf61   :  { %4232 = vsyncpa [#allocation5 + $0x1], 1 }

</bundles_post_ra>
